<compile_context>
chip_gen: v7x
topology: tpu7x:2x2x1
jax: 0.10.0
libtpu: 0.0.40
codegen_flags: <defaults>
</compile_context>

<pallas_src>
import jax
import jax.numpy as jnp
from jax import lax
from jax.experimental import pallas as pl
from jax.experimental.pallas import tpu as pltpu


_TB_MAX = 256   # max rows gathered per grid step (output block sublane dim)
_NSLOTS = 16    # DMA copies in flight (slot count); multiple of 8 -> any tb is sublane-aligned
assert _TB_MAX % _NSLOTS == 0 and _NSLOTS % 8 == 0


def _round_up(x, m):
    return ((x + m - 1) // m) * m


def _make_row_gather_kernel(tb):
    """Build a kernel gathering `tb` table rows per grid step."""
    n_chunks = tb // _NSLOTS

    def kernel(idx_ref, table_ref, out_ref, sem):
        # idx_ref   : SMEM (n_blocks*tb,) int32  -- scalar-prefetched flat row ids
        # table_ref : HBM  (V, D)                -- memory_space=pl.ANY (never fully loaded)
        # out_ref   : VMEM (tb, D)               -- output block of grid step i
        # sem       : DMA semaphores (_NSLOTS,)
        base = pl.program_id(0) * tb

        def read_chunk(c):
            # All SMEM index reads for a chunk happen before any .wait() that follows
            # (avoids the sst->sld forwarding break on the issue path).
            off = base + c * _NSLOTS
            return [idx_ref[off + j] for j in range(_NSLOTS)]

        def copy(row, pos, slot):
            return pltpu.make_async_copy(table_ref.at[row], out_ref.at[pos], sem.at[slot])

        def start_chunk(c, rows):
            off = c * _NSLOTS
            for j in range(_NSLOTS):
                copy(rows[j], off + j, j).start()

        def wait_chunk(c, rows):
            off = c * _NSLOTS
            for j in range(_NSLOTS):
                copy(rows[j], off + j, j).wait()   # exact same descriptor as the start

        # Prologue: fill the DMA queue with chunk 0.
        start_chunk(0, read_chunk(0))

        # Steady state: for each slot, wait chunk c's copy then immediately refill the
        # slot with chunk c+1's copy -> ~_NSLOTS row-DMAs continuously in flight.
        def body(c, carry):
            cur = read_chunk(c)
            nxt = read_chunk(c + 1)
            off_cur = c * _NSLOTS
            off_nxt = (c + 1) * _NSLOTS
            for j in range(_NSLOTS):                       # inner loop fully unrolled
                copy(cur[j], off_cur + j, j).wait()
                copy(nxt[j], off_nxt + j, j).start()
            return carry

        lax.fori_loop(0, n_chunks - 1, body, 0)

        # Drain the last in-flight chunk.
        wait_chunk(n_chunks - 1, read_chunk(n_chunks - 1))

    return kernel


def pallas_row_gather(table, flat_idx):
    """table: (V, D) float; flat_idx: (R,) int  ->  (R, D) = table[flat_idx]."""
    V, D = table.shape
    R = int(flat_idx.shape[0])

    # Block size: as large as possible (amortizes ~0.35 us/step grid overhead and the
    # DMA warm-up/drain tail) but not pointlessly larger than the problem; always a
    # multiple of _NSLOTS (and hence of 8, the sublane size).
    tb = min(_TB_MAX, _round_up(R, _NSLOTS))
    n_blocks = pl.cdiv(R, tb)

    # Pad only the (tiny) index vector to full blocks so in-kernel SMEM reads of the
    # masked-out tail rows stay in bounds.  The OUTPUT is exactly (R, D): the partial
    # last block is masked on write-back, so no out[:R] slice copy is needed.
    idx = flat_idx.astype(jnp.int32)
    pad = n_blocks * tb - R
    if pad:
        idx = jnp.pad(idx, (0, pad))

    block_bytes = tb * D * table.dtype.itemsize
    out = pl.pallas_call(
        _make_row_gather_kernel(tb),
        out_shape=jax.ShapeDtypeStruct((R, D), table.dtype),
        grid_spec=pltpu.PrefetchScalarGridSpec(
            num_scalar_prefetch=1,                          # idx -> SMEM
            grid=(n_blocks,),
            in_specs=[pl.BlockSpec(memory_space=pl.ANY)],   # table stays in HBM
            out_specs=pl.BlockSpec((tb, D), lambda i, idx_ref: (i, 0)),
            scratch_shapes=[pltpu.SemaphoreType.DMA((_NSLOTS,))],
        ),
        compiler_params=pltpu.CompilerParams(
            # TODO(synk): on v7x, verify the trace actually splits blocks across the 2 TCs;
            # if not, add a leading CORE_PARALLEL axis of size 2.
            dimension_semantics=("parallel",),
            vmem_limit_bytes=min(60 * 2**20, max(32 * 2**20, 8 * block_bytes)),
        ),
    )(idx, table)
    return out


class KDManagerReversePallas:
    """JAX/Pallas re-implementation of KDManager_Reverse.forward."""

    def __init__(self, nentity, nrelation, entity_dim, origin_rel_dim,
                 target_dim, relation_mul, key):
        # TODO(synk): torch.load(pretrain_path) checkpoint restore replaced with
        # deterministic synthetic parameters (no file I/O allowed in-script).
        k1, k2, k3 = jax.random.split(key, 3)
        self.entity_embedding = jax.random.normal(
            k1, (nentity, entity_dim), dtype=jnp.float32)
        self.origin_relation_embedding = jax.random.normal(
            k2, (nrelation, origin_rel_dim), dtype=jnp.float32)
        rel_dim = target_dim * relation_mul
        bound = (6.0 / (nrelation + rel_dim)) ** 0.5        # xavier_uniform_
        self.relation_embedding = jax.random.uniform(
            k3, (nrelation, rel_dim), minval=-bound, maxval=bound,
            dtype=jnp.float32)

    def forward(self, sample):
        positive, negative = sample            # (B, 3) int32, (B, N) int32
        B, N = negative.shape

        # --- tail = [pos_tail | negatives]: the one large gather (B*(1+N) rows) ---
        tail_idx = jnp.concatenate([positive[:, 2:3], negative], axis=1)   # (B, 1+N)
        tail = pallas_row_gather(self.entity_embedding,
                                 tail_idx.reshape(-1)).reshape(B, 1 + N, -1)

        # --- head / relation / origin_relation: B-row lookups -> XLA gather ---
        head = jnp.take(self.entity_embedding, positive[:, 0], axis=0)[:, None, :]
        relation = jnp.take(self.relation_embedding, positive[:, 1], axis=0)[:, None, :]
        origin_relation = jnp.take(self.origin_relation_embedding,
                                   positive[:, 1], axis=0)[:, None, :]
        return head, relation, tail, origin_relation


def _reference_forward(mgr, sample):
    positive, negative = sample
    B, N = negative.shape
    neg_tail = jnp.take(mgr.entity_embedding, negative.reshape(-1),
                        axis=0).reshape(B, N, -1)
    pos_tail = jnp.take(mgr.entity_embedding, positive[:, 2], axis=0)[:, None, :]
    tail = jnp.concatenate([pos_tail, neg_tail], axis=1)
    head = jnp.take(mgr.entity_embedding, positive[:, 0], axis=0)[:, None, :]
    relation = jnp.take(mgr.relation_embedding, positive[:, 1], axis=0)[:, None, :]
    origin_relation = jnp.take(mgr.origin_relation_embedding,
                               positive[:, 1], axis=0)[:, None, :]
    return head, relation, tail, origin_relation


if __name__ == "__main__":
    key = jax.random.PRNGKey(0)
    k_param, k_pos, k_rel, k_neg = jax.random.split(key, 4)

    # Small synthetic config; negative_sample_size chosen so the tail gather spans
    # 2 grid blocks with a masked partial last block (4*(1+77)=312 rows, tb=256).
    nentity, nrelation = 500, 8
    entity_dim, origin_rel_dim = 128, 128
    target_dim, relation_mul = 32, 2
    batch, neg_size = 4, 77

    mgr = KDManagerReversePallas(nentity, nrelation, entity_dim,
                                 origin_rel_dim, target_dim, relation_mul,
                                 k_param)

    positive = jax.random.randint(
        k_pos, (batch, 3), 0, nentity, dtype=jnp.int32)
    positive = positive.at[:, 1].set(
        jax.random.randint(k_rel, (batch,), 0, nrelation, dtype=jnp.int32))
    negative = jax.random.randint(
        k_neg, (batch, neg_size), 0, nentity, dtype=jnp.int32)
    sample = (positive, negative)

    outs = jax.block_until_ready(mgr.forward(sample))

    refs = _reference_forward(mgr, sample)
    names = ("head", "relation", "tail", "origin_relation")
    for name, o, r in zip(names, outs, refs):
        assert o.shape == r.shape, (name, o.shape, r.shape)
        assert jnp.array_equal(o, r), name

    print("KERNEL_OK")
</pallas_src>

<mosaic_0001>
module attributes {stable_mosaic.version = 11 : i64} {
  func.func @kernel(%arg0: i32, %arg1: memref<512xi32, #tpu.memory_space<smem>>, %arg2: memref<500x128xf32, #tpu.memory_space<any>>, %arg3: memref<256x128xf32, #tpu.memory_space<vmem>>, %arg4: memref<16x!tpu.dma_semaphore, #tpu.memory_space<semaphore_mem>>) attributes {dimension_semantics = [#tpu.dimension_semantics<parallel>], iteration_bounds = array<i64: 2>, scalar_prefetch = 1 : i64, scratch_operands = 1 : i64, tpu.core_type = #tpu.core_type<tc>, window_params = [{}, {transform_indices = @transform_1, window_bounds = array<i64: 256, 128>}]} {
    %c256_i32 = arith.constant 256 : i32
    %0 = arith.muli %arg0, %c256_i32 : i32
    %c0_i32 = arith.constant 0 : i32
    %1 = arith.addi %0, %c0_i32 : i32
    %c0_i32_0 = arith.constant 0 : i32
    %2 = arith.addi %1, %c0_i32_0 : i32
    %3 = arith.index_cast %2 : i32 to index
    %4 = memref.load %arg1[%3] : memref<512xi32, #tpu.memory_space<smem>>
    %c1_i32 = arith.constant 1 : i32
    %5 = arith.addi %1, %c1_i32 : i32
    %6 = arith.index_cast %5 : i32 to index
    %7 = memref.load %arg1[%6] : memref<512xi32, #tpu.memory_space<smem>>
    %c2_i32 = arith.constant 2 : i32
    %8 = arith.addi %1, %c2_i32 : i32
    %9 = arith.index_cast %8 : i32 to index
    %10 = memref.load %arg1[%9] : memref<512xi32, #tpu.memory_space<smem>>
    %c3_i32 = arith.constant 3 : i32
    %11 = arith.addi %1, %c3_i32 : i32
    %12 = arith.index_cast %11 : i32 to index
    %13 = memref.load %arg1[%12] : memref<512xi32, #tpu.memory_space<smem>>
    %c4_i32 = arith.constant 4 : i32
    %14 = arith.addi %1, %c4_i32 : i32
    %15 = arith.index_cast %14 : i32 to index
    %16 = memref.load %arg1[%15] : memref<512xi32, #tpu.memory_space<smem>>
    %c5_i32 = arith.constant 5 : i32
    %17 = arith.addi %1, %c5_i32 : i32
    %18 = arith.index_cast %17 : i32 to index
    %19 = memref.load %arg1[%18] : memref<512xi32, #tpu.memory_space<smem>>
    %c6_i32 = arith.constant 6 : i32
    %20 = arith.addi %1, %c6_i32 : i32
    %21 = arith.index_cast %20 : i32 to index
    %22 = memref.load %arg1[%21] : memref<512xi32, #tpu.memory_space<smem>>
    %c7_i32 = arith.constant 7 : i32
    %23 = arith.addi %1, %c7_i32 : i32
    %24 = arith.index_cast %23 : i32 to index
    %25 = memref.load %arg1[%24] : memref<512xi32, #tpu.memory_space<smem>>
    %c8_i32 = arith.constant 8 : i32
    %26 = arith.addi %1, %c8_i32 : i32
    %27 = arith.index_cast %26 : i32 to index
    %28 = memref.load %arg1[%27] : memref<512xi32, #tpu.memory_space<smem>>
    %c9_i32 = arith.constant 9 : i32
    %29 = arith.addi %1, %c9_i32 : i32
    %30 = arith.index_cast %29 : i32 to index
    %31 = memref.load %arg1[%30] : memref<512xi32, #tpu.memory_space<smem>>
    %c10_i32 = arith.constant 10 : i32
    %32 = arith.addi %1, %c10_i32 : i32
    %33 = arith.index_cast %32 : i32 to index
    %34 = memref.load %arg1[%33] : memref<512xi32, #tpu.memory_space<smem>>
    %c11_i32 = arith.constant 11 : i32
    %35 = arith.addi %1, %c11_i32 : i32
    %36 = arith.index_cast %35 : i32 to index
    %37 = memref.load %arg1[%36] : memref<512xi32, #tpu.memory_space<smem>>
    %c12_i32 = arith.constant 12 : i32
    %38 = arith.addi %1, %c12_i32 : i32
    %39 = arith.index_cast %38 : i32 to index
    %40 = memref.load %arg1[%39] : memref<512xi32, #tpu.memory_space<smem>>
    %c13_i32 = arith.constant 13 : i32
    %41 = arith.addi %1, %c13_i32 : i32
    %42 = arith.index_cast %41 : i32 to index
    %43 = memref.load %arg1[%42] : memref<512xi32, #tpu.memory_space<smem>>
    %c14_i32 = arith.constant 14 : i32
    %44 = arith.addi %1, %c14_i32 : i32
    %45 = arith.index_cast %44 : i32 to index
    %46 = memref.load %arg1[%45] : memref<512xi32, #tpu.memory_space<smem>>
    %c15_i32 = arith.constant 15 : i32
    %47 = arith.addi %1, %c15_i32 : i32
    %48 = arith.index_cast %47 : i32 to index
    %49 = memref.load %arg1[%48] : memref<512xi32, #tpu.memory_space<smem>>
    %c0_i32_1 = arith.constant 0 : i32
    %c0_i32_2 = arith.constant 0 : i32
    %c0_i32_3 = arith.constant 0 : i32
    %50 = tpu.memref_slice %arg2[%4, %c0_i32_3] : memref<500x128xf32, #tpu.memory_space<any>> -> memref<1x128xf32, #tpu.memory_space<any>>
    %51 = tpu.memref_squeeze %50 : memref<1x128xf32, #tpu.memory_space<any>> -> memref<128xf32, #tpu.memory_space<any>>
    %c0_i32_4 = arith.constant 0 : i32
    %52 = tpu.memref_slice %arg3[%c0_i32_1, %c0_i32_4] : memref<256x128xf32, #tpu.memory_space<vmem>> -> memref<1x128xf32, #tpu.memory_space<vmem>>
    %53 = tpu.memref_squeeze %52 : memref<1x128xf32, #tpu.memory_space<vmem>> -> memref<128xf32, #tpu.memory_space<vmem>>
    %54 = tpu.memref_slice %arg4[%c0_i32_2] : memref<16x!tpu.dma_semaphore, #tpu.memory_space<semaphore_mem>> -> memref<1x!tpu.dma_semaphore, #tpu.memory_space<semaphore_mem>>
    %55 = tpu.memref_squeeze %54 : memref<1x!tpu.dma_semaphore, #tpu.memory_space<semaphore_mem>> -> memref<!tpu.dma_semaphore, #tpu.memory_space<semaphore_mem>>
    tpu.enqueue_dma source(%51 : memref<128xf32, #tpu.memory_space<any>>) target(%53 : memref<128xf32, #tpu.memory_space<vmem>>) target_semaphore(%55 : memref<!tpu.dma_semaphore, #tpu.memory_space<semaphore_mem>>)
    %c1_i32_5 = arith.constant 1 : i32
    %c1_i32_6 = arith.constant 1 : i32
    %c0_i32_7 = arith.constant 0 : i32
    %56 = tpu.memref_slice %arg2[%7, %c0_i32_7] : memref<500x128xf32, #tpu.memory_space<any>> -> memref<1x128xf32, #tpu.memory_space<any>>
    %57 = tpu.memref_squeeze %56 : memref<1x128xf32, #tpu.memory_space<any>> -> memref<128xf32, #tpu.memory_space<any>>
    %c0_i32_8 = arith.constant 0 : i32
    %58 = tpu.memref_slice %arg3[%c1_i32_5, %c0_i32_8] : memref<256x128xf32, #tpu.memory_space<vmem>> -> memref<1x128xf32, #tpu.memory_space<vmem>>
    %59 = tpu.memref_squeeze %58 : memref<1x128xf32, #tpu.memory_space<vmem>> -> memref<128xf32, #tpu.memory_space<vmem>>
    %60 = tpu.memref_slice %arg4[%c1_i32_6] : memref<16x!tpu.dma_semaphore, #tpu.memory_space<semaphore_mem>> -> memref<1x!tpu.dma_semaphore, #tpu.memory_space<semaphore_mem>>
    %61 = tpu.memref_squeeze %60 : memref<1x!tpu.dma_semaphore, #tpu.memory_space<semaphore_mem>> -> memref<!tpu.dma_semaphore, #tpu.memory_space<semaphore_mem>>
    tpu.enqueue_dma source(%57 : memref<128xf32, #tpu.memory_space<any>>) target(%59 : memref<128xf32, #tpu.memory_space<vmem>>) target_semaphore(%61 : memref<!tpu.dma_semaphore, #tpu.memory_space<semaphore_mem>>)
    %c2_i32_9 = arith.constant 2 : i32
    %c2_i32_10 = arith.constant 2 : i32
    %c0_i32_11 = arith.constant 0 : i32
    %62 = tpu.memref_slice %arg2[%10, %c0_i32_11] : memref<500x128xf32, #tpu.memory_space<any>> -> memref<1x128xf32, #tpu.memory_space<any>>
    %63 = tpu.memref_squeeze %62 : memref<1x128xf32, #tpu.memory_space<any>> -> memref<128xf32, #tpu.memory_space<any>>
    %c0_i32_12 = arith.constant 0 : i32
    %64 = tpu.memref_slice %arg3[%c2_i32_9, %c0_i32_12] : memref<256x128xf32, #tpu.memory_space<vmem>> -> memref<1x128xf32, #tpu.memory_space<vmem>>
    %65 = tpu.memref_squeeze %64 : memref<1x128xf32, #tpu.memory_space<vmem>> -> memref<128xf32, #tpu.memory_space<vmem>>
    %66 = tpu.memref_slice %arg4[%c2_i32_10] : memref<16x!tpu.dma_semaphore, #tpu.memory_space<semaphore_mem>> -> memref<1x!tpu.dma_semaphore, #tpu.memory_space<semaphore_mem>>
    %67 = tpu.memref_squeeze %66 : memref<1x!tpu.dma_semaphore, #tpu.memory_space<semaphore_mem>> -> memref<!tpu.dma_semaphore, #tpu.memory_space<semaphore_mem>>
    tpu.enqueue_dma source(%63 : memref<128xf32, #tpu.memory_space<any>>) target(%65 : memref<128xf32, #tpu.memory_space<vmem>>) target_semaphore(%67 : memref<!tpu.dma_semaphore, #tpu.memory_space<semaphore_mem>>)
    %c3_i32_13 = arith.constant 3 : i32
    %c3_i32_14 = arith.constant 3 : i32
    %c0_i32_15 = arith.constant 0 : i32
    %68 = tpu.memref_slice %arg2[%13, %c0_i32_15] : memref<500x128xf32, #tpu.memory_space<any>> -> memref<1x128xf32, #tpu.memory_space<any>>
    %69 = tpu.memref_squeeze %68 : memref<1x128xf32, #tpu.memory_space<any>> -> memref<128xf32, #tpu.memory_space<any>>
    %c0_i32_16 = arith.constant 0 : i32
    %70 = tpu.memref_slice %arg3[%c3_i32_13, %c0_i32_16] : memref<256x128xf32, #tpu.memory_space<vmem>> -> memref<1x128xf32, #tpu.memory_space<vmem>>
    %71 = tpu.memref_squeeze %70 : memref<1x128xf32, #tpu.memory_space<vmem>> -> memref<128xf32, #tpu.memory_space<vmem>>
    %72 = tpu.memref_slice %arg4[%c3_i32_14] : memref<16x!tpu.dma_semaphore, #tpu.memory_space<semaphore_mem>> -> memref<1x!tpu.dma_semaphore, #tpu.memory_space<semaphore_mem>>
    %73 = tpu.memref_squeeze %72 : memref<1x!tpu.dma_semaphore, #tpu.memory_space<semaphore_mem>> -> memref<!tpu.dma_semaphore, #tpu.memory_space<semaphore_mem>>
    tpu.enqueue_dma source(%69 : memref<128xf32, #tpu.memory_space<any>>) target(%71 : memref<128xf32, #tpu.memory_space<vmem>>) target_semaphore(%73 : memref<!tpu.dma_semaphore, #tpu.memory_space<semaphore_mem>>)
    %c4_i32_17 = arith.constant 4 : i32
    %c4_i32_18 = arith.constant 4 : i32
    %c0_i32_19 = arith.constant 0 : i32
    %74 = tpu.memref_slice %arg2[%16, %c0_i32_19] : memref<500x128xf32, #tpu.memory_space<any>> -> memref<1x128xf32, #tpu.memory_space<any>>
    %75 = tpu.memref_squeeze %74 : memref<1x128xf32, #tpu.memory_space<any>> -> memref<128xf32, #tpu.memory_space<any>>
    %c0_i32_20 = arith.constant 0 : i32
    %76 = tpu.memref_slice %arg3[%c4_i32_17, %c0_i32_20] : memref<256x128xf32, #tpu.memory_space<vmem>> -> memref<1x128xf32, #tpu.memory_space<vmem>>
    %77 = tpu.memref_squeeze %76 : memref<1x128xf32, #tpu.memory_space<vmem>> -> memref<128xf32, #tpu.memory_space<vmem>>
    %78 = tpu.memref_slice %arg4[%c4_i32_18] : memref<16x!tpu.dma_semaphore, #tpu.memory_space<semaphore_mem>> -> memref<1x!tpu.dma_semaphore, #tpu.memory_space<semaphore_mem>>
    %79 = tpu.memref_squeeze %78 : memref<1x!tpu.dma_semaphore, #tpu.memory_space<semaphore_mem>> -> memref<!tpu.dma_semaphore, #tpu.memory_space<semaphore_mem>>
    tpu.enqueue_dma source(%75 : memref<128xf32, #tpu.memory_space<any>>) target(%77 : memref<128xf32, #tpu.memory_space<vmem>>) target_semaphore(%79 : memref<!tpu.dma_semaphore, #tpu.memory_space<semaphore_mem>>)
    %c5_i32_21 = arith.constant 5 : i32
    %c5_i32_22 = arith.constant 5 : i32
    %c0_i32_23 = arith.constant 0 : i32
    %80 = tpu.memref_slice %arg2[%19, %c0_i32_23] : memref<500x128xf32, #tpu.memory_space<any>> -> memref<1x128xf32, #tpu.memory_space<any>>
    %81 = tpu.memref_squeeze %80 : memref<1x128xf32, #tpu.memory_space<any>> -> memref<128xf32, #tpu.memory_space<any>>
    %c0_i32_24 = arith.constant 0 : i32
    %82 = tpu.memref_slice %arg3[%c5_i32_21, %c0_i32_24] : memref<256x128xf32, #tpu.memory_space<vmem>> -> memref<1x128xf32, #tpu.memory_space<vmem>>
    %83 = tpu.memref_squeeze %82 : memref<1x128xf32, #tpu.memory_space<vmem>> -> memref<128xf32, #tpu.memory_space<vmem>>
    %84 = tpu.memref_slice %arg4[%c5_i32_22] : memref<16x!tpu.dma_semaphore, #tpu.memory_space<semaphore_mem>> -> memref<1x!tpu.dma_semaphore, #tpu.memory_space<semaphore_mem>>
    %85 = tpu.memref_squeeze %84 : memref<1x!tpu.dma_semaphore, #tpu.memory_space<semaphore_mem>> -> memref<!tpu.dma_semaphore, #tpu.memory_space<semaphore_mem>>
    tpu.enqueue_dma source(%81 : memref<128xf32, #tpu.memory_space<any>>) target(%83 : memref<128xf32, #tpu.memory_space<vmem>>) target_semaphore(%85 : memref<!tpu.dma_semaphore, #tpu.memory_space<semaphore_mem>>)
    %c6_i32_25 = arith.constant 6 : i32
    %c6_i32_26 = arith.constant 6 : i32
    %c0_i32_27 = arith.constant 0 : i32
    %86 = tpu.memref_slice %arg2[%22, %c0_i32_27] : memref<500x128xf32, #tpu.memory_space<any>> -> memref<1x128xf32, #tpu.memory_space<any>>
    %87 = tpu.memref_squeeze %86 : memref<1x128xf32, #tpu.memory_space<any>> -> memref<128xf32, #tpu.memory_space<any>>
    %c0_i32_28 = arith.constant 0 : i32
    %88 = tpu.memref_slice %arg3[%c6_i32_25, %c0_i32_28] : memref<256x128xf32, #tpu.memory_space<vmem>> -> memref<1x128xf32, #tpu.memory_space<vmem>>
    %89 = tpu.memref_squeeze %88 : memref<1x128xf32, #tpu.memory_space<vmem>> -> memref<128xf32, #tpu.memory_space<vmem>>
    %90 = tpu.memref_slice %arg4[%c6_i32_26] : memref<16x!tpu.dma_semaphore, #tpu.memory_space<semaphore_mem>> -> memref<1x!tpu.dma_semaphore, #tpu.memory_space<semaphore_mem>>
    %91 = tpu.memref_squeeze %90 : memref<1x!tpu.dma_semaphore, #tpu.memory_space<semaphore_mem>> -> memref<!tpu.dma_semaphore, #tpu.memory_space<semaphore_mem>>
    tpu.enqueue_dma source(%87 : memref<128xf32, #tpu.memory_space<any>>) target(%89 : memref<128xf32, #tpu.memory_space<vmem>>) target_semaphore(%91 : memref<!tpu.dma_semaphore, #tpu.memory_space<semaphore_mem>>)
    %c7_i32_29 = arith.constant 7 : i32
    %c7_i32_30 = arith.constant 7 : i32
    %c0_i32_31 = arith.constant 0 : i32
    %92 = tpu.memref_slice %arg2[%25, %c0_i32_31] : memref<500x128xf32, #tpu.memory_space<any>> -> memref<1x128xf32, #tpu.memory_space<any>>
    %93 = tpu.memref_squeeze %92 : memref<1x128xf32, #tpu.memory_space<any>> -> memref<128xf32, #tpu.memory_space<any>>
    %c0_i32_32 = arith.constant 0 : i32
    %94 = tpu.memref_slice %arg3[%c7_i32_29, %c0_i32_32] : memref<256x128xf32, #tpu.memory_space<vmem>> -> memref<1x128xf32, #tpu.memory_space<vmem>>
    %95 = tpu.memref_squeeze %94 : memref<1x128xf32, #tpu.memory_space<vmem>> -> memref<128xf32, #tpu.memory_space<vmem>>
    %96 = tpu.memref_slice %arg4[%c7_i32_30] : memref<16x!tpu.dma_semaphore, #tpu.memory_space<semaphore_mem>> -> memref<1x!tpu.dma_semaphore, #tpu.memory_space<semaphore_mem>>
    %97 = tpu.memref_squeeze %96 : memref<1x!tpu.dma_semaphore, #tpu.memory_space<semaphore_mem>> -> memref<!tpu.dma_semaphore, #tpu.memory_space<semaphore_mem>>
    tpu.enqueue_dma source(%93 : memref<128xf32, #tpu.memory_space<any>>) target(%95 : memref<128xf32, #tpu.memory_space<vmem>>) target_semaphore(%97 : memref<!tpu.dma_semaphore, #tpu.memory_space<semaphore_mem>>)
    %c8_i32_33 = arith.constant 8 : i32
    %c8_i32_34 = arith.constant 8 : i32
    %c0_i32_35 = arith.constant 0 : i32
    %98 = tpu.memref_slice %arg2[%28, %c0_i32_35] : memref<500x128xf32, #tpu.memory_space<any>> -> memref<1x128xf32, #tpu.memory_space<any>>
    %99 = tpu.memref_squeeze %98 : memref<1x128xf32, #tpu.memory_space<any>> -> memref<128xf32, #tpu.memory_space<any>>
    %c0_i32_36 = arith.constant 0 : i32
    %100 = tpu.memref_slice %arg3[%c8_i32_33, %c0_i32_36] : memref<256x128xf32, #tpu.memory_space<vmem>> -> memref<1x128xf32, #tpu.memory_space<vmem>>
    %101 = tpu.memref_squeeze %100 : memref<1x128xf32, #tpu.memory_space<vmem>> -> memref<128xf32, #tpu.memory_space<vmem>>
    %102 = tpu.memref_slice %arg4[%c8_i32_34] : memref<16x!tpu.dma_semaphore, #tpu.memory_space<semaphore_mem>> -> memref<1x!tpu.dma_semaphore, #tpu.memory_space<semaphore_mem>>
    %103 = tpu.memref_squeeze %102 : memref<1x!tpu.dma_semaphore, #tpu.memory_space<semaphore_mem>> -> memref<!tpu.dma_semaphore, #tpu.memory_space<semaphore_mem>>
    tpu.enqueue_dma source(%99 : memref<128xf32, #tpu.memory_space<any>>) target(%101 : memref<128xf32, #tpu.memory_space<vmem>>) target_semaphore(%103 : memref<!tpu.dma_semaphore, #tpu.memory_space<semaphore_mem>>)
    %c9_i32_37 = arith.constant 9 : i32
    %c9_i32_38 = arith.constant 9 : i32
    %c0_i32_39 = arith.constant 0 : i32
    %104 = tpu.memref_slice %arg2[%31, %c0_i32_39] : memref<500x128xf32, #tpu.memory_space<any>> -> memref<1x128xf32, #tpu.memory_space<any>>
    %105 = tpu.memref_squeeze %104 : memref<1x128xf32, #tpu.memory_space<any>> -> memref<128xf32, #tpu.memory_space<any>>
    %c0_i32_40 = arith.constant 0 : i32
    %106 = tpu.memref_slice %arg3[%c9_i32_37, %c0_i32_40] : memref<256x128xf32, #tpu.memory_space<vmem>> -> memref<1x128xf32, #tpu.memory_space<vmem>>
    %107 = tpu.memref_squeeze %106 : memref<1x128xf32, #tpu.memory_space<vmem>> -> memref<128xf32, #tpu.memory_space<vmem>>
    %108 = tpu.memref_slice %arg4[%c9_i32_38] : memref<16x!tpu.dma_semaphore, #tpu.memory_space<semaphore_mem>> -> memref<1x!tpu.dma_semaphore, #tpu.memory_space<semaphore_mem>>
    %109 = tpu.memref_squeeze %108 : memref<1x!tpu.dma_semaphore, #tpu.memory_space<semaphore_mem>> -> memref<!tpu.dma_semaphore, #tpu.memory_space<semaphore_mem>>
    tpu.enqueue_dma source(%105 : memref<128xf32, #tpu.memory_space<any>>) target(%107 : memref<128xf32, #tpu.memory_space<vmem>>) target_semaphore(%109 : memref<!tpu.dma_semaphore, #tpu.memory_space<semaphore_mem>>)
    %c10_i32_41 = arith.constant 10 : i32
    %c10_i32_42 = arith.constant 10 : i32
    %c0_i32_43 = arith.constant 0 : i32
    %110 = tpu.memref_slice %arg2[%34, %c0_i32_43] : memref<500x128xf32, #tpu.memory_space<any>> -> memref<1x128xf32, #tpu.memory_space<any>>
    %111 = tpu.memref_squeeze %110 : memref<1x128xf32, #tpu.memory_space<any>> -> memref<128xf32, #tpu.memory_space<any>>
    %c0_i32_44 = arith.constant 0 : i32
    %112 = tpu.memref_slice %arg3[%c10_i32_41, %c0_i32_44] : memref<256x128xf32, #tpu.memory_space<vmem>> -> memref<1x128xf32, #tpu.memory_space<vmem>>
    %113 = tpu.memref_squeeze %112 : memref<1x128xf32, #tpu.memory_space<vmem>> -> memref<128xf32, #tpu.memory_space<vmem>>
    %114 = tpu.memref_slice %arg4[%c10_i32_42] : memref<16x!tpu.dma_semaphore, #tpu.memory_space<semaphore_mem>> -> memref<1x!tpu.dma_semaphore, #tpu.memory_space<semaphore_mem>>
    %115 = tpu.memref_squeeze %114 : memref<1x!tpu.dma_semaphore, #tpu.memory_space<semaphore_mem>> -> memref<!tpu.dma_semaphore, #tpu.memory_space<semaphore_mem>>
    tpu.enqueue_dma source(%111 : memref<128xf32, #tpu.memory_space<any>>) target(%113 : memref<128xf32, #tpu.memory_space<vmem>>) target_semaphore(%115 : memref<!tpu.dma_semaphore, #tpu.memory_space<semaphore_mem>>)
    %c11_i32_45 = arith.constant 11 : i32
    %c11_i32_46 = arith.constant 11 : i32
    %c0_i32_47 = arith.constant 0 : i32
    %116 = tpu.memref_slice %arg2[%37, %c0_i32_47] : memref<500x128xf32, #tpu.memory_space<any>> -> memref<1x128xf32, #tpu.memory_space<any>>
    %117 = tpu.memref_squeeze %116 : memref<1x128xf32, #tpu.memory_space<any>> -> memref<128xf32, #tpu.memory_space<any>>
    %c0_i32_48 = arith.constant 0 : i32
    %118 = tpu.memref_slice %arg3[%c11_i32_45, %c0_i32_48] : memref<256x128xf32, #tpu.memory_space<vmem>> -> memref<1x128xf32, #tpu.memory_space<vmem>>
    %119 = tpu.memref_squeeze %118 : memref<1x128xf32, #tpu.memory_space<vmem>> -> memref<128xf32, #tpu.memory_space<vmem>>
    %120 = tpu.memref_slice %arg4[%c11_i32_46] : memref<16x!tpu.dma_semaphore, #tpu.memory_space<semaphore_mem>> -> memref<1x!tpu.dma_semaphore, #tpu.memory_space<semaphore_mem>>
    %121 = tpu.memref_squeeze %120 : memref<1x!tpu.dma_semaphore, #tpu.memory_space<semaphore_mem>> -> memref<!tpu.dma_semaphore, #tpu.memory_space<semaphore_mem>>
    tpu.enqueue_dma source(%117 : memref<128xf32, #tpu.memory_space<any>>) target(%119 : memref<128xf32, #tpu.memory_space<vmem>>) target_semaphore(%121 : memref<!tpu.dma_semaphore, #tpu.memory_space<semaphore_mem>>)
    %c12_i32_49 = arith.constant 12 : i32
    %c12_i32_50 = arith.constant 12 : i32
    %c0_i32_51 = arith.constant 0 : i32
    %122 = tpu.memref_slice %arg2[%40, %c0_i32_51] : memref<500x128xf32, #tpu.memory_space<any>> -> memref<1x128xf32, #tpu.memory_space<any>>
    %123 = tpu.memref_squeeze %122 : memref<1x128xf32, #tpu.memory_space<any>> -> memref<128xf32, #tpu.memory_space<any>>
    %c0_i32_52 = arith.constant 0 : i32
    %124 = tpu.memref_slice %arg3[%c12_i32_49, %c0_i32_52] : memref<256x128xf32, #tpu.memory_space<vmem>> -> memref<1x128xf32, #tpu.memory_space<vmem>>
    %125 = tpu.memref_squeeze %124 : memref<1x128xf32, #tpu.memory_space<vmem>> -> memref<128xf32, #tpu.memory_space<vmem>>
    %126 = tpu.memref_slice %arg4[%c12_i32_50] : memref<16x!tpu.dma_semaphore, #tpu.memory_space<semaphore_mem>> -> memref<1x!tpu.dma_semaphore, #tpu.memory_space<semaphore_mem>>
    %127 = tpu.memref_squeeze %126 : memref<1x!tpu.dma_semaphore, #tpu.memory_space<semaphore_mem>> -> memref<!tpu.dma_semaphore, #tpu.memory_space<semaphore_mem>>
    tpu.enqueue_dma source(%123 : memref<128xf32, #tpu.memory_space<any>>) target(%125 : memref<128xf32, #tpu.memory_space<vmem>>) target_semaphore(%127 : memref<!tpu.dma_semaphore, #tpu.memory_space<semaphore_mem>>)
    %c13_i32_53 = arith.constant 13 : i32
    %c13_i32_54 = arith.constant 13 : i32
    %c0_i32_55 = arith.constant 0 : i32
    %128 = tpu.memref_slice %arg2[%43, %c0_i32_55] : memref<500x128xf32, #tpu.memory_space<any>> -> memref<1x128xf32, #tpu.memory_space<any>>
    %129 = tpu.memref_squeeze %128 : memref<1x128xf32, #tpu.memory_space<any>> -> memref<128xf32, #tpu.memory_space<any>>
    %c0_i32_56 = arith.constant 0 : i32
    %130 = tpu.memref_slice %arg3[%c13_i32_53, %c0_i32_56] : memref<256x128xf32, #tpu.memory_space<vmem>> -> memref<1x128xf32, #tpu.memory_space<vmem>>
    %131 = tpu.memref_squeeze %130 : memref<1x128xf32, #tpu.memory_space<vmem>> -> memref<128xf32, #tpu.memory_space<vmem>>
    %132 = tpu.memref_slice %arg4[%c13_i32_54] : memref<16x!tpu.dma_semaphore, #tpu.memory_space<semaphore_mem>> -> memref<1x!tpu.dma_semaphore, #tpu.memory_space<semaphore_mem>>
    %133 = tpu.memref_squeeze %132 : memref<1x!tpu.dma_semaphore, #tpu.memory_space<semaphore_mem>> -> memref<!tpu.dma_semaphore, #tpu.memory_space<semaphore_mem>>
    tpu.enqueue_dma source(%129 : memref<128xf32, #tpu.memory_space<any>>) target(%131 : memref<128xf32, #tpu.memory_space<vmem>>) target_semaphore(%133 : memref<!tpu.dma_semaphore, #tpu.memory_space<semaphore_mem>>)
    %c14_i32_57 = arith.constant 14 : i32
    %c14_i32_58 = arith.constant 14 : i32
    %c0_i32_59 = arith.constant 0 : i32
    %134 = tpu.memref_slice %arg2[%46, %c0_i32_59] : memref<500x128xf32, #tpu.memory_space<any>> -> memref<1x128xf32, #tpu.memory_space<any>>
    %135 = tpu.memref_squeeze %134 : memref<1x128xf32, #tpu.memory_space<any>> -> memref<128xf32, #tpu.memory_space<any>>
    %c0_i32_60 = arith.constant 0 : i32
    %136 = tpu.memref_slice %arg3[%c14_i32_57, %c0_i32_60] : memref<256x128xf32, #tpu.memory_space<vmem>> -> memref<1x128xf32, #tpu.memory_space<vmem>>
    %137 = tpu.memref_squeeze %136 : memref<1x128xf32, #tpu.memory_space<vmem>> -> memref<128xf32, #tpu.memory_space<vmem>>
    %138 = tpu.memref_slice %arg4[%c14_i32_58] : memref<16x!tpu.dma_semaphore, #tpu.memory_space<semaphore_mem>> -> memref<1x!tpu.dma_semaphore, #tpu.memory_space<semaphore_mem>>
    %139 = tpu.memref_squeeze %138 : memref<1x!tpu.dma_semaphore, #tpu.memory_space<semaphore_mem>> -> memref<!tpu.dma_semaphore, #tpu.memory_space<semaphore_mem>>
    tpu.enqueue_dma source(%135 : memref<128xf32, #tpu.memory_space<any>>) target(%137 : memref<128xf32, #tpu.memory_space<vmem>>) target_semaphore(%139 : memref<!tpu.dma_semaphore, #tpu.memory_space<semaphore_mem>>)
    %c15_i32_61 = arith.constant 15 : i32
    %c15_i32_62 = arith.constant 15 : i32
    %c0_i32_63 = arith.constant 0 : i32
    %140 = tpu.memref_slice %arg2[%49, %c0_i32_63] : memref<500x128xf32, #tpu.memory_space<any>> -> memref<1x128xf32, #tpu.memory_space<any>>
    %141 = tpu.memref_squeeze %140 : memref<1x128xf32, #tpu.memory_space<any>> -> memref<128xf32, #tpu.memory_space<any>>
    %c0_i32_64 = arith.constant 0 : i32
    %142 = tpu.memref_slice %arg3[%c15_i32_61, %c0_i32_64] : memref<256x128xf32, #tpu.memory_space<vmem>> -> memref<1x128xf32, #tpu.memory_space<vmem>>
    %143 = tpu.memref_squeeze %142 : memref<1x128xf32, #tpu.memory_space<vmem>> -> memref<128xf32, #tpu.memory_space<vmem>>
    %144 = tpu.memref_slice %arg4[%c15_i32_62] : memref<16x!tpu.dma_semaphore, #tpu.memory_space<semaphore_mem>> -> memref<1x!tpu.dma_semaphore, #tpu.memory_space<semaphore_mem>>
    %145 = tpu.memref_squeeze %144 : memref<1x!tpu.dma_semaphore, #tpu.memory_space<semaphore_mem>> -> memref<!tpu.dma_semaphore, #tpu.memory_space<semaphore_mem>>
    tpu.enqueue_dma source(%141 : memref<128xf32, #tpu.memory_space<any>>) target(%143 : memref<128xf32, #tpu.memory_space<vmem>>) target_semaphore(%145 : memref<!tpu.dma_semaphore, #tpu.memory_space<semaphore_mem>>)
    %c0_i32_65 = arith.constant 0 : i32
    %c15_i32_66 = arith.constant 15 : i32
    %146 = arith.addi %c0_i32_65, %c15_i32_66 : i32
    %c1_i32_67 = arith.constant 1 : i32
    scf.for %arg5 = %c0_i32_65 to %146 step %c1_i32_67  : i32 {
      %c16_i32 = arith.constant 16 : i32
      %292 = arith.muli %arg5, %c16_i32 : i32
      %293 = arith.addi %0, %292 : i32
      %c0_i32_134 = arith.constant 0 : i32
      %294 = arith.addi %293, %c0_i32_134 : i32
      %295 = arith.index_cast %294 : i32 to index
      %296 = memref.load %arg1[%295] : memref<512xi32, #tpu.memory_space<smem>>
      %c1_i32_135 = arith.constant 1 : i32
      %297 = arith.addi %293, %c1_i32_135 : i32
      %298 = arith.index_cast %297 : i32 to index
      %299 = memref.load %arg1[%298] : memref<512xi32, #tpu.memory_space<smem>>
      %c2_i32_136 = arith.constant 2 : i32
      %300 = arith.addi %293, %c2_i32_136 : i32
      %301 = arith.index_cast %300 : i32 to index
      %302 = memref.load %arg1[%301] : memref<512xi32, #tpu.memory_space<smem>>
      %c3_i32_137 = arith.constant 3 : i32
      %303 = arith.addi %293, %c3_i32_137 : i32
      %304 = arith.index_cast %303 : i32 to index
      %305 = memref.load %arg1[%304] : memref<512xi32, #tpu.memory_space<smem>>
      %c4_i32_138 = arith.constant 4 : i32
      %306 = arith.addi %293, %c4_i32_138 : i32
      %307 = arith.index_cast %306 : i32 to index
      %308 = memref.load %arg1[%307] : memref<512xi32, #tpu.memory_space<smem>>
      %c5_i32_139 = arith.constant 5 : i32
      %309 = arith.addi %293, %c5_i32_139 : i32
      %310 = arith.index_cast %309 : i32 to index
      %311 = memref.load %arg1[%310] : memref<512xi32, #tpu.memory_space<smem>>
      %c6_i32_140 = arith.constant 6 : i32
      %312 = arith.addi %293, %c6_i32_140 : i32
      %313 = arith.index_cast %312 : i32 to index
      %314 = memref.load %arg1[%313] : memref<512xi32, #tpu.memory_space<smem>>
      %c7_i32_141 = arith.constant 7 : i32
      %315 = arith.addi %293, %c7_i32_141 : i32
      %316 = arith.index_cast %315 : i32 to index
      %317 = memref.load %arg1[%316] : memref<512xi32, #tpu.memory_space<smem>>
      %c8_i32_142 = arith.constant 8 : i32
      %318 = arith.addi %293, %c8_i32_142 : i32
      %319 = arith.index_cast %318 : i32 to index
      %320 = memref.load %arg1[%319] : memref<512xi32, #tpu.memory_space<smem>>
      %c9_i32_143 = arith.constant 9 : i32
      %321 = arith.addi %293, %c9_i32_143 : i32
      %322 = arith.index_cast %321 : i32 to index
      %323 = memref.load %arg1[%322] : memref<512xi32, #tpu.memory_space<smem>>
      %c10_i32_144 = arith.constant 10 : i32
      %324 = arith.addi %293, %c10_i32_144 : i32
      %325 = arith.index_cast %324 : i32 to index
      %326 = memref.load %arg1[%325] : memref<512xi32, #tpu.memory_space<smem>>
      %c11_i32_145 = arith.constant 11 : i32
      %327 = arith.addi %293, %c11_i32_145 : i32
      %328 = arith.index_cast %327 : i32 to index
      %329 = memref.load %arg1[%328] : memref<512xi32, #tpu.memory_space<smem>>
      %c12_i32_146 = arith.constant 12 : i32
      %330 = arith.addi %293, %c12_i32_146 : i32
      %331 = arith.index_cast %330 : i32 to index
      %332 = memref.load %arg1[%331] : memref<512xi32, #tpu.memory_space<smem>>
      %c13_i32_147 = arith.constant 13 : i32
      %333 = arith.addi %293, %c13_i32_147 : i32
      %334 = arith.index_cast %333 : i32 to index
      %335 = memref.load %arg1[%334] : memref<512xi32, #tpu.memory_space<smem>>
      %c14_i32_148 = arith.constant 14 : i32
      %336 = arith.addi %293, %c14_i32_148 : i32
      %337 = arith.index_cast %336 : i32 to index
      %338 = memref.load %arg1[%337] : memref<512xi32, #tpu.memory_space<smem>>
      %c15_i32_149 = arith.constant 15 : i32
      %339 = arith.addi %293, %c15_i32_149 : i32
      %340 = arith.index_cast %339 : i32 to index
      %341 = memref.load %arg1[%340] : memref<512xi32, #tpu.memory_space<smem>>
      %c1_i32_150 = arith.constant 1 : i32
      %342 = arith.addi %arg5, %c1_i32_150 : i32
      %c16_i32_151 = arith.constant 16 : i32
      %343 = arith.muli %342, %c16_i32_151 : i32
      %344 = arith.addi %0, %343 : i32
      %c0_i32_152 = arith.constant 0 : i32
      %345 = arith.addi %344, %c0_i32_152 : i32
      %346 = arith.index_cast %345 : i32 to index
      %347 = memref.load %arg1[%346] : memref<512xi32, #tpu.memory_space<smem>>
      %c1_i32_153 = arith.constant 1 : i32
      %348 = arith.addi %344, %c1_i32_153 : i32
      %349 = arith.index_cast %348 : i32 to index
      %350 = memref.load %arg1[%349] : memref<512xi32, #tpu.memory_space<smem>>
      %c2_i32_154 = arith.constant 2 : i32
      %351 = arith.addi %344, %c2_i32_154 : i32
      %352 = arith.index_cast %351 : i32 to index
      %353 = memref.load %arg1[%352] : memref<512xi32, #tpu.memory_space<smem>>
      %c3_i32_155 = arith.constant 3 : i32
      %354 = arith.addi %344, %c3_i32_155 : i32
      %355 = arith.index_cast %354 : i32 to index
      %356 = memref.load %arg1[%355] : memref<512xi32, #tpu.memory_space<smem>>
      %c4_i32_156 = arith.constant 4 : i32
      %357 = arith.addi %344, %c4_i32_156 : i32
      %358 = arith.index_cast %357 : i32 to index
      %359 = memref.load %arg1[%358] : memref<512xi32, #tpu.memory_space<smem>>
      %c5_i32_157 = arith.constant 5 : i32
      %360 = arith.addi %344, %c5_i32_157 : i32
      %361 = arith.index_cast %360 : i32 to index
      %362 = memref.load %arg1[%361] : memref<512xi32, #tpu.memory_space<smem>>
      %c6_i32_158 = arith.constant 6 : i32
      %363 = arith.addi %344, %c6_i32_158 : i32
      %364 = arith.index_cast %363 : i32 to index
      %365 = memref.load %arg1[%364] : memref<512xi32, #tpu.memory_space<smem>>
      %c7_i32_159 = arith.constant 7 : i32
      %366 = arith.addi %344, %c7_i32_159 : i32
      %367 = arith.index_cast %366 : i32 to index
      %368 = memref.load %arg1[%367] : memref<512xi32, #tpu.memory_space<smem>>
      %c8_i32_160 = arith.constant 8 : i32
      %369 = arith.addi %344, %c8_i32_160 : i32
      %370 = arith.index_cast %369 : i32 to index
      %371 = memref.load %arg1[%370] : memref<512xi32, #tpu.memory_space<smem>>
      %c9_i32_161 = arith.constant 9 : i32
      %372 = arith.addi %344, %c9_i32_161 : i32
      %373 = arith.index_cast %372 : i32 to index
      %374 = memref.load %arg1[%373] : memref<512xi32, #tpu.memory_space<smem>>
      %c10_i32_162 = arith.constant 10 : i32
      %375 = arith.addi %344, %c10_i32_162 : i32
      %376 = arith.index_cast %375 : i32 to index
      %377 = memref.load %arg1[%376] : memref<512xi32, #tpu.memory_space<smem>>
      %c11_i32_163 = arith.constant 11 : i32
      %378 = arith.addi %344, %c11_i32_163 : i32
      %379 = arith.index_cast %378 : i32 to index
      %380 = memref.load %arg1[%379] : memref<512xi32, #tpu.memory_space<smem>>
      %c12_i32_164 = arith.constant 12 : i32
      %381 = arith.addi %344, %c12_i32_164 : i32
      %382 = arith.index_cast %381 : i32 to index
      %383 = memref.load %arg1[%382] : memref<512xi32, #tpu.memory_space<smem>>
      %c13_i32_165 = arith.constant 13 : i32
      %384 = arith.addi %344, %c13_i32_165 : i32
      %385 = arith.index_cast %384 : i32 to index
      %386 = memref.load %arg1[%385] : memref<512xi32, #tpu.memory_space<smem>>
      %c14_i32_166 = arith.constant 14 : i32
      %387 = arith.addi %344, %c14_i32_166 : i32
      %388 = arith.index_cast %387 : i32 to index
      %389 = memref.load %arg1[%388] : memref<512xi32, #tpu.memory_space<smem>>
      %c15_i32_167 = arith.constant 15 : i32
      %390 = arith.addi %344, %c15_i32_167 : i32
      %391 = arith.index_cast %390 : i32 to index
      %392 = memref.load %arg1[%391] : memref<512xi32, #tpu.memory_space<smem>>
      %c16_i32_168 = arith.constant 16 : i32
      %393 = arith.muli %arg5, %c16_i32_168 : i32
      %c1_i32_169 = arith.constant 1 : i32
      %394 = arith.addi %arg5, %c1_i32_169 : i32
      %c16_i32_170 = arith.constant 16 : i32
      %395 = arith.muli %394, %c16_i32_170 : i32
      %c0_i32_171 = arith.constant 0 : i32
      %396 = arith.addi %393, %c0_i32_171 : i32
      %c0_i32_172 = arith.constant 0 : i32
      %c0_i32_173 = arith.constant 0 : i32
      %397 = tpu.memref_slice %arg2[%296, %c0_i32_173] : memref<500x128xf32, #tpu.memory_space<any>> -> memref<1x128xf32, #tpu.memory_space<any>>
      %398 = tpu.memref_squeeze %397 : memref<1x128xf32, #tpu.memory_space<any>> -> memref<128xf32, #tpu.memory_space<any>>
      %c0_i32_174 = arith.constant 0 : i32
      %399 = tpu.memref_slice %arg3[%396, %c0_i32_174] : memref<256x128xf32, #tpu.memory_space<vmem>> -> memref<1x128xf32, #tpu.memory_space<vmem>>
      %400 = tpu.memref_squeeze %399 : memref<1x128xf32, #tpu.memory_space<vmem>> -> memref<128xf32, #tpu.memory_space<vmem>>
      %401 = tpu.memref_slice %arg4[%c0_i32_172] : memref<16x!tpu.dma_semaphore, #tpu.memory_space<semaphore_mem>> -> memref<1x!tpu.dma_semaphore, #tpu.memory_space<semaphore_mem>>
      %402 = tpu.memref_squeeze %401 : memref<1x!tpu.dma_semaphore, #tpu.memory_space<semaphore_mem>> -> memref<!tpu.dma_semaphore, #tpu.memory_space<semaphore_mem>>
      tpu.wait_dma2 semaphore(%402 : memref<!tpu.dma_semaphore, #tpu.memory_space<semaphore_mem>>) src(%398 : memref<128xf32, #tpu.memory_space<any>>) dst(%400 : memref<128xf32, #tpu.memory_space<vmem>>)
      %c0_i32_175 = arith.constant 0 : i32
      %403 = arith.addi %395, %c0_i32_175 : i32
      %c0_i32_176 = arith.constant 0 : i32
      %c0_i32_177 = arith.constant 0 : i32
      %404 = tpu.memref_slice %arg2[%347, %c0_i32_177] : memref<500x128xf32, #tpu.memory_space<any>> -> memref<1x128xf32, #tpu.memory_space<any>>
      %405 = tpu.memref_squeeze %404 : memref<1x128xf32, #tpu.memory_space<any>> -> memref<128xf32, #tpu.memory_space<any>>
      %c0_i32_178 = arith.constant 0 : i32
      %406 = tpu.memref_slice %arg3[%403, %c0_i32_178] : memref<256x128xf32, #tpu.memory_space<vmem>> -> memref<1x128xf32, #tpu.memory_space<vmem>>
      %407 = tpu.memref_squeeze %406 : memref<1x128xf32, #tpu.memory_space<vmem>> -> memref<128xf32, #tpu.memory_space<vmem>>
      %408 = tpu.memref_slice %arg4[%c0_i32_176] : memref<16x!tpu.dma_semaphore, #tpu.memory_space<semaphore_mem>> -> memref<1x!tpu.dma_semaphore, #tpu.memory_space<semaphore_mem>>
      %409 = tpu.memref_squeeze %408 : memref<1x!tpu.dma_semaphore, #tpu.memory_space<semaphore_mem>> -> memref<!tpu.dma_semaphore, #tpu.memory_space<semaphore_mem>>
      tpu.enqueue_dma source(%405 : memref<128xf32, #tpu.memory_space<any>>) target(%407 : memref<128xf32, #tpu.memory_space<vmem>>) target_semaphore(%409 : memref<!tpu.dma_semaphore, #tpu.memory_space<semaphore_mem>>)
      %c1_i32_179 = arith.constant 1 : i32
      %410 = arith.addi %393, %c1_i32_179 : i32
      %c1_i32_180 = arith.constant 1 : i32
      %c0_i32_181 = arith.constant 0 : i32
      %411 = tpu.memref_slice %arg2[%299, %c0_i32_181] : memref<500x128xf32, #tpu.memory_space<any>> -> memref<1x128xf32, #tpu.memory_space<any>>
      %412 = tpu.memref_squeeze %411 : memref<1x128xf32, #tpu.memory_space<any>> -> memref<128xf32, #tpu.memory_space<any>>
      %c0_i32_182 = arith.constant 0 : i32
      %413 = tpu.memref_slice %arg3[%410, %c0_i32_182] : memref<256x128xf32, #tpu.memory_space<vmem>> -> memref<1x128xf32, #tpu.memory_space<vmem>>
      %414 = tpu.memref_squeeze %413 : memref<1x128xf32, #tpu.memory_space<vmem>> -> memref<128xf32, #tpu.memory_space<vmem>>
      %415 = tpu.memref_slice %arg4[%c1_i32_180] : memref<16x!tpu.dma_semaphore, #tpu.memory_space<semaphore_mem>> -> memref<1x!tpu.dma_semaphore, #tpu.memory_space<semaphore_mem>>
      %416 = tpu.memref_squeeze %415 : memref<1x!tpu.dma_semaphore, #tpu.memory_space<semaphore_mem>> -> memref<!tpu.dma_semaphore, #tpu.memory_space<semaphore_mem>>
      tpu.wait_dma2 semaphore(%416 : memref<!tpu.dma_semaphore, #tpu.memory_space<semaphore_mem>>) src(%412 : memref<128xf32, #tpu.memory_space<any>>) dst(%414 : memref<128xf32, #tpu.memory_space<vmem>>)
      %c1_i32_183 = arith.constant 1 : i32
      %417 = arith.addi %395, %c1_i32_183 : i32
      %c1_i32_184 = arith.constant 1 : i32
      %c0_i32_185 = arith.constant 0 : i32
      %418 = tpu.memref_slice %arg2[%350, %c0_i32_185] : memref<500x128xf32, #tpu.memory_space<any>> -> memref<1x128xf32, #tpu.memory_space<any>>
      %419 = tpu.memref_squeeze %418 : memref<1x128xf32, #tpu.memory_space<any>> -> memref<128xf32, #tpu.memory_space<any>>
      %c0_i32_186 = arith.constant 0 : i32
      %420 = tpu.memref_slice %arg3[%417, %c0_i32_186] : memref<256x128xf32, #tpu.memory_space<vmem>> -> memref<1x128xf32, #tpu.memory_space<vmem>>
      %421 = tpu.memref_squeeze %420 : memref<1x128xf32, #tpu.memory_space<vmem>> -> memref<128xf32, #tpu.memory_space<vmem>>
      %422 = tpu.memref_slice %arg4[%c1_i32_184] : memref<16x!tpu.dma_semaphore, #tpu.memory_space<semaphore_mem>> -> memref<1x!tpu.dma_semaphore, #tpu.memory_space<semaphore_mem>>
      %423 = tpu.memref_squeeze %422 : memref<1x!tpu.dma_semaphore, #tpu.memory_space<semaphore_mem>> -> memref<!tpu.dma_semaphore, #tpu.memory_space<semaphore_mem>>
      tpu.enqueue_dma source(%419 : memref<128xf32, #tpu.memory_space<any>>) target(%421 : memref<128xf32, #tpu.memory_space<vmem>>) target_semaphore(%423 : memref<!tpu.dma_semaphore, #tpu.memory_space<semaphore_mem>>)
      %c2_i32_187 = arith.constant 2 : i32
      %424 = arith.addi %393, %c2_i32_187 : i32
      %c2_i32_188 = arith.constant 2 : i32
      %c0_i32_189 = arith.constant 0 : i32
      %425 = tpu.memref_slice %arg2[%302, %c0_i32_189] : memref<500x128xf32, #tpu.memory_space<any>> -> memref<1x128xf32, #tpu.memory_space<any>>
      %426 = tpu.memref_squeeze %425 : memref<1x128xf32, #tpu.memory_space<any>> -> memref<128xf32, #tpu.memory_space<any>>
      %c0_i32_190 = arith.constant 0 : i32
      %427 = tpu.memref_slice %arg3[%424, %c0_i32_190] : memref<256x128xf32, #tpu.memory_space<vmem>> -> memref<1x128xf32, #tpu.memory_space<vmem>>
      %428 = tpu.memref_squeeze %427 : memref<1x128xf32, #tpu.memory_space<vmem>> -> memref<128xf32, #tpu.memory_space<vmem>>
      %429 = tpu.memref_slice %arg4[%c2_i32_188] : memref<16x!tpu.dma_semaphore, #tpu.memory_space<semaphore_mem>> -> memref<1x!tpu.dma_semaphore, #tpu.memory_space<semaphore_mem>>
      %430 = tpu.memref_squeeze %429 : memref<1x!tpu.dma_semaphore, #tpu.memory_space<semaphore_mem>> -> memref<!tpu.dma_semaphore, #tpu.memory_space<semaphore_mem>>
      tpu.wait_dma2 semaphore(%430 : memref<!tpu.dma_semaphore, #tpu.memory_space<semaphore_mem>>) src(%426 : memref<128xf32, #tpu.memory_space<any>>) dst(%428 : memref<128xf32, #tpu.memory_space<vmem>>)
      %c2_i32_191 = arith.constant 2 : i32
      %431 = arith.addi %395, %c2_i32_191 : i32
      %c2_i32_192 = arith.constant 2 : i32
      %c0_i32_193 = arith.constant 0 : i32
      %432 = tpu.memref_slice %arg2[%353, %c0_i32_193] : memref<500x128xf32, #tpu.memory_space<any>> -> memref<1x128xf32, #tpu.memory_space<any>>
      %433 = tpu.memref_squeeze %432 : memref<1x128xf32, #tpu.memory_space<any>> -> memref<128xf32, #tpu.memory_space<any>>
      %c0_i32_194 = arith.constant 0 : i32
      %434 = tpu.memref_slice %arg3[%431, %c0_i32_194] : memref<256x128xf32, #tpu.memory_space<vmem>> -> memref<1x128xf32, #tpu.memory_space<vmem>>
      %435 = tpu.memref_squeeze %434 : memref<1x128xf32, #tpu.memory_space<vmem>> -> memref<128xf32, #tpu.memory_space<vmem>>
      %436 = tpu.memref_slice %arg4[%c2_i32_192] : memref<16x!tpu.dma_semaphore, #tpu.memory_space<semaphore_mem>> -> memref<1x!tpu.dma_semaphore, #tpu.memory_space<semaphore_mem>>
      %437 = tpu.memref_squeeze %436 : memref<1x!tpu.dma_semaphore, #tpu.memory_space<semaphore_mem>> -> memref<!tpu.dma_semaphore, #tpu.memory_space<semaphore_mem>>
      tpu.enqueue_dma source(%433 : memref<128xf32, #tpu.memory_space<any>>) target(%435 : memref<128xf32, #tpu.memory_space<vmem>>) target_semaphore(%437 : memref<!tpu.dma_semaphore, #tpu.memory_space<semaphore_mem>>)
      %c3_i32_195 = arith.constant 3 : i32
      %438 = arith.addi %393, %c3_i32_195 : i32
      %c3_i32_196 = arith.constant 3 : i32
      %c0_i32_197 = arith.constant 0 : i32
      %439 = tpu.memref_slice %arg2[%305, %c0_i32_197] : memref<500x128xf32, #tpu.memory_space<any>> -> memref<1x128xf32, #tpu.memory_space<any>>
      %440 = tpu.memref_squeeze %439 : memref<1x128xf32, #tpu.memory_space<any>> -> memref<128xf32, #tpu.memory_space<any>>
      %c0_i32_198 = arith.constant 0 : i32
      %441 = tpu.memref_slice %arg3[%438, %c0_i32_198] : memref<256x128xf32, #tpu.memory_space<vmem>> -> memref<1x128xf32, #tpu.memory_space<vmem>>
      %442 = tpu.memref_squeeze %441 : memref<1x128xf32, #tpu.memory_space<vmem>> -> memref<128xf32, #tpu.memory_space<vmem>>
      %443 = tpu.memref_slice %arg4[%c3_i32_196] : memref<16x!tpu.dma_semaphore, #tpu.memory_space<semaphore_mem>> -> memref<1x!tpu.dma_semaphore, #tpu.memory_space<semaphore_mem>>
      %444 = tpu.memref_squeeze %443 : memref<1x!tpu.dma_semaphore, #tpu.memory_space<semaphore_mem>> -> memref<!tpu.dma_semaphore, #tpu.memory_space<semaphore_mem>>
      tpu.wait_dma2 semaphore(%444 : memref<!tpu.dma_semaphore, #tpu.memory_space<semaphore_mem>>) src(%440 : memref<128xf32, #tpu.memory_space<any>>) dst(%442 : memref<128xf32, #tpu.memory_space<vmem>>)
      %c3_i32_199 = arith.constant 3 : i32
      %445 = arith.addi %395, %c3_i32_199 : i32
      %c3_i32_200 = arith.constant 3 : i32
      %c0_i32_201 = arith.constant 0 : i32
      %446 = tpu.memref_slice %arg2[%356, %c0_i32_201] : memref<500x128xf32, #tpu.memory_space<any>> -> memref<1x128xf32, #tpu.memory_space<any>>
      %447 = tpu.memref_squeeze %446 : memref<1x128xf32, #tpu.memory_space<any>> -> memref<128xf32, #tpu.memory_space<any>>
      %c0_i32_202 = arith.constant 0 : i32
      %448 = tpu.memref_slice %arg3[%445, %c0_i32_202] : memref<256x128xf32, #tpu.memory_space<vmem>> -> memref<1x128xf32, #tpu.memory_space<vmem>>
      %449 = tpu.memref_squeeze %448 : memref<1x128xf32, #tpu.memory_space<vmem>> -> memref<128xf32, #tpu.memory_space<vmem>>
      %450 = tpu.memref_slice %arg4[%c3_i32_200] : memref<16x!tpu.dma_semaphore, #tpu.memory_space<semaphore_mem>> -> memref<1x!tpu.dma_semaphore, #tpu.memory_space<semaphore_mem>>
      %451 = tpu.memref_squeeze %450 : memref<1x!tpu.dma_semaphore, #tpu.memory_space<semaphore_mem>> -> memref<!tpu.dma_semaphore, #tpu.memory_space<semaphore_mem>>
      tpu.enqueue_dma source(%447 : memref<128xf32, #tpu.memory_space<any>>) target(%449 : memref<128xf32, #tpu.memory_space<vmem>>) target_semaphore(%451 : memref<!tpu.dma_semaphore, #tpu.memory_space<semaphore_mem>>)
      %c4_i32_203 = arith.constant 4 : i32
      %452 = arith.addi %393, %c4_i32_203 : i32
      %c4_i32_204 = arith.constant 4 : i32
      %c0_i32_205 = arith.constant 0 : i32
      %453 = tpu.memref_slice %arg2[%308, %c0_i32_205] : memref<500x128xf32, #tpu.memory_space<any>> -> memref<1x128xf32, #tpu.memory_space<any>>
      %454 = tpu.memref_squeeze %453 : memref<1x128xf32, #tpu.memory_space<any>> -> memref<128xf32, #tpu.memory_space<any>>
      %c0_i32_206 = arith.constant 0 : i32
      %455 = tpu.memref_slice %arg3[%452, %c0_i32_206] : memref<256x128xf32, #tpu.memory_space<vmem>> -> memref<1x128xf32, #tpu.memory_space<vmem>>
      %456 = tpu.memref_squeeze %455 : memref<1x128xf32, #tpu.memory_space<vmem>> -> memref<128xf32, #tpu.memory_space<vmem>>
      %457 = tpu.memref_slice %arg4[%c4_i32_204] : memref<16x!tpu.dma_semaphore, #tpu.memory_space<semaphore_mem>> -> memref<1x!tpu.dma_semaphore, #tpu.memory_space<semaphore_mem>>
      %458 = tpu.memref_squeeze %457 : memref<1x!tpu.dma_semaphore, #tpu.memory_space<semaphore_mem>> -> memref<!tpu.dma_semaphore, #tpu.memory_space<semaphore_mem>>
      tpu.wait_dma2 semaphore(%458 : memref<!tpu.dma_semaphore, #tpu.memory_space<semaphore_mem>>) src(%454 : memref<128xf32, #tpu.memory_space<any>>) dst(%456 : memref<128xf32, #tpu.memory_space<vmem>>)
      %c4_i32_207 = arith.constant 4 : i32
      %459 = arith.addi %395, %c4_i32_207 : i32
      %c4_i32_208 = arith.constant 4 : i32
      %c0_i32_209 = arith.constant 0 : i32
      %460 = tpu.memref_slice %arg2[%359, %c0_i32_209] : memref<500x128xf32, #tpu.memory_space<any>> -> memref<1x128xf32, #tpu.memory_space<any>>
      %461 = tpu.memref_squeeze %460 : memref<1x128xf32, #tpu.memory_space<any>> -> memref<128xf32, #tpu.memory_space<any>>
      %c0_i32_210 = arith.constant 0 : i32
      %462 = tpu.memref_slice %arg3[%459, %c0_i32_210] : memref<256x128xf32, #tpu.memory_space<vmem>> -> memref<1x128xf32, #tpu.memory_space<vmem>>
      %463 = tpu.memref_squeeze %462 : memref<1x128xf32, #tpu.memory_space<vmem>> -> memref<128xf32, #tpu.memory_space<vmem>>
      %464 = tpu.memref_slice %arg4[%c4_i32_208] : memref<16x!tpu.dma_semaphore, #tpu.memory_space<semaphore_mem>> -> memref<1x!tpu.dma_semaphore, #tpu.memory_space<semaphore_mem>>
      %465 = tpu.memref_squeeze %464 : memref<1x!tpu.dma_semaphore, #tpu.memory_space<semaphore_mem>> -> memref<!tpu.dma_semaphore, #tpu.memory_space<semaphore_mem>>
      tpu.enqueue_dma source(%461 : memref<128xf32, #tpu.memory_space<any>>) target(%463 : memref<128xf32, #tpu.memory_space<vmem>>) target_semaphore(%465 : memref<!tpu.dma_semaphore, #tpu.memory_space<semaphore_mem>>)
      %c5_i32_211 = arith.constant 5 : i32
      %466 = arith.addi %393, %c5_i32_211 : i32
      %c5_i32_212 = arith.constant 5 : i32
      %c0_i32_213 = arith.constant 0 : i32
      %467 = tpu.memref_slice %arg2[%311, %c0_i32_213] : memref<500x128xf32, #tpu.memory_space<any>> -> memref<1x128xf32, #tpu.memory_space<any>>
      %468 = tpu.memref_squeeze %467 : memref<1x128xf32, #tpu.memory_space<any>> -> memref<128xf32, #tpu.memory_space<any>>
      %c0_i32_214 = arith.constant 0 : i32
      %469 = tpu.memref_slice %arg3[%466, %c0_i32_214] : memref<256x128xf32, #tpu.memory_space<vmem>> -> memref<1x128xf32, #tpu.memory_space<vmem>>
      %470 = tpu.memref_squeeze %469 : memref<1x128xf32, #tpu.memory_space<vmem>> -> memref<128xf32, #tpu.memory_space<vmem>>
      %471 = tpu.memref_slice %arg4[%c5_i32_212] : memref<16x!tpu.dma_semaphore, #tpu.memory_space<semaphore_mem>> -> memref<1x!tpu.dma_semaphore, #tpu.memory_space<semaphore_mem>>
      %472 = tpu.memref_squeeze %471 : memref<1x!tpu.dma_semaphore, #tpu.memory_space<semaphore_mem>> -> memref<!tpu.dma_semaphore, #tpu.memory_space<semaphore_mem>>
      tpu.wait_dma2 semaphore(%472 : memref<!tpu.dma_semaphore, #tpu.memory_space<semaphore_mem>>) src(%468 : memref<128xf32, #tpu.memory_space<any>>) dst(%470 : memref<128xf32, #tpu.memory_space<vmem>>)
      %c5_i32_215 = arith.constant 5 : i32
      %473 = arith.addi %395, %c5_i32_215 : i32
      %c5_i32_216 = arith.constant 5 : i32
      %c0_i32_217 = arith.constant 0 : i32
      %474 = tpu.memref_slice %arg2[%362, %c0_i32_217] : memref<500x128xf32, #tpu.memory_space<any>> -> memref<1x128xf32, #tpu.memory_space<any>>
      %475 = tpu.memref_squeeze %474 : memref<1x128xf32, #tpu.memory_space<any>> -> memref<128xf32, #tpu.memory_space<any>>
      %c0_i32_218 = arith.constant 0 : i32
      %476 = tpu.memref_slice %arg3[%473, %c0_i32_218] : memref<256x128xf32, #tpu.memory_space<vmem>> -> memref<1x128xf32, #tpu.memory_space<vmem>>
      %477 = tpu.memref_squeeze %476 : memref<1x128xf32, #tpu.memory_space<vmem>> -> memref<128xf32, #tpu.memory_space<vmem>>
      %478 = tpu.memref_slice %arg4[%c5_i32_216] : memref<16x!tpu.dma_semaphore, #tpu.memory_space<semaphore_mem>> -> memref<1x!tpu.dma_semaphore, #tpu.memory_space<semaphore_mem>>
      %479 = tpu.memref_squeeze %478 : memref<1x!tpu.dma_semaphore, #tpu.memory_space<semaphore_mem>> -> memref<!tpu.dma_semaphore, #tpu.memory_space<semaphore_mem>>
      tpu.enqueue_dma source(%475 : memref<128xf32, #tpu.memory_space<any>>) target(%477 : memref<128xf32, #tpu.memory_space<vmem>>) target_semaphore(%479 : memref<!tpu.dma_semaphore, #tpu.memory_space<semaphore_mem>>)
      %c6_i32_219 = arith.constant 6 : i32
      %480 = arith.addi %393, %c6_i32_219 : i32
      %c6_i32_220 = arith.constant 6 : i32
      %c0_i32_221 = arith.constant 0 : i32
      %481 = tpu.memref_slice %arg2[%314, %c0_i32_221] : memref<500x128xf32, #tpu.memory_space<any>> -> memref<1x128xf32, #tpu.memory_space<any>>
      %482 = tpu.memref_squeeze %481 : memref<1x128xf32, #tpu.memory_space<any>> -> memref<128xf32, #tpu.memory_space<any>>
      %c0_i32_222 = arith.constant 0 : i32
      %483 = tpu.memref_slice %arg3[%480, %c0_i32_222] : memref<256x128xf32, #tpu.memory_space<vmem>> -> memref<1x128xf32, #tpu.memory_space<vmem>>
      %484 = tpu.memref_squeeze %483 : memref<1x128xf32, #tpu.memory_space<vmem>> -> memref<128xf32, #tpu.memory_space<vmem>>
      %485 = tpu.memref_slice %arg4[%c6_i32_220] : memref<16x!tpu.dma_semaphore, #tpu.memory_space<semaphore_mem>> -> memref<1x!tpu.dma_semaphore, #tpu.memory_space<semaphore_mem>>
      %486 = tpu.memref_squeeze %485 : memref<1x!tpu.dma_semaphore, #tpu.memory_space<semaphore_mem>> -> memref<!tpu.dma_semaphore, #tpu.memory_space<semaphore_mem>>
      tpu.wait_dma2 semaphore(%486 : memref<!tpu.dma_semaphore, #tpu.memory_space<semaphore_mem>>) src(%482 : memref<128xf32, #tpu.memory_space<any>>) dst(%484 : memref<128xf32, #tpu.memory_space<vmem>>)
      %c6_i32_223 = arith.constant 6 : i32
      %487 = arith.addi %395, %c6_i32_223 : i32
      %c6_i32_224 = arith.constant 6 : i32
      %c0_i32_225 = arith.constant 0 : i32
      %488 = tpu.memref_slice %arg2[%365, %c0_i32_225] : memref<500x128xf32, #tpu.memory_space<any>> -> memref<1x128xf32, #tpu.memory_space<any>>
      %489 = tpu.memref_squeeze %488 : memref<1x128xf32, #tpu.memory_space<any>> -> memref<128xf32, #tpu.memory_space<any>>
      %c0_i32_226 = arith.constant 0 : i32
      %490 = tpu.memref_slice %arg3[%487, %c0_i32_226] : memref<256x128xf32, #tpu.memory_space<vmem>> -> memref<1x128xf32, #tpu.memory_space<vmem>>
      %491 = tpu.memref_squeeze %490 : memref<1x128xf32, #tpu.memory_space<vmem>> -> memref<128xf32, #tpu.memory_space<vmem>>
      %492 = tpu.memref_slice %arg4[%c6_i32_224] : memref<16x!tpu.dma_semaphore, #tpu.memory_space<semaphore_mem>> -> memref<1x!tpu.dma_semaphore, #tpu.memory_space<semaphore_mem>>
      %493 = tpu.memref_squeeze %492 : memref<1x!tpu.dma_semaphore, #tpu.memory_space<semaphore_mem>> -> memref<!tpu.dma_semaphore, #tpu.memory_space<semaphore_mem>>
      tpu.enqueue_dma source(%489 : memref<128xf32, #tpu.memory_space<any>>) target(%491 : memref<128xf32, #tpu.memory_space<vmem>>) target_semaphore(%493 : memref<!tpu.dma_semaphore, #tpu.memory_space<semaphore_mem>>)
      %c7_i32_227 = arith.constant 7 : i32
      %494 = arith.addi %393, %c7_i32_227 : i32
      %c7_i32_228 = arith.constant 7 : i32
      %c0_i32_229 = arith.constant 0 : i32
      %495 = tpu.memref_slice %arg2[%317, %c0_i32_229] : memref<500x128xf32, #tpu.memory_space<any>> -> memref<1x128xf32, #tpu.memory_space<any>>
      %496 = tpu.memref_squeeze %495 : memref<1x128xf32, #tpu.memory_space<any>> -> memref<128xf32, #tpu.memory_space<any>>
      %c0_i32_230 = arith.constant 0 : i32
      %497 = tpu.memref_slice %arg3[%494, %c0_i32_230] : memref<256x128xf32, #tpu.memory_space<vmem>> -> memref<1x128xf32, #tpu.memory_space<vmem>>
      %498 = tpu.memref_squeeze %497 : memref<1x128xf32, #tpu.memory_space<vmem>> -> memref<128xf32, #tpu.memory_space<vmem>>
      %499 = tpu.memref_slice %arg4[%c7_i32_228] : memref<16x!tpu.dma_semaphore, #tpu.memory_space<semaphore_mem>> -> memref<1x!tpu.dma_semaphore, #tpu.memory_space<semaphore_mem>>
      %500 = tpu.memref_squeeze %499 : memref<1x!tpu.dma_semaphore, #tpu.memory_space<semaphore_mem>> -> memref<!tpu.dma_semaphore, #tpu.memory_space<semaphore_mem>>
      tpu.wait_dma2 semaphore(%500 : memref<!tpu.dma_semaphore, #tpu.memory_space<semaphore_mem>>) src(%496 : memref<128xf32, #tpu.memory_space<any>>) dst(%498 : memref<128xf32, #tpu.memory_space<vmem>>)
      %c7_i32_231 = arith.constant 7 : i32
      %501 = arith.addi %395, %c7_i32_231 : i32
      %c7_i32_232 = arith.constant 7 : i32
      %c0_i32_233 = arith.constant 0 : i32
      %502 = tpu.memref_slice %arg2[%368, %c0_i32_233] : memref<500x128xf32, #tpu.memory_space<any>> -> memref<1x128xf32, #tpu.memory_space<any>>
      %503 = tpu.memref_squeeze %502 : memref<1x128xf32, #tpu.memory_space<any>> -> memref<128xf32, #tpu.memory_space<any>>
      %c0_i32_234 = arith.constant 0 : i32
      %504 = tpu.memref_slice %arg3[%501, %c0_i32_234] : memref<256x128xf32, #tpu.memory_space<vmem>> -> memref<1x128xf32, #tpu.memory_space<vmem>>
      %505 = tpu.memref_squeeze %504 : memref<1x128xf32, #tpu.memory_space<vmem>> -> memref<128xf32, #tpu.memory_space<vmem>>
      %506 = tpu.memref_slice %arg4[%c7_i32_232] : memref<16x!tpu.dma_semaphore, #tpu.memory_space<semaphore_mem>> -> memref<1x!tpu.dma_semaphore, #tpu.memory_space<semaphore_mem>>
      %507 = tpu.memref_squeeze %506 : memref<1x!tpu.dma_semaphore, #tpu.memory_space<semaphore_mem>> -> memref<!tpu.dma_semaphore, #tpu.memory_space<semaphore_mem>>
      tpu.enqueue_dma source(%503 : memref<128xf32, #tpu.memory_space<any>>) target(%505 : memref<128xf32, #tpu.memory_space<vmem>>) target_semaphore(%507 : memref<!tpu.dma_semaphore, #tpu.memory_space<semaphore_mem>>)
      %c8_i32_235 = arith.constant 8 : i32
      %508 = arith.addi %393, %c8_i32_235 : i32
      %c8_i32_236 = arith.constant 8 : i32
      %c0_i32_237 = arith.constant 0 : i32
      %509 = tpu.memref_slice %arg2[%320, %c0_i32_237] : memref<500x128xf32, #tpu.memory_space<any>> -> memref<1x128xf32, #tpu.memory_space<any>>
      %510 = tpu.memref_squeeze %509 : memref<1x128xf32, #tpu.memory_space<any>> -> memref<128xf32, #tpu.memory_space<any>>
      %c0_i32_238 = arith.constant 0 : i32
      %511 = tpu.memref_slice %arg3[%508, %c0_i32_238] : memref<256x128xf32, #tpu.memory_space<vmem>> -> memref<1x128xf32, #tpu.memory_space<vmem>>
      %512 = tpu.memref_squeeze %511 : memref<1x128xf32, #tpu.memory_space<vmem>> -> memref<128xf32, #tpu.memory_space<vmem>>
      %513 = tpu.memref_slice %arg4[%c8_i32_236] : memref<16x!tpu.dma_semaphore, #tpu.memory_space<semaphore_mem>> -> memref<1x!tpu.dma_semaphore, #tpu.memory_space<semaphore_mem>>
      %514 = tpu.memref_squeeze %513 : memref<1x!tpu.dma_semaphore, #tpu.memory_space<semaphore_mem>> -> memref<!tpu.dma_semaphore, #tpu.memory_space<semaphore_mem>>
      tpu.wait_dma2 semaphore(%514 : memref<!tpu.dma_semaphore, #tpu.memory_space<semaphore_mem>>) src(%510 : memref<128xf32, #tpu.memory_space<any>>) dst(%512 : memref<128xf32, #tpu.memory_space<vmem>>)
      %c8_i32_239 = arith.constant 8 : i32
      %515 = arith.addi %395, %c8_i32_239 : i32
      %c8_i32_240 = arith.constant 8 : i32
      %c0_i32_241 = arith.constant 0 : i32
      %516 = tpu.memref_slice %arg2[%371, %c0_i32_241] : memref<500x128xf32, #tpu.memory_space<any>> -> memref<1x128xf32, #tpu.memory_space<any>>
      %517 = tpu.memref_squeeze %516 : memref<1x128xf32, #tpu.memory_space<any>> -> memref<128xf32, #tpu.memory_space<any>>
      %c0_i32_242 = arith.constant 0 : i32
      %518 = tpu.memref_slice %arg3[%515, %c0_i32_242] : memref<256x128xf32, #tpu.memory_space<vmem>> -> memref<1x128xf32, #tpu.memory_space<vmem>>
      %519 = tpu.memref_squeeze %518 : memref<1x128xf32, #tpu.memory_space<vmem>> -> memref<128xf32, #tpu.memory_space<vmem>>
      %520 = tpu.memref_slice %arg4[%c8_i32_240] : memref<16x!tpu.dma_semaphore, #tpu.memory_space<semaphore_mem>> -> memref<1x!tpu.dma_semaphore, #tpu.memory_space<semaphore_mem>>
      %521 = tpu.memref_squeeze %520 : memref<1x!tpu.dma_semaphore, #tpu.memory_space<semaphore_mem>> -> memref<!tpu.dma_semaphore, #tpu.memory_space<semaphore_mem>>
      tpu.enqueue_dma source(%517 : memref<128xf32, #tpu.memory_space<any>>) target(%519 : memref<128xf32, #tpu.memory_space<vmem>>) target_semaphore(%521 : memref<!tpu.dma_semaphore, #tpu.memory_space<semaphore_mem>>)
      %c9_i32_243 = arith.constant 9 : i32
      %522 = arith.addi %393, %c9_i32_243 : i32
      %c9_i32_244 = arith.constant 9 : i32
      %c0_i32_245 = arith.constant 0 : i32
      %523 = tpu.memref_slice %arg2[%323, %c0_i32_245] : memref<500x128xf32, #tpu.memory_space<any>> -> memref<1x128xf32, #tpu.memory_space<any>>
      %524 = tpu.memref_squeeze %523 : memref<1x128xf32, #tpu.memory_space<any>> -> memref<128xf32, #tpu.memory_space<any>>
      %c0_i32_246 = arith.constant 0 : i32
      %525 = tpu.memref_slice %arg3[%522, %c0_i32_246] : memref<256x128xf32, #tpu.memory_space<vmem>> -> memref<1x128xf32, #tpu.memory_space<vmem>>
      %526 = tpu.memref_squeeze %525 : memref<1x128xf32, #tpu.memory_space<vmem>> -> memref<128xf32, #tpu.memory_space<vmem>>
      %527 = tpu.memref_slice %arg4[%c9_i32_244] : memref<16x!tpu.dma_semaphore, #tpu.memory_space<semaphore_mem>> -> memref<1x!tpu.dma_semaphore, #tpu.memory_space<semaphore_mem>>
      %528 = tpu.memref_squeeze %527 : memref<1x!tpu.dma_semaphore, #tpu.memory_space<semaphore_mem>> -> memref<!tpu.dma_semaphore, #tpu.memory_space<semaphore_mem>>
      tpu.wait_dma2 semaphore(%528 : memref<!tpu.dma_semaphore, #tpu.memory_space<semaphore_mem>>) src(%524 : memref<128xf32, #tpu.memory_space<any>>) dst(%526 : memref<128xf32, #tpu.memory_space<vmem>>)
      %c9_i32_247 = arith.constant 9 : i32
      %529 = arith.addi %395, %c9_i32_247 : i32
      %c9_i32_248 = arith.constant 9 : i32
      %c0_i32_249 = arith.constant 0 : i32
      %530 = tpu.memref_slice %arg2[%374, %c0_i32_249] : memref<500x128xf32, #tpu.memory_space<any>> -> memref<1x128xf32, #tpu.memory_space<any>>
      %531 = tpu.memref_squeeze %530 : memref<1x128xf32, #tpu.memory_space<any>> -> memref<128xf32, #tpu.memory_space<any>>
      %c0_i32_250 = arith.constant 0 : i32
      %532 = tpu.memref_slice %arg3[%529, %c0_i32_250] : memref<256x128xf32, #tpu.memory_space<vmem>> -> memref<1x128xf32, #tpu.memory_space<vmem>>
      %533 = tpu.memref_squeeze %532 : memref<1x128xf32, #tpu.memory_space<vmem>> -> memref<128xf32, #tpu.memory_space<vmem>>
      %534 = tpu.memref_slice %arg4[%c9_i32_248] : memref<16x!tpu.dma_semaphore, #tpu.memory_space<semaphore_mem>> -> memref<1x!tpu.dma_semaphore, #tpu.memory_space<semaphore_mem>>
      %535 = tpu.memref_squeeze %534 : memref<1x!tpu.dma_semaphore, #tpu.memory_space<semaphore_mem>> -> memref<!tpu.dma_semaphore, #tpu.memory_space<semaphore_mem>>
      tpu.enqueue_dma source(%531 : memref<128xf32, #tpu.memory_space<any>>) target(%533 : memref<128xf32, #tpu.memory_space<vmem>>) target_semaphore(%535 : memref<!tpu.dma_semaphore, #tpu.memory_space<semaphore_mem>>)
      %c10_i32_251 = arith.constant 10 : i32
      %536 = arith.addi %393, %c10_i32_251 : i32
      %c10_i32_252 = arith.constant 10 : i32
      %c0_i32_253 = arith.constant 0 : i32
      %537 = tpu.memref_slice %arg2[%326, %c0_i32_253] : memref<500x128xf32, #tpu.memory_space<any>> -> memref<1x128xf32, #tpu.memory_space<any>>
      %538 = tpu.memref_squeeze %537 : memref<1x128xf32, #tpu.memory_space<any>> -> memref<128xf32, #tpu.memory_space<any>>
      %c0_i32_254 = arith.constant 0 : i32
      %539 = tpu.memref_slice %arg3[%536, %c0_i32_254] : memref<256x128xf32, #tpu.memory_space<vmem>> -> memref<1x128xf32, #tpu.memory_space<vmem>>
      %540 = tpu.memref_squeeze %539 : memref<1x128xf32, #tpu.memory_space<vmem>> -> memref<128xf32, #tpu.memory_space<vmem>>
      %541 = tpu.memref_slice %arg4[%c10_i32_252] : memref<16x!tpu.dma_semaphore, #tpu.memory_space<semaphore_mem>> -> memref<1x!tpu.dma_semaphore, #tpu.memory_space<semaphore_mem>>
      %542 = tpu.memref_squeeze %541 : memref<1x!tpu.dma_semaphore, #tpu.memory_space<semaphore_mem>> -> memref<!tpu.dma_semaphore, #tpu.memory_space<semaphore_mem>>
      tpu.wait_dma2 semaphore(%542 : memref<!tpu.dma_semaphore, #tpu.memory_space<semaphore_mem>>) src(%538 : memref<128xf32, #tpu.memory_space<any>>) dst(%540 : memref<128xf32, #tpu.memory_space<vmem>>)
      %c10_i32_255 = arith.constant 10 : i32
      %543 = arith.addi %395, %c10_i32_255 : i32
      %c10_i32_256 = arith.constant 10 : i32
      %c0_i32_257 = arith.constant 0 : i32
      %544 = tpu.memref_slice %arg2[%377, %c0_i32_257] : memref<500x128xf32, #tpu.memory_space<any>> -> memref<1x128xf32, #tpu.memory_space<any>>
      %545 = tpu.memref_squeeze %544 : memref<1x128xf32, #tpu.memory_space<any>> -> memref<128xf32, #tpu.memory_space<any>>
      %c0_i32_258 = arith.constant 0 : i32
      %546 = tpu.memref_slice %arg3[%543, %c0_i32_258] : memref<256x128xf32, #tpu.memory_space<vmem>> -> memref<1x128xf32, #tpu.memory_space<vmem>>
      %547 = tpu.memref_squeeze %546 : memref<1x128xf32, #tpu.memory_space<vmem>> -> memref<128xf32, #tpu.memory_space<vmem>>
      %548 = tpu.memref_slice %arg4[%c10_i32_256] : memref<16x!tpu.dma_semaphore, #tpu.memory_space<semaphore_mem>> -> memref<1x!tpu.dma_semaphore, #tpu.memory_space<semaphore_mem>>
      %549 = tpu.memref_squeeze %548 : memref<1x!tpu.dma_semaphore, #tpu.memory_space<semaphore_mem>> -> memref<!tpu.dma_semaphore, #tpu.memory_space<semaphore_mem>>
      tpu.enqueue_dma source(%545 : memref<128xf32, #tpu.memory_space<any>>) target(%547 : memref<128xf32, #tpu.memory_space<vmem>>) target_semaphore(%549 : memref<!tpu.dma_semaphore, #tpu.memory_space<semaphore_mem>>)
      %c11_i32_259 = arith.constant 11 : i32
      %550 = arith.addi %393, %c11_i32_259 : i32
      %c11_i32_260 = arith.constant 11 : i32
      %c0_i32_261 = arith.constant 0 : i32
      %551 = tpu.memref_slice %arg2[%329, %c0_i32_261] : memref<500x128xf32, #tpu.memory_space<any>> -> memref<1x128xf32, #tpu.memory_space<any>>
      %552 = tpu.memref_squeeze %551 : memref<1x128xf32, #tpu.memory_space<any>> -> memref<128xf32, #tpu.memory_space<any>>
      %c0_i32_262 = arith.constant 0 : i32
      %553 = tpu.memref_slice %arg3[%550, %c0_i32_262] : memref<256x128xf32, #tpu.memory_space<vmem>> -> memref<1x128xf32, #tpu.memory_space<vmem>>
      %554 = tpu.memref_squeeze %553 : memref<1x128xf32, #tpu.memory_space<vmem>> -> memref<128xf32, #tpu.memory_space<vmem>>
      %555 = tpu.memref_slice %arg4[%c11_i32_260] : memref<16x!tpu.dma_semaphore, #tpu.memory_space<semaphore_mem>> -> memref<1x!tpu.dma_semaphore, #tpu.memory_space<semaphore_mem>>
      %556 = tpu.memref_squeeze %555 : memref<1x!tpu.dma_semaphore, #tpu.memory_space<semaphore_mem>> -> memref<!tpu.dma_semaphore, #tpu.memory_space<semaphore_mem>>
      tpu.wait_dma2 semaphore(%556 : memref<!tpu.dma_semaphore, #tpu.memory_space<semaphore_mem>>) src(%552 : memref<128xf32, #tpu.memory_space<any>>) dst(%554 : memref<128xf32, #tpu.memory_space<vmem>>)
      %c11_i32_263 = arith.constant 11 : i32
      %557 = arith.addi %395, %c11_i32_263 : i32
      %c11_i32_264 = arith.constant 11 : i32
      %c0_i32_265 = arith.constant 0 : i32
      %558 = tpu.memref_slice %arg2[%380, %c0_i32_265] : memref<500x128xf32, #tpu.memory_space<any>> -> memref<1x128xf32, #tpu.memory_space<any>>
      %559 = tpu.memref_squeeze %558 : memref<1x128xf32, #tpu.memory_space<any>> -> memref<128xf32, #tpu.memory_space<any>>
      %c0_i32_266 = arith.constant 0 : i32
      %560 = tpu.memref_slice %arg3[%557, %c0_i32_266] : memref<256x128xf32, #tpu.memory_space<vmem>> -> memref<1x128xf32, #tpu.memory_space<vmem>>
      %561 = tpu.memref_squeeze %560 : memref<1x128xf32, #tpu.memory_space<vmem>> -> memref<128xf32, #tpu.memory_space<vmem>>
      %562 = tpu.memref_slice %arg4[%c11_i32_264] : memref<16x!tpu.dma_semaphore, #tpu.memory_space<semaphore_mem>> -> memref<1x!tpu.dma_semaphore, #tpu.memory_space<semaphore_mem>>
      %563 = tpu.memref_squeeze %562 : memref<1x!tpu.dma_semaphore, #tpu.memory_space<semaphore_mem>> -> memref<!tpu.dma_semaphore, #tpu.memory_space<semaphore_mem>>
      tpu.enqueue_dma source(%559 : memref<128xf32, #tpu.memory_space<any>>) target(%561 : memref<128xf32, #tpu.memory_space<vmem>>) target_semaphore(%563 : memref<!tpu.dma_semaphore, #tpu.memory_space<semaphore_mem>>)
      %c12_i32_267 = arith.constant 12 : i32
      %564 = arith.addi %393, %c12_i32_267 : i32
      %c12_i32_268 = arith.constant 12 : i32
      %c0_i32_269 = arith.constant 0 : i32
      %565 = tpu.memref_slice %arg2[%332, %c0_i32_269] : memref<500x128xf32, #tpu.memory_space<any>> -> memref<1x128xf32, #tpu.memory_space<any>>
      %566 = tpu.memref_squeeze %565 : memref<1x128xf32, #tpu.memory_space<any>> -> memref<128xf32, #tpu.memory_space<any>>
      %c0_i32_270 = arith.constant 0 : i32
      %567 = tpu.memref_slice %arg3[%564, %c0_i32_270] : memref<256x128xf32, #tpu.memory_space<vmem>> -> memref<1x128xf32, #tpu.memory_space<vmem>>
      %568 = tpu.memref_squeeze %567 : memref<1x128xf32, #tpu.memory_space<vmem>> -> memref<128xf32, #tpu.memory_space<vmem>>
      %569 = tpu.memref_slice %arg4[%c12_i32_268] : memref<16x!tpu.dma_semaphore, #tpu.memory_space<semaphore_mem>> -> memref<1x!tpu.dma_semaphore, #tpu.memory_space<semaphore_mem>>
      %570 = tpu.memref_squeeze %569 : memref<1x!tpu.dma_semaphore, #tpu.memory_space<semaphore_mem>> -> memref<!tpu.dma_semaphore, #tpu.memory_space<semaphore_mem>>
      tpu.wait_dma2 semaphore(%570 : memref<!tpu.dma_semaphore, #tpu.memory_space<semaphore_mem>>) src(%566 : memref<128xf32, #tpu.memory_space<any>>) dst(%568 : memref<128xf32, #tpu.memory_space<vmem>>)
      %c12_i32_271 = arith.constant 12 : i32
      %571 = arith.addi %395, %c12_i32_271 : i32
      %c12_i32_272 = arith.constant 12 : i32
      %c0_i32_273 = arith.constant 0 : i32
      %572 = tpu.memref_slice %arg2[%383, %c0_i32_273] : memref<500x128xf32, #tpu.memory_space<any>> -> memref<1x128xf32, #tpu.memory_space<any>>
      %573 = tpu.memref_squeeze %572 : memref<1x128xf32, #tpu.memory_space<any>> -> memref<128xf32, #tpu.memory_space<any>>
      %c0_i32_274 = arith.constant 0 : i32
      %574 = tpu.memref_slice %arg3[%571, %c0_i32_274] : memref<256x128xf32, #tpu.memory_space<vmem>> -> memref<1x128xf32, #tpu.memory_space<vmem>>
      %575 = tpu.memref_squeeze %574 : memref<1x128xf32, #tpu.memory_space<vmem>> -> memref<128xf32, #tpu.memory_space<vmem>>
      %576 = tpu.memref_slice %arg4[%c12_i32_272] : memref<16x!tpu.dma_semaphore, #tpu.memory_space<semaphore_mem>> -> memref<1x!tpu.dma_semaphore, #tpu.memory_space<semaphore_mem>>
      %577 = tpu.memref_squeeze %576 : memref<1x!tpu.dma_semaphore, #tpu.memory_space<semaphore_mem>> -> memref<!tpu.dma_semaphore, #tpu.memory_space<semaphore_mem>>
      tpu.enqueue_dma source(%573 : memref<128xf32, #tpu.memory_space<any>>) target(%575 : memref<128xf32, #tpu.memory_space<vmem>>) target_semaphore(%577 : memref<!tpu.dma_semaphore, #tpu.memory_space<semaphore_mem>>)
      %c13_i32_275 = arith.constant 13 : i32
      %578 = arith.addi %393, %c13_i32_275 : i32
      %c13_i32_276 = arith.constant 13 : i32
      %c0_i32_277 = arith.constant 0 : i32
      %579 = tpu.memref_slice %arg2[%335, %c0_i32_277] : memref<500x128xf32, #tpu.memory_space<any>> -> memref<1x128xf32, #tpu.memory_space<any>>
      %580 = tpu.memref_squeeze %579 : memref<1x128xf32, #tpu.memory_space<any>> -> memref<128xf32, #tpu.memory_space<any>>
      %c0_i32_278 = arith.constant 0 : i32
      %581 = tpu.memref_slice %arg3[%578, %c0_i32_278] : memref<256x128xf32, #tpu.memory_space<vmem>> -> memref<1x128xf32, #tpu.memory_space<vmem>>
      %582 = tpu.memref_squeeze %581 : memref<1x128xf32, #tpu.memory_space<vmem>> -> memref<128xf32, #tpu.memory_space<vmem>>
      %583 = tpu.memref_slice %arg4[%c13_i32_276] : memref<16x!tpu.dma_semaphore, #tpu.memory_space<semaphore_mem>> -> memref<1x!tpu.dma_semaphore, #tpu.memory_space<semaphore_mem>>
      %584 = tpu.memref_squeeze %583 : memref<1x!tpu.dma_semaphore, #tpu.memory_space<semaphore_mem>> -> memref<!tpu.dma_semaphore, #tpu.memory_space<semaphore_mem>>
      tpu.wait_dma2 semaphore(%584 : memref<!tpu.dma_semaphore, #tpu.memory_space<semaphore_mem>>) src(%580 : memref<128xf32, #tpu.memory_space<any>>) dst(%582 : memref<128xf32, #tpu.memory_space<vmem>>)
      %c13_i32_279 = arith.constant 13 : i32
      %585 = arith.addi %395, %c13_i32_279 : i32
      %c13_i32_280 = arith.constant 13 : i32
      %c0_i32_281 = arith.constant 0 : i32
      %586 = tpu.memref_slice %arg2[%386, %c0_i32_281] : memref<500x128xf32, #tpu.memory_space<any>> -> memref<1x128xf32, #tpu.memory_space<any>>
      %587 = tpu.memref_squeeze %586 : memref<1x128xf32, #tpu.memory_space<any>> -> memref<128xf32, #tpu.memory_space<any>>
      %c0_i32_282 = arith.constant 0 : i32
      %588 = tpu.memref_slice %arg3[%585, %c0_i32_282] : memref<256x128xf32, #tpu.memory_space<vmem>> -> memref<1x128xf32, #tpu.memory_space<vmem>>
      %589 = tpu.memref_squeeze %588 : memref<1x128xf32, #tpu.memory_space<vmem>> -> memref<128xf32, #tpu.memory_space<vmem>>
      %590 = tpu.memref_slice %arg4[%c13_i32_280] : memref<16x!tpu.dma_semaphore, #tpu.memory_space<semaphore_mem>> -> memref<1x!tpu.dma_semaphore, #tpu.memory_space<semaphore_mem>>
      %591 = tpu.memref_squeeze %590 : memref<1x!tpu.dma_semaphore, #tpu.memory_space<semaphore_mem>> -> memref<!tpu.dma_semaphore, #tpu.memory_space<semaphore_mem>>
      tpu.enqueue_dma source(%587 : memref<128xf32, #tpu.memory_space<any>>) target(%589 : memref<128xf32, #tpu.memory_space<vmem>>) target_semaphore(%591 : memref<!tpu.dma_semaphore, #tpu.memory_space<semaphore_mem>>)
      %c14_i32_283 = arith.constant 14 : i32
      %592 = arith.addi %393, %c14_i32_283 : i32
      %c14_i32_284 = arith.constant 14 : i32
      %c0_i32_285 = arith.constant 0 : i32
      %593 = tpu.memref_slice %arg2[%338, %c0_i32_285] : memref<500x128xf32, #tpu.memory_space<any>> -> memref<1x128xf32, #tpu.memory_space<any>>
      %594 = tpu.memref_squeeze %593 : memref<1x128xf32, #tpu.memory_space<any>> -> memref<128xf32, #tpu.memory_space<any>>
      %c0_i32_286 = arith.constant 0 : i32
      %595 = tpu.memref_slice %arg3[%592, %c0_i32_286] : memref<256x128xf32, #tpu.memory_space<vmem>> -> memref<1x128xf32, #tpu.memory_space<vmem>>
      %596 = tpu.memref_squeeze %595 : memref<1x128xf32, #tpu.memory_space<vmem>> -> memref<128xf32, #tpu.memory_space<vmem>>
      %597 = tpu.memref_slice %arg4[%c14_i32_284] : memref<16x!tpu.dma_semaphore, #tpu.memory_space<semaphore_mem>> -> memref<1x!tpu.dma_semaphore, #tpu.memory_space<semaphore_mem>>
      %598 = tpu.memref_squeeze %597 : memref<1x!tpu.dma_semaphore, #tpu.memory_space<semaphore_mem>> -> memref<!tpu.dma_semaphore, #tpu.memory_space<semaphore_mem>>
      tpu.wait_dma2 semaphore(%598 : memref<!tpu.dma_semaphore, #tpu.memory_space<semaphore_mem>>) src(%594 : memref<128xf32, #tpu.memory_space<any>>) dst(%596 : memref<128xf32, #tpu.memory_space<vmem>>)
      %c14_i32_287 = arith.constant 14 : i32
      %599 = arith.addi %395, %c14_i32_287 : i32
      %c14_i32_288 = arith.constant 14 : i32
      %c0_i32_289 = arith.constant 0 : i32
      %600 = tpu.memref_slice %arg2[%389, %c0_i32_289] : memref<500x128xf32, #tpu.memory_space<any>> -> memref<1x128xf32, #tpu.memory_space<any>>
      %601 = tpu.memref_squeeze %600 : memref<1x128xf32, #tpu.memory_space<any>> -> memref<128xf32, #tpu.memory_space<any>>
      %c0_i32_290 = arith.constant 0 : i32
      %602 = tpu.memref_slice %arg3[%599, %c0_i32_290] : memref<256x128xf32, #tpu.memory_space<vmem>> -> memref<1x128xf32, #tpu.memory_space<vmem>>
      %603 = tpu.memref_squeeze %602 : memref<1x128xf32, #tpu.memory_space<vmem>> -> memref<128xf32, #tpu.memory_space<vmem>>
      %604 = tpu.memref_slice %arg4[%c14_i32_288] : memref<16x!tpu.dma_semaphore, #tpu.memory_space<semaphore_mem>> -> memref<1x!tpu.dma_semaphore, #tpu.memory_space<semaphore_mem>>
      %605 = tpu.memref_squeeze %604 : memref<1x!tpu.dma_semaphore, #tpu.memory_space<semaphore_mem>> -> memref<!tpu.dma_semaphore, #tpu.memory_space<semaphore_mem>>
      tpu.enqueue_dma source(%601 : memref<128xf32, #tpu.memory_space<any>>) target(%603 : memref<128xf32, #tpu.memory_space<vmem>>) target_semaphore(%605 : memref<!tpu.dma_semaphore, #tpu.memory_space<semaphore_mem>>)
      %c15_i32_291 = arith.constant 15 : i32
      %606 = arith.addi %393, %c15_i32_291 : i32
      %c15_i32_292 = arith.constant 15 : i32
      %c0_i32_293 = arith.constant 0 : i32
      %607 = tpu.memref_slice %arg2[%341, %c0_i32_293] : memref<500x128xf32, #tpu.memory_space<any>> -> memref<1x128xf32, #tpu.memory_space<any>>
      %608 = tpu.memref_squeeze %607 : memref<1x128xf32, #tpu.memory_space<any>> -> memref<128xf32, #tpu.memory_space<any>>
      %c0_i32_294 = arith.constant 0 : i32
      %609 = tpu.memref_slice %arg3[%606, %c0_i32_294] : memref<256x128xf32, #tpu.memory_space<vmem>> -> memref<1x128xf32, #tpu.memory_space<vmem>>
      %610 = tpu.memref_squeeze %609 : memref<1x128xf32, #tpu.memory_space<vmem>> -> memref<128xf32, #tpu.memory_space<vmem>>
      %611 = tpu.memref_slice %arg4[%c15_i32_292] : memref<16x!tpu.dma_semaphore, #tpu.memory_space<semaphore_mem>> -> memref<1x!tpu.dma_semaphore, #tpu.memory_space<semaphore_mem>>
      %612 = tpu.memref_squeeze %611 : memref<1x!tpu.dma_semaphore, #tpu.memory_space<semaphore_mem>> -> memref<!tpu.dma_semaphore, #tpu.memory_space<semaphore_mem>>
      tpu.wait_dma2 semaphore(%612 : memref<!tpu.dma_semaphore, #tpu.memory_space<semaphore_mem>>) src(%608 : memref<128xf32, #tpu.memory_space<any>>) dst(%610 : memref<128xf32, #tpu.memory_space<vmem>>)
      %c15_i32_295 = arith.constant 15 : i32
      %613 = arith.addi %395, %c15_i32_295 : i32
      %c15_i32_296 = arith.constant 15 : i32
      %c0_i32_297 = arith.constant 0 : i32
      %614 = tpu.memref_slice %arg2[%392, %c0_i32_297] : memref<500x128xf32, #tpu.memory_space<any>> -> memref<1x128xf32, #tpu.memory_space<any>>
      %615 = tpu.memref_squeeze %614 : memref<1x128xf32, #tpu.memory_space<any>> -> memref<128xf32, #tpu.memory_space<any>>
      %c0_i32_298 = arith.constant 0 : i32
      %616 = tpu.memref_slice %arg3[%613, %c0_i32_298] : memref<256x128xf32, #tpu.memory_space<vmem>> -> memref<1x128xf32, #tpu.memory_space<vmem>>
      %617 = tpu.memref_squeeze %616 : memref<1x128xf32, #tpu.memory_space<vmem>> -> memref<128xf32, #tpu.memory_space<vmem>>
      %618 = tpu.memref_slice %arg4[%c15_i32_296] : memref<16x!tpu.dma_semaphore, #tpu.memory_space<semaphore_mem>> -> memref<1x!tpu.dma_semaphore, #tpu.memory_space<semaphore_mem>>
      %619 = tpu.memref_squeeze %618 : memref<1x!tpu.dma_semaphore, #tpu.memory_space<semaphore_mem>> -> memref<!tpu.dma_semaphore, #tpu.memory_space<semaphore_mem>>
      tpu.enqueue_dma source(%615 : memref<128xf32, #tpu.memory_space<any>>) target(%617 : memref<128xf32, #tpu.memory_space<vmem>>) target_semaphore(%619 : memref<!tpu.dma_semaphore, #tpu.memory_space<semaphore_mem>>)
    }
    %c15_i32_68 = arith.constant 15 : i32
    %c240_i32 = arith.constant 240 : i32
    %147 = arith.addi %0, %c240_i32 : i32
    %c0_i32_69 = arith.constant 0 : i32
    %148 = arith.addi %147, %c0_i32_69 : i32
    %149 = arith.index_cast %148 : i32 to index
    %150 = memref.load %arg1[%149] : memref<512xi32, #tpu.memory_space<smem>>
    %c1_i32_70 = arith.constant 1 : i32
    %151 = arith.addi %147, %c1_i32_70 : i32
    %152 = arith.index_cast %151 : i32 to index
    %153 = memref.load %arg1[%152] : memref<512xi32, #tpu.memory_space<smem>>
    %c2_i32_71 = arith.constant 2 : i32
    %154 = arith.addi %147, %c2_i32_71 : i32
    %155 = arith.index_cast %154 : i32 to index
    %156 = memref.load %arg1[%155] : memref<512xi32, #tpu.memory_space<smem>>
    %c3_i32_72 = arith.constant 3 : i32
    %157 = arith.addi %147, %c3_i32_72 : i32
    %158 = arith.index_cast %157 : i32 to index
    %159 = memref.load %arg1[%158] : memref<512xi32, #tpu.memory_space<smem>>
    %c4_i32_73 = arith.constant 4 : i32
    %160 = arith.addi %147, %c4_i32_73 : i32
    %161 = arith.index_cast %160 : i32 to index
    %162 = memref.load %arg1[%161] : memref<512xi32, #tpu.memory_space<smem>>
    %c5_i32_74 = arith.constant 5 : i32
    %163 = arith.addi %147, %c5_i32_74 : i32
    %164 = arith.index_cast %163 : i32 to index
    %165 = memref.load %arg1[%164] : memref<512xi32, #tpu.memory_space<smem>>
    %c6_i32_75 = arith.constant 6 : i32
    %166 = arith.addi %147, %c6_i32_75 : i32
    %167 = arith.index_cast %166 : i32 to index
    %168 = memref.load %arg1[%167] : memref<512xi32, #tpu.memory_space<smem>>
    %c7_i32_76 = arith.constant 7 : i32
    %169 = arith.addi %147, %c7_i32_76 : i32
    %170 = arith.index_cast %169 : i32 to index
    %171 = memref.load %arg1[%170] : memref<512xi32, #tpu.memory_space<smem>>
    %c8_i32_77 = arith.constant 8 : i32
    %172 = arith.addi %147, %c8_i32_77 : i32
    %173 = arith.index_cast %172 : i32 to index
    %174 = memref.load %arg1[%173] : memref<512xi32, #tpu.memory_space<smem>>
    %c9_i32_78 = arith.constant 9 : i32
    %175 = arith.addi %147, %c9_i32_78 : i32
    %176 = arith.index_cast %175 : i32 to index
    %177 = memref.load %arg1[%176] : memref<512xi32, #tpu.memory_space<smem>>
    %c10_i32_79 = arith.constant 10 : i32
    %178 = arith.addi %147, %c10_i32_79 : i32
    %179 = arith.index_cast %178 : i32 to index
    %180 = memref.load %arg1[%179] : memref<512xi32, #tpu.memory_space<smem>>
    %c11_i32_80 = arith.constant 11 : i32
    %181 = arith.addi %147, %c11_i32_80 : i32
    %182 = arith.index_cast %181 : i32 to index
    %183 = memref.load %arg1[%182] : memref<512xi32, #tpu.memory_space<smem>>
    %c12_i32_81 = arith.constant 12 : i32
    %184 = arith.addi %147, %c12_i32_81 : i32
    %185 = arith.index_cast %184 : i32 to index
    %186 = memref.load %arg1[%185] : memref<512xi32, #tpu.memory_space<smem>>
    %c13_i32_82 = arith.constant 13 : i32
    %187 = arith.addi %147, %c13_i32_82 : i32
    %188 = arith.index_cast %187 : i32 to index
    %189 = memref.load %arg1[%188] : memref<512xi32, #tpu.memory_space<smem>>
    %c14_i32_83 = arith.constant 14 : i32
    %190 = arith.addi %147, %c14_i32_83 : i32
    %191 = arith.index_cast %190 : i32 to index
    %192 = memref.load %arg1[%191] : memref<512xi32, #tpu.memory_space<smem>>
    %c15_i32_84 = arith.constant 15 : i32
    %193 = arith.addi %147, %c15_i32_84 : i32
    %194 = arith.index_cast %193 : i32 to index
    %195 = memref.load %arg1[%194] : memref<512xi32, #tpu.memory_space<smem>>
    %c240_i32_85 = arith.constant 240 : i32
    %c0_i32_86 = arith.constant 0 : i32
    %c0_i32_87 = arith.constant 0 : i32
    %196 = tpu.memref_slice %arg2[%150, %c0_i32_87] : memref<500x128xf32, #tpu.memory_space<any>> -> memref<1x128xf32, #tpu.memory_space<any>>
    %197 = tpu.memref_squeeze %196 : memref<1x128xf32, #tpu.memory_space<any>> -> memref<128xf32, #tpu.memory_space<any>>
    %c0_i32_88 = arith.constant 0 : i32
    %198 = tpu.memref_slice %arg3[%c240_i32_85, %c0_i32_88] : memref<256x128xf32, #tpu.memory_space<vmem>> -> memref<1x128xf32, #tpu.memory_space<vmem>>
    %199 = tpu.memref_squeeze %198 : memref<1x128xf32, #tpu.memory_space<vmem>> -> memref<128xf32, #tpu.memory_space<vmem>>
    %200 = tpu.memref_slice %arg4[%c0_i32_86] : memref<16x!tpu.dma_semaphore, #tpu.memory_space<semaphore_mem>> -> memref<1x!tpu.dma_semaphore, #tpu.memory_space<semaphore_mem>>
    %201 = tpu.memref_squeeze %200 : memref<1x!tpu.dma_semaphore, #tpu.memory_space<semaphore_mem>> -> memref<!tpu.dma_semaphore, #tpu.memory_space<semaphore_mem>>
    tpu.wait_dma2 semaphore(%201 : memref<!tpu.dma_semaphore, #tpu.memory_space<semaphore_mem>>) src(%197 : memref<128xf32, #tpu.memory_space<any>>) dst(%199 : memref<128xf32, #tpu.memory_space<vmem>>)
    %c241_i32 = arith.constant 241 : i32
    %c1_i32_89 = arith.constant 1 : i32
    %c0_i32_90 = arith.constant 0 : i32
    %202 = tpu.memref_slice %arg2[%153, %c0_i32_90] : memref<500x128xf32, #tpu.memory_space<any>> -> memref<1x128xf32, #tpu.memory_space<any>>
    %203 = tpu.memref_squeeze %202 : memref<1x128xf32, #tpu.memory_space<any>> -> memref<128xf32, #tpu.memory_space<any>>
    %c0_i32_91 = arith.constant 0 : i32
    %204 = tpu.memref_slice %arg3[%c241_i32, %c0_i32_91] : memref<256x128xf32, #tpu.memory_space<vmem>> -> memref<1x128xf32, #tpu.memory_space<vmem>>
    %205 = tpu.memref_squeeze %204 : memref<1x128xf32, #tpu.memory_space<vmem>> -> memref<128xf32, #tpu.memory_space<vmem>>
    %206 = tpu.memref_slice %arg4[%c1_i32_89] : memref<16x!tpu.dma_semaphore, #tpu.memory_space<semaphore_mem>> -> memref<1x!tpu.dma_semaphore, #tpu.memory_space<semaphore_mem>>
    %207 = tpu.memref_squeeze %206 : memref<1x!tpu.dma_semaphore, #tpu.memory_space<semaphore_mem>> -> memref<!tpu.dma_semaphore, #tpu.memory_space<semaphore_mem>>
    tpu.wait_dma2 semaphore(%207 : memref<!tpu.dma_semaphore, #tpu.memory_space<semaphore_mem>>) src(%203 : memref<128xf32, #tpu.memory_space<any>>) dst(%205 : memref<128xf32, #tpu.memory_space<vmem>>)
    %c242_i32 = arith.constant 242 : i32
    %c2_i32_92 = arith.constant 2 : i32
    %c0_i32_93 = arith.constant 0 : i32
    %208 = tpu.memref_slice %arg2[%156, %c0_i32_93] : memref<500x128xf32, #tpu.memory_space<any>> -> memref<1x128xf32, #tpu.memory_space<any>>
    %209 = tpu.memref_squeeze %208 : memref<1x128xf32, #tpu.memory_space<any>> -> memref<128xf32, #tpu.memory_space<any>>
    %c0_i32_94 = arith.constant 0 : i32
    %210 = tpu.memref_slice %arg3[%c242_i32, %c0_i32_94] : memref<256x128xf32, #tpu.memory_space<vmem>> -> memref<1x128xf32, #tpu.memory_space<vmem>>
    %211 = tpu.memref_squeeze %210 : memref<1x128xf32, #tpu.memory_space<vmem>> -> memref<128xf32, #tpu.memory_space<vmem>>
    %212 = tpu.memref_slice %arg4[%c2_i32_92] : memref<16x!tpu.dma_semaphore, #tpu.memory_space<semaphore_mem>> -> memref<1x!tpu.dma_semaphore, #tpu.memory_space<semaphore_mem>>
    %213 = tpu.memref_squeeze %212 : memref<1x!tpu.dma_semaphore, #tpu.memory_space<semaphore_mem>> -> memref<!tpu.dma_semaphore, #tpu.memory_space<semaphore_mem>>
    tpu.wait_dma2 semaphore(%213 : memref<!tpu.dma_semaphore, #tpu.memory_space<semaphore_mem>>) src(%209 : memref<128xf32, #tpu.memory_space<any>>) dst(%211 : memref<128xf32, #tpu.memory_space<vmem>>)
    %c243_i32 = arith.constant 243 : i32
    %c3_i32_95 = arith.constant 3 : i32
    %c0_i32_96 = arith.constant 0 : i32
    %214 = tpu.memref_slice %arg2[%159, %c0_i32_96] : memref<500x128xf32, #tpu.memory_space<any>> -> memref<1x128xf32, #tpu.memory_space<any>>
    %215 = tpu.memref_squeeze %214 : memref<1x128xf32, #tpu.memory_space<any>> -> memref<128xf32, #tpu.memory_space<any>>
    %c0_i32_97 = arith.constant 0 : i32
    %216 = tpu.memref_slice %arg3[%c243_i32, %c0_i32_97] : memref<256x128xf32, #tpu.memory_space<vmem>> -> memref<1x128xf32, #tpu.memory_space<vmem>>
    %217 = tpu.memref_squeeze %216 : memref<1x128xf32, #tpu.memory_space<vmem>> -> memref<128xf32, #tpu.memory_space<vmem>>
    %218 = tpu.memref_slice %arg4[%c3_i32_95] : memref<16x!tpu.dma_semaphore, #tpu.memory_space<semaphore_mem>> -> memref<1x!tpu.dma_semaphore, #tpu.memory_space<semaphore_mem>>
    %219 = tpu.memref_squeeze %218 : memref<1x!tpu.dma_semaphore, #tpu.memory_space<semaphore_mem>> -> memref<!tpu.dma_semaphore, #tpu.memory_space<semaphore_mem>>
    tpu.wait_dma2 semaphore(%219 : memref<!tpu.dma_semaphore, #tpu.memory_space<semaphore_mem>>) src(%215 : memref<128xf32, #tpu.memory_space<any>>) dst(%217 : memref<128xf32, #tpu.memory_space<vmem>>)
    %c244_i32 = arith.constant 244 : i32
    %c4_i32_98 = arith.constant 4 : i32
    %c0_i32_99 = arith.constant 0 : i32
    %220 = tpu.memref_slice %arg2[%162, %c0_i32_99] : memref<500x128xf32, #tpu.memory_space<any>> -> memref<1x128xf32, #tpu.memory_space<any>>
    %221 = tpu.memref_squeeze %220 : memref<1x128xf32, #tpu.memory_space<any>> -> memref<128xf32, #tpu.memory_space<any>>
    %c0_i32_100 = arith.constant 0 : i32
    %222 = tpu.memref_slice %arg3[%c244_i32, %c0_i32_100] : memref<256x128xf32, #tpu.memory_space<vmem>> -> memref<1x128xf32, #tpu.memory_space<vmem>>
    %223 = tpu.memref_squeeze %222 : memref<1x128xf32, #tpu.memory_space<vmem>> -> memref<128xf32, #tpu.memory_space<vmem>>
    %224 = tpu.memref_slice %arg4[%c4_i32_98] : memref<16x!tpu.dma_semaphore, #tpu.memory_space<semaphore_mem>> -> memref<1x!tpu.dma_semaphore, #tpu.memory_space<semaphore_mem>>
    %225 = tpu.memref_squeeze %224 : memref<1x!tpu.dma_semaphore, #tpu.memory_space<semaphore_mem>> -> memref<!tpu.dma_semaphore, #tpu.memory_space<semaphore_mem>>
    tpu.wait_dma2 semaphore(%225 : memref<!tpu.dma_semaphore, #tpu.memory_space<semaphore_mem>>) src(%221 : memref<128xf32, #tpu.memory_space<any>>) dst(%223 : memref<128xf32, #tpu.memory_space<vmem>>)
    %c245_i32 = arith.constant 245 : i32
    %c5_i32_101 = arith.constant 5 : i32
    %c0_i32_102 = arith.constant 0 : i32
    %226 = tpu.memref_slice %arg2[%165, %c0_i32_102] : memref<500x128xf32, #tpu.memory_space<any>> -> memref<1x128xf32, #tpu.memory_space<any>>
    %227 = tpu.memref_squeeze %226 : memref<1x128xf32, #tpu.memory_space<any>> -> memref<128xf32, #tpu.memory_space<any>>
    %c0_i32_103 = arith.constant 0 : i32
    %228 = tpu.memref_slice %arg3[%c245_i32, %c0_i32_103] : memref<256x128xf32, #tpu.memory_space<vmem>> -> memref<1x128xf32, #tpu.memory_space<vmem>>
    %229 = tpu.memref_squeeze %228 : memref<1x128xf32, #tpu.memory_space<vmem>> -> memref<128xf32, #tpu.memory_space<vmem>>
    %230 = tpu.memref_slice %arg4[%c5_i32_101] : memref<16x!tpu.dma_semaphore, #tpu.memory_space<semaphore_mem>> -> memref<1x!tpu.dma_semaphore, #tpu.memory_space<semaphore_mem>>
    %231 = tpu.memref_squeeze %230 : memref<1x!tpu.dma_semaphore, #tpu.memory_space<semaphore_mem>> -> memref<!tpu.dma_semaphore, #tpu.memory_space<semaphore_mem>>
    tpu.wait_dma2 semaphore(%231 : memref<!tpu.dma_semaphore, #tpu.memory_space<semaphore_mem>>) src(%227 : memref<128xf32, #tpu.memory_space<any>>) dst(%229 : memref<128xf32, #tpu.memory_space<vmem>>)
    %c246_i32 = arith.constant 246 : i32
    %c6_i32_104 = arith.constant 6 : i32
    %c0_i32_105 = arith.constant 0 : i32
    %232 = tpu.memref_slice %arg2[%168, %c0_i32_105] : memref<500x128xf32, #tpu.memory_space<any>> -> memref<1x128xf32, #tpu.memory_space<any>>
    %233 = tpu.memref_squeeze %232 : memref<1x128xf32, #tpu.memory_space<any>> -> memref<128xf32, #tpu.memory_space<any>>
    %c0_i32_106 = arith.constant 0 : i32
    %234 = tpu.memref_slice %arg3[%c246_i32, %c0_i32_106] : memref<256x128xf32, #tpu.memory_space<vmem>> -> memref<1x128xf32, #tpu.memory_space<vmem>>
    %235 = tpu.memref_squeeze %234 : memref<1x128xf32, #tpu.memory_space<vmem>> -> memref<128xf32, #tpu.memory_space<vmem>>
    %236 = tpu.memref_slice %arg4[%c6_i32_104] : memref<16x!tpu.dma_semaphore, #tpu.memory_space<semaphore_mem>> -> memref<1x!tpu.dma_semaphore, #tpu.memory_space<semaphore_mem>>
    %237 = tpu.memref_squeeze %236 : memref<1x!tpu.dma_semaphore, #tpu.memory_space<semaphore_mem>> -> memref<!tpu.dma_semaphore, #tpu.memory_space<semaphore_mem>>
    tpu.wait_dma2 semaphore(%237 : memref<!tpu.dma_semaphore, #tpu.memory_space<semaphore_mem>>) src(%233 : memref<128xf32, #tpu.memory_space<any>>) dst(%235 : memref<128xf32, #tpu.memory_space<vmem>>)
    %c247_i32 = arith.constant 247 : i32
    %c7_i32_107 = arith.constant 7 : i32
    %c0_i32_108 = arith.constant 0 : i32
    %238 = tpu.memref_slice %arg2[%171, %c0_i32_108] : memref<500x128xf32, #tpu.memory_space<any>> -> memref<1x128xf32, #tpu.memory_space<any>>
    %239 = tpu.memref_squeeze %238 : memref<1x128xf32, #tpu.memory_space<any>> -> memref<128xf32, #tpu.memory_space<any>>
    %c0_i32_109 = arith.constant 0 : i32
    %240 = tpu.memref_slice %arg3[%c247_i32, %c0_i32_109] : memref<256x128xf32, #tpu.memory_space<vmem>> -> memref<1x128xf32, #tpu.memory_space<vmem>>
    %241 = tpu.memref_squeeze %240 : memref<1x128xf32, #tpu.memory_space<vmem>> -> memref<128xf32, #tpu.memory_space<vmem>>
    %242 = tpu.memref_slice %arg4[%c7_i32_107] : memref<16x!tpu.dma_semaphore, #tpu.memory_space<semaphore_mem>> -> memref<1x!tpu.dma_semaphore, #tpu.memory_space<semaphore_mem>>
    %243 = tpu.memref_squeeze %242 : memref<1x!tpu.dma_semaphore, #tpu.memory_space<semaphore_mem>> -> memref<!tpu.dma_semaphore, #tpu.memory_space<semaphore_mem>>
    tpu.wait_dma2 semaphore(%243 : memref<!tpu.dma_semaphore, #tpu.memory_space<semaphore_mem>>) src(%239 : memref<128xf32, #tpu.memory_space<any>>) dst(%241 : memref<128xf32, #tpu.memory_space<vmem>>)
    %c248_i32 = arith.constant 248 : i32
    %c8_i32_110 = arith.constant 8 : i32
    %c0_i32_111 = arith.constant 0 : i32
    %244 = tpu.memref_slice %arg2[%174, %c0_i32_111] : memref<500x128xf32, #tpu.memory_space<any>> -> memref<1x128xf32, #tpu.memory_space<any>>
    %245 = tpu.memref_squeeze %244 : memref<1x128xf32, #tpu.memory_space<any>> -> memref<128xf32, #tpu.memory_space<any>>
    %c0_i32_112 = arith.constant 0 : i32
    %246 = tpu.memref_slice %arg3[%c248_i32, %c0_i32_112] : memref<256x128xf32, #tpu.memory_space<vmem>> -> memref<1x128xf32, #tpu.memory_space<vmem>>
    %247 = tpu.memref_squeeze %246 : memref<1x128xf32, #tpu.memory_space<vmem>> -> memref<128xf32, #tpu.memory_space<vmem>>
    %248 = tpu.memref_slice %arg4[%c8_i32_110] : memref<16x!tpu.dma_semaphore, #tpu.memory_space<semaphore_mem>> -> memref<1x!tpu.dma_semaphore, #tpu.memory_space<semaphore_mem>>
    %249 = tpu.memref_squeeze %248 : memref<1x!tpu.dma_semaphore, #tpu.memory_space<semaphore_mem>> -> memref<!tpu.dma_semaphore, #tpu.memory_space<semaphore_mem>>
    tpu.wait_dma2 semaphore(%249 : memref<!tpu.dma_semaphore, #tpu.memory_space<semaphore_mem>>) src(%245 : memref<128xf32, #tpu.memory_space<any>>) dst(%247 : memref<128xf32, #tpu.memory_space<vmem>>)
    %c249_i32 = arith.constant 249 : i32
    %c9_i32_113 = arith.constant 9 : i32
    %c0_i32_114 = arith.constant 0 : i32
    %250 = tpu.memref_slice %arg2[%177, %c0_i32_114] : memref<500x128xf32, #tpu.memory_space<any>> -> memref<1x128xf32, #tpu.memory_space<any>>
    %251 = tpu.memref_squeeze %250 : memref<1x128xf32, #tpu.memory_space<any>> -> memref<128xf32, #tpu.memory_space<any>>
    %c0_i32_115 = arith.constant 0 : i32
    %252 = tpu.memref_slice %arg3[%c249_i32, %c0_i32_115] : memref<256x128xf32, #tpu.memory_space<vmem>> -> memref<1x128xf32, #tpu.memory_space<vmem>>
    %253 = tpu.memref_squeeze %252 : memref<1x128xf32, #tpu.memory_space<vmem>> -> memref<128xf32, #tpu.memory_space<vmem>>
    %254 = tpu.memref_slice %arg4[%c9_i32_113] : memref<16x!tpu.dma_semaphore, #tpu.memory_space<semaphore_mem>> -> memref<1x!tpu.dma_semaphore, #tpu.memory_space<semaphore_mem>>
    %255 = tpu.memref_squeeze %254 : memref<1x!tpu.dma_semaphore, #tpu.memory_space<semaphore_mem>> -> memref<!tpu.dma_semaphore, #tpu.memory_space<semaphore_mem>>
    tpu.wait_dma2 semaphore(%255 : memref<!tpu.dma_semaphore, #tpu.memory_space<semaphore_mem>>) src(%251 : memref<128xf32, #tpu.memory_space<any>>) dst(%253 : memref<128xf32, #tpu.memory_space<vmem>>)
    %c250_i32 = arith.constant 250 : i32
    %c10_i32_116 = arith.constant 10 : i32
    %c0_i32_117 = arith.constant 0 : i32
    %256 = tpu.memref_slice %arg2[%180, %c0_i32_117] : memref<500x128xf32, #tpu.memory_space<any>> -> memref<1x128xf32, #tpu.memory_space<any>>
    %257 = tpu.memref_squeeze %256 : memref<1x128xf32, #tpu.memory_space<any>> -> memref<128xf32, #tpu.memory_space<any>>
    %c0_i32_118 = arith.constant 0 : i32
    %258 = tpu.memref_slice %arg3[%c250_i32, %c0_i32_118] : memref<256x128xf32, #tpu.memory_space<vmem>> -> memref<1x128xf32, #tpu.memory_space<vmem>>
    %259 = tpu.memref_squeeze %258 : memref<1x128xf32, #tpu.memory_space<vmem>> -> memref<128xf32, #tpu.memory_space<vmem>>
    %260 = tpu.memref_slice %arg4[%c10_i32_116] : memref<16x!tpu.dma_semaphore, #tpu.memory_space<semaphore_mem>> -> memref<1x!tpu.dma_semaphore, #tpu.memory_space<semaphore_mem>>
    %261 = tpu.memref_squeeze %260 : memref<1x!tpu.dma_semaphore, #tpu.memory_space<semaphore_mem>> -> memref<!tpu.dma_semaphore, #tpu.memory_space<semaphore_mem>>
    tpu.wait_dma2 semaphore(%261 : memref<!tpu.dma_semaphore, #tpu.memory_space<semaphore_mem>>) src(%257 : memref<128xf32, #tpu.memory_space<any>>) dst(%259 : memref<128xf32, #tpu.memory_space<vmem>>)
    %c251_i32 = arith.constant 251 : i32
    %c11_i32_119 = arith.constant 11 : i32
    %c0_i32_120 = arith.constant 0 : i32
    %262 = tpu.memref_slice %arg2[%183, %c0_i32_120] : memref<500x128xf32, #tpu.memory_space<any>> -> memref<1x128xf32, #tpu.memory_space<any>>
    %263 = tpu.memref_squeeze %262 : memref<1x128xf32, #tpu.memory_space<any>> -> memref<128xf32, #tpu.memory_space<any>>
    %c0_i32_121 = arith.constant 0 : i32
    %264 = tpu.memref_slice %arg3[%c251_i32, %c0_i32_121] : memref<256x128xf32, #tpu.memory_space<vmem>> -> memref<1x128xf32, #tpu.memory_space<vmem>>
    %265 = tpu.memref_squeeze %264 : memref<1x128xf32, #tpu.memory_space<vmem>> -> memref<128xf32, #tpu.memory_space<vmem>>
    %266 = tpu.memref_slice %arg4[%c11_i32_119] : memref<16x!tpu.dma_semaphore, #tpu.memory_space<semaphore_mem>> -> memref<1x!tpu.dma_semaphore, #tpu.memory_space<semaphore_mem>>
    %267 = tpu.memref_squeeze %266 : memref<1x!tpu.dma_semaphore, #tpu.memory_space<semaphore_mem>> -> memref<!tpu.dma_semaphore, #tpu.memory_space<semaphore_mem>>
    tpu.wait_dma2 semaphore(%267 : memref<!tpu.dma_semaphore, #tpu.memory_space<semaphore_mem>>) src(%263 : memref<128xf32, #tpu.memory_space<any>>) dst(%265 : memref<128xf32, #tpu.memory_space<vmem>>)
    %c252_i32 = arith.constant 252 : i32
    %c12_i32_122 = arith.constant 12 : i32
    %c0_i32_123 = arith.constant 0 : i32
    %268 = tpu.memref_slice %arg2[%186, %c0_i32_123] : memref<500x128xf32, #tpu.memory_space<any>> -> memref<1x128xf32, #tpu.memory_space<any>>
    %269 = tpu.memref_squeeze %268 : memref<1x128xf32, #tpu.memory_space<any>> -> memref<128xf32, #tpu.memory_space<any>>
    %c0_i32_124 = arith.constant 0 : i32
    %270 = tpu.memref_slice %arg3[%c252_i32, %c0_i32_124] : memref<256x128xf32, #tpu.memory_space<vmem>> -> memref<1x128xf32, #tpu.memory_space<vmem>>
    %271 = tpu.memref_squeeze %270 : memref<1x128xf32, #tpu.memory_space<vmem>> -> memref<128xf32, #tpu.memory_space<vmem>>
    %272 = tpu.memref_slice %arg4[%c12_i32_122] : memref<16x!tpu.dma_semaphore, #tpu.memory_space<semaphore_mem>> -> memref<1x!tpu.dma_semaphore, #tpu.memory_space<semaphore_mem>>
    %273 = tpu.memref_squeeze %272 : memref<1x!tpu.dma_semaphore, #tpu.memory_space<semaphore_mem>> -> memref<!tpu.dma_semaphore, #tpu.memory_space<semaphore_mem>>
    tpu.wait_dma2 semaphore(%273 : memref<!tpu.dma_semaphore, #tpu.memory_space<semaphore_mem>>) src(%269 : memref<128xf32, #tpu.memory_space<any>>) dst(%271 : memref<128xf32, #tpu.memory_space<vmem>>)
    %c253_i32 = arith.constant 253 : i32
    %c13_i32_125 = arith.constant 13 : i32
    %c0_i32_126 = arith.constant 0 : i32
    %274 = tpu.memref_slice %arg2[%189, %c0_i32_126] : memref<500x128xf32, #tpu.memory_space<any>> -> memref<1x128xf32, #tpu.memory_space<any>>
    %275 = tpu.memref_squeeze %274 : memref<1x128xf32, #tpu.memory_space<any>> -> memref<128xf32, #tpu.memory_space<any>>
    %c0_i32_127 = arith.constant 0 : i32
    %276 = tpu.memref_slice %arg3[%c253_i32, %c0_i32_127] : memref<256x128xf32, #tpu.memory_space<vmem>> -> memref<1x128xf32, #tpu.memory_space<vmem>>
    %277 = tpu.memref_squeeze %276 : memref<1x128xf32, #tpu.memory_space<vmem>> -> memref<128xf32, #tpu.memory_space<vmem>>
    %278 = tpu.memref_slice %arg4[%c13_i32_125] : memref<16x!tpu.dma_semaphore, #tpu.memory_space<semaphore_mem>> -> memref<1x!tpu.dma_semaphore, #tpu.memory_space<semaphore_mem>>
    %279 = tpu.memref_squeeze %278 : memref<1x!tpu.dma_semaphore, #tpu.memory_space<semaphore_mem>> -> memref<!tpu.dma_semaphore, #tpu.memory_space<semaphore_mem>>
    tpu.wait_dma2 semaphore(%279 : memref<!tpu.dma_semaphore, #tpu.memory_space<semaphore_mem>>) src(%275 : memref<128xf32, #tpu.memory_space<any>>) dst(%277 : memref<128xf32, #tpu.memory_space<vmem>>)
    %c254_i32 = arith.constant 254 : i32
    %c14_i32_128 = arith.constant 14 : i32
    %c0_i32_129 = arith.constant 0 : i32
    %280 = tpu.memref_slice %arg2[%192, %c0_i32_129] : memref<500x128xf32, #tpu.memory_space<any>> -> memref<1x128xf32, #tpu.memory_space<any>>
    %281 = tpu.memref_squeeze %280 : memref<1x128xf32, #tpu.memory_space<any>> -> memref<128xf32, #tpu.memory_space<any>>
    %c0_i32_130 = arith.constant 0 : i32
    %282 = tpu.memref_slice %arg3[%c254_i32, %c0_i32_130] : memref<256x128xf32, #tpu.memory_space<vmem>> -> memref<1x128xf32, #tpu.memory_space<vmem>>
    %283 = tpu.memref_squeeze %282 : memref<1x128xf32, #tpu.memory_space<vmem>> -> memref<128xf32, #tpu.memory_space<vmem>>
    %284 = tpu.memref_slice %arg4[%c14_i32_128] : memref<16x!tpu.dma_semaphore, #tpu.memory_space<semaphore_mem>> -> memref<1x!tpu.dma_semaphore, #tpu.memory_space<semaphore_mem>>
    %285 = tpu.memref_squeeze %284 : memref<1x!tpu.dma_semaphore, #tpu.memory_space<semaphore_mem>> -> memref<!tpu.dma_semaphore, #tpu.memory_space<semaphore_mem>>
    tpu.wait_dma2 semaphore(%285 : memref<!tpu.dma_semaphore, #tpu.memory_space<semaphore_mem>>) src(%281 : memref<128xf32, #tpu.memory_space<any>>) dst(%283 : memref<128xf32, #tpu.memory_space<vmem>>)
    %c255_i32 = arith.constant 255 : i32
    %c15_i32_131 = arith.constant 15 : i32
    %c0_i32_132 = arith.constant 0 : i32
    %286 = tpu.memref_slice %arg2[%195, %c0_i32_132] : memref<500x128xf32, #tpu.memory_space<any>> -> memref<1x128xf32, #tpu.memory_space<any>>
    %287 = tpu.memref_squeeze %286 : memref<1x128xf32, #tpu.memory_space<any>> -> memref<128xf32, #tpu.memory_space<any>>
    %c0_i32_133 = arith.constant 0 : i32
    %288 = tpu.memref_slice %arg3[%c255_i32, %c0_i32_133] : memref<256x128xf32, #tpu.memory_space<vmem>> -> memref<1x128xf32, #tpu.memory_space<vmem>>
    %289 = tpu.memref_squeeze %288 : memref<1x128xf32, #tpu.memory_space<vmem>> -> memref<128xf32, #tpu.memory_space<vmem>>
    %290 = tpu.memref_slice %arg4[%c15_i32_131] : memref<16x!tpu.dma_semaphore, #tpu.memory_space<semaphore_mem>> -> memref<1x!tpu.dma_semaphore, #tpu.memory_space<semaphore_mem>>
    %291 = tpu.memref_squeeze %290 : memref<1x!tpu.dma_semaphore, #tpu.memory_space<semaphore_mem>> -> memref<!tpu.dma_semaphore, #tpu.memory_space<semaphore_mem>>
    tpu.wait_dma2 semaphore(%291 : memref<!tpu.dma_semaphore, #tpu.memory_space<semaphore_mem>>) src(%287 : memref<128xf32, #tpu.memory_space<any>>) dst(%289 : memref<128xf32, #tpu.memory_space<vmem>>)
    return
  }
  func.func @transform_1(%arg0: i32, %arg1: memref<512xi32, #tpu.memory_space<smem>>) -> (i32, i32) {
    %c0_i32 = arith.constant 0 : i32
    %c0_i32_0 = arith.constant 0 : i32
    return %arg0, %c0_i32 : i32, i32
  }
}

</mosaic_0001>

<bundles_post_ra>
// kernel: tpu_custom_call.1
= control target key start
LH: loop header
LB: loop body
LE: loop exit
PB: predicated region body
PF: predicated region fallthrough
CT: control target
= control target key end

     0   :  { %s2741_s0 = inlined_call_operand.hbm [shape: s32[512], index: 0, kind: input, shape index: {}]   ;;  %s2742_s1 = inlined_call_operand.hbm [shape: f32[500,128], index: 1, kind: input, shape index: {}]   ;;  %s2743_s2 = inlined_call_operand.hbm [shape: f32[312,128], index: 2, kind: output, shape index: {}]  }
   0x1   :  { %2759 = sst [smem:[#allocation118_spill]] %s2743_s2  ;;  %s1152_s11 = scalar_lea.hbm %s2741_s0, 64 }
   0x2   :  { %p1153_p0 = scmp.ne.s32.totalorder %s2741_s0, %s1152_s11  ;;  %p1156_p1 = scmp.lt.u32.totalorder %s1152_s11, %s2741_s0 }
   0x4   :  { %p1158_p2 = pnand %p1156_p1, %p1153_p0 }
   0x6   :  { %1161 = shalt.err (!%p1158_p2)  }
   0x7   :  { %s2060_s16 = smov [#allocation4]  }
   0x8   :  { %8 = dma.hbm_to_smem %s2741_s0, 64, %s2060_s16, [#allocation3] }
   0x9   :  { %1974 = dma.done.wait [#allocation3], 64 }
   0xa   :  { %1975 = vsyncadd [#allocation3], 4294967232 }
   0xb   :  { %10 = sfence }
   0xc   :  { %11 = vsyncpa [#allocation6], 0 }
   0xd   :  { %13 = vsyncpa [#allocation6 + $0x1], 0  ;;  %s2091_s19 = smov 0   ;;  %s2093_s20 = smov 0  }
   0xe   :  { %s2095_s21 = smov 0  }
   0xf LB: > { %2760 = sst [smem:[#allocation107_spill]] %s2046_s19  ;;  %s1029_s0 = sadd.s32 4294967295, %s2054_s21   ;;  %s2054_s21 = sphi %s2095_s21, %s2788_s21   ;;  %s2050_s20 = sphi %s2093_s20, %s2790_s20   ;;  %s2046_s19 = sphi %s2091_s19, %s2789_s19  }
  0x10   : > { %2761 = sst [smem:[#allocation108_spill]] %s2050_s20  ;;  %s2108_s22 = sadd.s32 1, %s2054_s21  }
  0x11   : > { %2762 = sst [smem:[#allocation109_spill]] %s2054_s21  ;;  %s22_s23 = ssub.s32 %s2054_s21, %s2108_s22 }
  0x12   : > { %2763 = sst [smem:[#allocation110_spill]] %s2108_s22  ;;  %s25_s24 = sadd.s32 1, %s2050_s20 }
  0x13   : > { %p23_p3 = scmp.eq.s32.totalorder %s22_s23, 0  ;;  %p1030_p4 = scmp.ne.s32.totalorder %s22_s23, 0 }
  0x14   : > { %p29_p5 = scmp.eq.s32.totalorder %s2054_s21, 1  ;;  %p34_p6 = scmp.ne.s32.totalorder %s2050_s20, %s2046_s19 }
  0x15   : > { %s2117_s25 = scalar_select %p23_p3, %s2050_s20, %s25_s24  }
  0x16   : > { %p2119_p7 = por %p1030_p4, %p29_p5  ;;  %p35_p8 = scmp.eq.s32.totalorder %s1029_s0, 1 }
  0x17   : > { %2764 = sst [smem:[#allocation111_spill]] %s2117_s25  ;;  %p1031_p10 = scmp.ge.s32.totalorder %s2054_s21, 2 }
  0x18   : > { %s2765_s26 = scalar_select %p2119_p7, 1, 0 }
  0x19   : > { %p2123_p9 = por %p35_p8, %p34_p6  ;;  %44 = sbr.rel (%p1031_p10) target bundleno = 872 (0x368), region = 12 }
  0x1a   : > { %2766 = sst [smem:[#allocation112_spill]] %s2765_s26 }
  0x1b   : > { %s2767_s27 = scalar_select %p2123_p9, 1, 0 }
  0x1d   : > { %2768 = sst [smem:[#allocation113_spill]] %s2767_s27 }
  0x20   : > { %s2745_s28 = sand.u32 1, %s2050_s20   ;;  %s2130_s29 = sshll.u32 %s2054_s21, 8 }
  0x21   : > { %2769 = sst [smem:[#allocation114_spill]] %s2130_s29  ;;  %s1032_s30 = sshll.u32 %s2745_s28, 8 }
  0x22   : > { %s58_s3 = sld [smem:[#allocation4 + %s2130_s29]]  ;;  %s59_s4 = sadd.s32 1, %s2130_s29 }
  0x23   : > { %s2136_s5 = scalar_lea.vmem [#allocation5], %s1032_s30  ;;  %s2139_s7 = sld [smem:[#allocation4 + %s59_s4]] }
  0x24   : > { %s98_s6 = sshll.u32 %s2136_s5, 4  ;;  %s104_s8 = scalar_lea.vmem %s2136_s5, 1 [#allocation5]  ;;  %s2141_s6 = int_to_ptr.vmem [resolvable:$true] %s98_s6 }
  0x25   : > { %2770 = sst [smem:[#allocation115_spill]] %s2141_s6  ;;  %s113_s9 = sshll.u32 %s104_s8, 4  ;;  %s2145_s9 = int_to_ptr.vmem [resolvable:$true] %s113_s9 }
  0x26   : > { %s61_s10 = sadd.s32 2, %s2130_s29  ;;  %s119_s13 = scalar_lea.vmem %s2136_s5, 2 [#allocation5] }
  0x27   : > { %s2147_s11 = sld [smem:[#allocation4 + %s61_s10]]  ;;  %s128_s17 = sshll.u32 %s119_s13, 4  ;;  %s2177_s17 = int_to_ptr.vmem [resolvable:$true] %s128_s17 }
  0x28   : > { %s1034_s12 = sshll.u32 %s58_s3, 4  ;;  %s2156_s24 = scalar_lea.hbm %s2742_s1, 8064 }
  0x29   : > { %s90_s16 = scalar_lea.hbm %s2742_s1, %s1034_s12 }
  0x2a   : > { %s1162_s18 = scalar_lea.hbm %s90_s16, 16  ;;  %p1165_p12 = scmp.lt.u32.totalorder %s90_s16, %s2742_s1 }
  0x2b   : > { %p1163_p11 = scmp.ne.s32.totalorder %s90_s16, %s1162_s18  ;;  %p1166_p13 = scmp.lt.u32.totalorder %s2156_s24, %s1162_s18 }
  0x2c   : > { %p1168_p1 = scmp.lt.u32.totalorder %s1162_s18, %s90_s16 }
  0x2d   : > { %p1167_p0 = por %p1166_p13, %p1165_p12 }
  0x2f   : > { %p1169_p2 = por %p1168_p1, %p1167_p0 }
  0x31   : > { %p1170_p3 = pnand %p1169_p2, %p1163_p11 }
  0x33   : > { %1173 = shalt.err (!%p1170_p3)  }
  0x34   : > { %s1174_s3 = scalar_lea.vmem %s2141_s6, 16  ;;  %s2061_s8 = smov [#allocation5]  }
  0x35   : > { %p1175_p4 = scmp.ne.s32.totalorder %s2141_s6, %s1174_s3  ;;  %s1176_s10 = sshll.u32 %s2061_s8, 4  ;;  %s2164_s10 = int_to_ptr.vmem [resolvable:$false] %s1176_s10 }
  0x36   : > { %s2167_s12 = scalar_lea.vmem %s2164_s10, 8192  ;;  %p2744_p5 = scmp.lt.s32.totalorder %s2141_s6, %s2164_s10 }
  0x37   : > { %p1180_p6 = scmp.lt.s32.totalorder %s2167_s12, %s1174_s3 }
  0x39   : > { %p1181_p8 = por %p1180_p6, %p2744_p5 }
  0x3b   : > { %p1182_p10 = pnand %p1181_p8, %p1175_p4 }
  0x3d   : > { %1185 = shalt.err (!%p1182_p10)  }
  0x3e   : > { %101 = dma.hbm_to_vmem [thread:$0]  %s90_s16, 16, %s2141_s6, [#allocation2] }
  0x3f   : > { %s1035_s13 = sshll.u32 %s2139_s7, 4  ;;  %s63_s0 = sadd.s32 3, %s2130_s29 }
  0x40   : > { %s103_s18 = scalar_lea.hbm %s2742_s1, %s1035_s13 }
  0x41   : > { %s1186_s23 = scalar_lea.hbm %s103_s18, 16  ;;  %p1189_p12 = scmp.lt.u32.totalorder %s103_s18, %s2742_s1 }
  0x42   : > { %p1187_p11 = scmp.ne.s32.totalorder %s103_s18, %s1186_s23  ;;  %p1190_p13 = scmp.lt.u32.totalorder %s2156_s24, %s1186_s23 }
  0x43   : > { %p1192_p1 = scmp.lt.u32.totalorder %s1186_s23, %s103_s18 }
  0x44   : > { %p1191_p0 = por %p1190_p13, %p1189_p12 }
  0x46   : > { %p1193_p2 = por %p1192_p1, %p1191_p0 }
  0x48   : > { %p1194_p3 = pnand %p1193_p2, %p1187_p11 }
  0x4a   : > { %1197 = shalt.err (!%p1194_p3)  }
  0x4b   : > { %s1198_s7 = scalar_lea.vmem %s2145_s9, 16  ;;  %p1203_p6 = scmp.lt.s32.totalorder %s2145_s9, %s2164_s10 }
  0x4c   : > { %p1199_p4 = scmp.ne.s32.totalorder %s2145_s9, %s1198_s7  ;;  %p1204_p8 = scmp.lt.s32.totalorder %s2167_s12, %s1198_s7 }
  0x4e   : > { %p1205_p10 = por %p1204_p8, %p1203_p6 }
  0x50   : > { %p1206_p5 = pnand %p1205_p10, %p1199_p4 }
  0x52   : > { %1209 = shalt.err (!%p1206_p5)  }
  0x53   : > { %116 = dma.hbm_to_vmem [thread:$0]  %s103_s18, 16, %s2145_s9, [#allocation2 + $0x1] }
  0x54   : > { %s1036_s16 = sshll.u32 %s2147_s11, 4  ;;  %s2194_s3 = sld [smem:[#allocation4 + %s63_s0]] }
  0x55   : > { %s118_s14 = scalar_lea.hbm %s2742_s1, %s1036_s16  ;;  %s134_s15 = scalar_lea.vmem %s2136_s5, 3 [#allocation5] }
  0x56   : > { %s1210_s23 = scalar_lea.hbm %s118_s14, 16  ;;  %p1213_p12 = scmp.lt.u32.totalorder %s118_s14, %s2742_s1 }
  0x57   : > { %p1211_p11 = scmp.ne.s32.totalorder %s118_s14, %s1210_s23  ;;  %p1214_p5 = scmp.lt.u32.totalorder %s2156_s24, %s1210_s23 }
  0x58   : > { %p1216_p0 = scmp.lt.u32.totalorder %s1210_s23, %s118_s14 }
  0x59   : > { %p1215_p13 = por %p1214_p5, %p1213_p12 }
  0x5b   : > { %p1217_p1 = por %p1216_p0, %p1215_p13 }
  0x5d   : > { %p1218_p2 = pnand %p1217_p1, %p1211_p11 }
  0x5f   : > { %1221 = shalt.err (!%p1218_p2)  }
  0x60   : > { %s1222_s9 = scalar_lea.vmem %s2177_s17, 16  ;;  %p1227_p4 = scmp.lt.s32.totalorder %s2177_s17, %s2164_s10 }
  0x61   : > { %p1223_p3 = scmp.ne.s32.totalorder %s2177_s17, %s1222_s9  ;;  %p1228_p6 = scmp.lt.s32.totalorder %s2167_s12, %s1222_s9 }
  0x63   : > { %p1229_p8 = por %p1228_p6, %p1227_p4 }
  0x65   : > { %p1230_p10 = pnand %p1229_p8, %p1223_p3 }
  0x67   : > { %1233 = shalt.err (!%p1230_p10)  }
  0x68   : > { %131 = dma.hbm_to_vmem [thread:$0]  %s118_s14, 16, %s2177_s17, [#allocation2 + $0x2] }
  0x69   : > { %s143_s11 = sshll.u32 %s134_s15, 4  ;;  %s65_s18 = sadd.s32 4, %s2130_s29  ;;  %s144_s11 = int_to_ptr.vmem [resolvable:$true] %s143_s11 }
  0x6a   : > { %s2211_s0 = sld [smem:[#allocation4 + %s65_s18]]  ;;  %s149_s7 = scalar_lea.vmem %s2136_s5, 4 [#allocation5] }
  0x6b   : > { %s67_s16 = sadd.s32 5, %s2130_s29  ;;  %s1037_s8 = sshll.u32 %s2194_s3, 4 }
  0x6c   : > { %s158_s13 = sshll.u32 %s149_s7, 4  ;;  %s133_s4 = scalar_lea.hbm %s2742_s1, %s1037_s8  ;;  %s2219_s13 = int_to_ptr.vmem [resolvable:$true] %s158_s13 }
  0x6d   : > { %s1234_s9 = scalar_lea.hbm %s133_s4, 16  ;;  %p1237_p12 = scmp.lt.u32.totalorder %s133_s4, %s2742_s1 }
  0x6e   : > { %p1235_p11 = scmp.ne.s32.totalorder %s133_s4, %s1234_s9  ;;  %p1238_p5 = scmp.lt.u32.totalorder %s2156_s24, %s1234_s9 }
  0x6f   : > { %p1240_p0 = scmp.lt.u32.totalorder %s1234_s9, %s133_s4 }
  0x70   : > { %p1239_p13 = por %p1238_p5, %p1237_p12 }
  0x72   : > { %p1241_p1 = por %p1240_p0, %p1239_p13 }
  0x74   : > { %p1242_p2 = pnand %p1241_p1, %p1235_p11 }
  0x76   : > { %1245 = shalt.err (!%p1242_p2)  }
  0x77   : > { %s1246_s17 = scalar_lea.vmem %s144_s11, 16  ;;  %p1251_p4 = scmp.lt.s32.totalorder %s144_s11, %s2164_s10 }
  0x78   : > { %p1247_p3 = scmp.ne.s32.totalorder %s144_s11, %s1246_s17  ;;  %p1252_p6 = scmp.lt.s32.totalorder %s2167_s12, %s1246_s17 }
  0x7a   : > { %p1253_p8 = por %p1252_p6, %p1251_p4 }
  0x7c   : > { %p1254_p10 = pnand %p1253_p8, %p1247_p3 }
  0x7e   : > { %1257 = shalt.err (!%p1254_p10)  }
  0x7f   : > { %146 = dma.hbm_to_vmem [thread:$0]  %s133_s4, 16, %s144_s11, [#allocation2 + $0x3] }
  0x80   : > { %s2227_s25 = sld [smem:[#allocation4 + %s67_s16]]  ;;  %s164_s28 = scalar_lea.vmem %s2136_s5, 5 [#allocation5] }
  0x81   : > { %s1038_s3 = sshll.u32 %s2211_s0, 4  ;;  %s173_s14 = sshll.u32 %s164_s28, 4  ;;  %s2234_s14 = int_to_ptr.vmem [resolvable:$true] %s173_s14 }
  0x82   : > { %s148_s7 = scalar_lea.hbm %s2742_s1, %s1038_s3 }
  0x83   : > { %s1258_s8 = scalar_lea.hbm %s148_s7, 16  ;;  %p1261_p12 = scmp.lt.u32.totalorder %s148_s7, %s2742_s1 }
  0x84   : > { %p1259_p11 = scmp.ne.s32.totalorder %s148_s7, %s1258_s8  ;;  %p1262_p5 = scmp.lt.u32.totalorder %s2156_s24, %s1258_s8 }
  0x85   : > { %p1264_p0 = scmp.lt.u32.totalorder %s1258_s8, %s148_s7 }
  0x86   : > { %p1263_p13 = por %p1262_p5, %p1261_p12 }
  0x88   : > { %p1265_p1 = por %p1264_p0, %p1263_p13 }
  0x8a   : > { %p1266_p2 = pnand %p1265_p1, %p1259_p11 }
  0x8c   : > { %1269 = shalt.err (!%p1266_p2)  }
  0x8d   : > { %s1270_s11 = scalar_lea.vmem %s2219_s13, 16  ;;  %p1275_p4 = scmp.lt.s32.totalorder %s2219_s13, %s2164_s10 }
  0x8e   : > { %p1271_p3 = scmp.ne.s32.totalorder %s2219_s13, %s1270_s11  ;;  %p1276_p6 = scmp.lt.s32.totalorder %s2167_s12, %s1270_s11 }
  0x90   : > { %p1277_p8 = por %p1276_p6, %p1275_p4 }
  0x92   : > { %p1278_p10 = pnand %p1277_p8, %p1271_p3 }
  0x94   : > { %1281 = shalt.err (!%p1278_p10)  }
  0x95   : > { %161 = dma.hbm_to_vmem [thread:$0]  %s148_s7, 16, %s2219_s13, [#allocation2 + $0x4] }
  0x96   : > { %s69_s0 = sadd.s32 6, %s2130_s29  ;;  %s179_s16 = scalar_lea.vmem %s2136_s5, 6 [#allocation5] }
  0x97   : > { %s2248_s4 = sld [smem:[#allocation4 + %s69_s0]]  ;;  %s188_s9 = sshll.u32 %s179_s16, 4  ;;  %s2251_s9 = int_to_ptr.vmem [resolvable:$true] %s188_s9 }
  0x98   : > { %s1039_s17 = sshll.u32 %s2227_s25, 4  ;;  %s71_s18 = sadd.s32 7, %s2130_s29 }
  0x99   : > { %s163_s15 = scalar_lea.hbm %s2742_s1, %s1039_s17 }
  0x9a   : > { %s1282_s8 = scalar_lea.hbm %s163_s15, 16  ;;  %p1285_p12 = scmp.lt.u32.totalorder %s163_s15, %s2742_s1 }
  0x9b   : > { %p1283_p11 = scmp.ne.s32.totalorder %s163_s15, %s1282_s8  ;;  %p1286_p5 = scmp.lt.u32.totalorder %s2156_s24, %s1282_s8 }
  0x9c   : > { %p1288_p0 = scmp.lt.u32.totalorder %s1282_s8, %s163_s15 }
  0x9d   : > { %p1287_p13 = por %p1286_p5, %p1285_p12 }
  0x9f   : > { %p1289_p1 = por %p1288_p0, %p1287_p13 }
  0xa1   : > { %p1290_p2 = pnand %p1289_p1, %p1283_p11 }
  0xa3   : > { %1293 = shalt.err (!%p1290_p2)  }
  0xa4   : > { %s1294_s13 = scalar_lea.vmem %s2234_s14, 16  ;;  %p1299_p4 = scmp.lt.s32.totalorder %s2234_s14, %s2164_s10 }
  0xa5   : > { %p1295_p3 = scmp.ne.s32.totalorder %s2234_s14, %s1294_s13  ;;  %p1300_p6 = scmp.lt.s32.totalorder %s2167_s12, %s1294_s13 }
  0xa7   : > { %p1301_p8 = por %p1300_p6, %p1299_p4 }
  0xa9   : > { %p1302_p10 = pnand %p1301_p8, %p1295_p3 }
  0xab   : > { %1305 = shalt.err (!%p1302_p10)  }
  0xac   : > { %176 = dma.hbm_to_vmem [thread:$0]  %s163_s15, 16, %s2234_s14, [#allocation2 + $0x5] }
  0xad   : > { %s2267_s25 = sld [smem:[#allocation4 + %s71_s18]]  ;;  %s194_s7 = scalar_lea.vmem %s2136_s5, 7 [#allocation5] }
  0xae   : > { %s203_s11 = sshll.u32 %s194_s7, 4  ;;  %s73_s0 = sadd.s32 8, %s2130_s29  ;;  %s2272_s11 = int_to_ptr.vmem [resolvable:$true] %s203_s11 }
  0xaf   : > { %s1040_s16 = sshll.u32 %s2248_s4, 4  ;;  %s2277_s8 = sld [smem:[#allocation4 + %s73_s0]] }
  0xb0   : > { %s178_s3 = scalar_lea.hbm %s2742_s1, %s1040_s16 }
  0xb1   : > { %s1306_s23 = scalar_lea.hbm %s178_s3, 16  ;;  %p1309_p12 = scmp.lt.u32.totalorder %s178_s3, %s2742_s1 }
  0xb2   : > { %p1307_p11 = scmp.ne.s32.totalorder %s178_s3, %s1306_s23  ;;  %p1310_p5 = scmp.lt.u32.totalorder %s2156_s24, %s1306_s23 }
  0xb3   : > { %p1312_p0 = scmp.lt.u32.totalorder %s1306_s23, %s178_s3 }
  0xb4   : > { %p1311_p13 = por %p1310_p5, %p1309_p12 }
  0xb6   : > { %p1313_p1 = por %p1312_p0, %p1311_p13 }
  0xb8   : > { %p1314_p2 = pnand %p1313_p1, %p1307_p11 }
  0xba   : > { %1317 = shalt.err (!%p1314_p2)  }
  0xbb   : > { %s1318_s14 = scalar_lea.vmem %s2251_s9, 16  ;;  %p1323_p4 = scmp.lt.s32.totalorder %s2251_s9, %s2164_s10 }
  0xbc   : > { %p1319_p3 = scmp.ne.s32.totalorder %s2251_s9, %s1318_s14  ;;  %p1324_p6 = scmp.lt.s32.totalorder %s2167_s12, %s1318_s14 }
  0xbe   : > { %p1325_p8 = por %p1324_p6, %p1323_p4 }
  0xc0   : > { %p1326_p10 = pnand %p1325_p8, %p1319_p3 }
  0xc2   : > { %1329 = shalt.err (!%p1326_p10)  }
  0xc3   : > { %191 = dma.hbm_to_vmem [thread:$0]  %s178_s3, 16, %s2251_s9, [#allocation2 + $0x6] }
  0xc4   : > { %s209_s4 = scalar_lea.vmem %s2136_s5, 8 [#allocation5]  ;;  %s75_s15 = sadd.s32 9, %s2130_s29 }
  0xc5   : > { %s1041_s18 = sshll.u32 %s2267_s25, 4  ;;  %s218_s7 = sshll.u32 %s209_s4, 4  ;;  %s2295_s7 = int_to_ptr.vmem [resolvable:$true] %s218_s7 }
  0xc6   : > { %s193_s17 = scalar_lea.hbm %s2742_s1, %s1041_s18 }
  0xc7   : > { %s1330_s28 = scalar_lea.hbm %s193_s17, 16  ;;  %p1333_p12 = scmp.lt.u32.totalorder %s193_s17, %s2742_s1 }
  0xc8   : > { %p1331_p11 = scmp.ne.s32.totalorder %s193_s17, %s1330_s28  ;;  %p1334_p5 = scmp.lt.u32.totalorder %s2156_s24, %s1330_s28 }
  0xc9   : > { %p1336_p0 = scmp.lt.u32.totalorder %s1330_s28, %s193_s17 }
  0xca   : > { %p1335_p13 = por %p1334_p5, %p1333_p12 }
  0xcc   : > { %p1337_p1 = por %p1336_p0, %p1335_p13 }
  0xce   : > { %p1338_p2 = pnand %p1337_p1, %p1331_p11 }
  0xd0   : > { %1341 = shalt.err (!%p1338_p2)  }
  0xd1   : > { %s1342_s9 = scalar_lea.vmem %s2272_s11, 16  ;;  %p1347_p4 = scmp.lt.s32.totalorder %s2272_s11, %s2164_s10 }
  0xd2   : > { %p1343_p3 = scmp.ne.s32.totalorder %s2272_s11, %s1342_s9  ;;  %p1348_p6 = scmp.lt.s32.totalorder %s2167_s12, %s1342_s9 }
  0xd4   : > { %p1349_p8 = por %p1348_p6, %p1347_p4 }
  0xd6   : > { %p1350_p10 = pnand %p1349_p8, %p1343_p3 }
  0xd8   : > { %1353 = shalt.err (!%p1350_p10)  }
  0xd9   : > { %206 = dma.hbm_to_vmem [thread:$0]  %s193_s17, 16, %s2272_s11, [#allocation2 + $0x7] }
  0xda   : > { %s1042_s25 = sshll.u32 %s2277_s8, 4  ;;  %s2308_s3 = sld [smem:[#allocation4 + %s75_s15]] }
  0xdb   : > { %s208_s4 = scalar_lea.hbm %s2742_s1, %s1042_s25  ;;  %s224_s18 = scalar_lea.vmem %s2136_s5, 9 [#allocation5] }
  0xdc   : > { %s1354_s0 = scalar_lea.hbm %s208_s4, 16  ;;  %p1357_p12 = scmp.lt.u32.totalorder %s208_s4, %s2742_s1 }
  0xdd   : > { %p1355_p11 = scmp.ne.s32.totalorder %s208_s4, %s1354_s0  ;;  %p1358_p5 = scmp.lt.u32.totalorder %s2156_s24, %s1354_s0 }
  0xde   : > { %p1360_p0 = scmp.lt.u32.totalorder %s1354_s0, %s208_s4 }
  0xdf   : > { %p1359_p13 = por %p1358_p5, %p1357_p12 }
  0xe1   : > { %p1361_p1 = por %p1360_p0, %p1359_p13 }
  0xe3   : > { %p1362_p2 = pnand %p1361_p1, %p1355_p11 }
  0xe5   : > { %1365 = shalt.err (!%p1362_p2)  }
  0xe6   : > { %s1366_s11 = scalar_lea.vmem %s2295_s7, 16  ;;  %p1371_p4 = scmp.lt.s32.totalorder %s2295_s7, %s2164_s10 }
  0xe7   : > { %p1367_p3 = scmp.ne.s32.totalorder %s2295_s7, %s1366_s11  ;;  %p1372_p6 = scmp.lt.s32.totalorder %s2167_s12, %s1366_s11 }
  0xe9   : > { %p1373_p8 = por %p1372_p6, %p1371_p4 }
  0xeb   : > { %p1374_p10 = pnand %p1373_p8, %p1367_p3 }
  0xed   : > { %1377 = shalt.err (!%p1374_p10)  }
  0xee   : > { %221 = dma.hbm_to_vmem [thread:$0]  %s208_s4, 16, %s2295_s7, [#allocation2 + $0x8] }
  0xef   : > { %s233_s8 = sshll.u32 %s224_s18, 4  ;;  %s77_s15 = sadd.s32 10, %s2130_s29  ;;  %s234_s8 = int_to_ptr.vmem [resolvable:$true] %s233_s8 }
  0xf0   : > { %s2325_s17 = sld [smem:[#allocation4 + %s77_s15]]  ;;  %s239_s23 = scalar_lea.vmem %s2136_s5, 10 [#allocation5] }
  0xf1   : > { %s79_s30 = sadd.s32 11, %s2130_s29  ;;  %s1043_s9 = sshll.u32 %s2308_s3, 4 }
  0xf2   : > { %s248_s25 = sshll.u32 %s239_s23, 4  ;;  %s223_s0 = scalar_lea.hbm %s2742_s1, %s1043_s9  ;;  %s2333_s25 = int_to_ptr.vmem [resolvable:$true] %s248_s25 }
  0xf3   : > { %s1378_s16 = scalar_lea.hbm %s223_s0, 16  ;;  %p1381_p12 = scmp.lt.u32.totalorder %s223_s0, %s2742_s1 }
  0xf4   : > { %p1379_p11 = scmp.ne.s32.totalorder %s223_s0, %s1378_s16  ;;  %p1382_p5 = scmp.lt.u32.totalorder %s2156_s24, %s1378_s16 }
  0xf5   : > { %p1384_p0 = scmp.lt.u32.totalorder %s1378_s16, %s223_s0 }
  0xf6   : > { %p1383_p13 = por %p1382_p5, %p1381_p12 }
  0xf8   : > { %p1385_p1 = por %p1384_p0, %p1383_p13 }
  0xfa   : > { %p1386_p2 = pnand %p1385_p1, %p1379_p11 }
  0xfc   : > { %1389 = shalt.err (!%p1386_p2)  }
  0xfd   : > { %s1390_s7 = scalar_lea.vmem %s234_s8, 16  ;;  %p1395_p4 = scmp.lt.s32.totalorder %s234_s8, %s2164_s10 }
  0xfe   : > { %p1391_p3 = scmp.ne.s32.totalorder %s234_s8, %s1390_s7  ;;  %p1396_p6 = scmp.lt.s32.totalorder %s2167_s12, %s1390_s7 }
 0x100   : > { %p1397_p8 = por %p1396_p6, %p1395_p4 }
 0x102   : > { %p1398_p10 = pnand %p1397_p8, %p1391_p3 }
 0x104   : > { %1401 = shalt.err (!%p1398_p10)  }
 0x105   : > { %236 = dma.hbm_to_vmem [thread:$0]  %s223_s0, 16, %s234_s8, [#allocation2 + $0x9] }
 0x106   : > { %s2341_s3 = sld [smem:[#allocation4 + %s79_s30]]  ;;  %s254_s4 = scalar_lea.vmem %s2136_s5, 11 [#allocation5] }
 0x107   : > { %s1044_s18 = sshll.u32 %s2325_s17, 4  ;;  %s263_s15 = sshll.u32 %s254_s4, 4  ;;  %s2348_s15 = int_to_ptr.vmem [resolvable:$true] %s263_s15 }
 0x108   : > { %s238_s13 = scalar_lea.hbm %s2742_s1, %s1044_s18 }
 0x109   : > { %s1402_s14 = scalar_lea.hbm %s238_s13, 16  ;;  %p1405_p12 = scmp.lt.u32.totalorder %s238_s13, %s2742_s1 }
 0x10a   : > { %p1403_p11 = scmp.ne.s32.totalorder %s238_s13, %s1402_s14  ;;  %p1406_p5 = scmp.lt.u32.totalorder %s2156_s24, %s1402_s14 }
 0x10b   : > { %p1408_p0 = scmp.lt.u32.totalorder %s1402_s14, %s238_s13 }
 0x10c   : > { %p1407_p13 = por %p1406_p5, %p1405_p12 }
 0x10e   : > { %p1409_p1 = por %p1408_p0, %p1407_p13 }
 0x110   : > { %p1410_p2 = pnand %p1409_p1, %p1403_p11 }
 0x112   : > { %1413 = shalt.err (!%p1410_p2)  }
 0x113   : > { %s1414_s8 = scalar_lea.vmem %s2333_s25, 16  ;;  %p1419_p4 = scmp.lt.s32.totalorder %s2333_s25, %s2164_s10 }
 0x114   : > { %p1415_p3 = scmp.ne.s32.totalorder %s2333_s25, %s1414_s8  ;;  %p1420_p6 = scmp.lt.s32.totalorder %s2167_s12, %s1414_s8 }
 0x116   : > { %p1421_p8 = por %p1420_p6, %p1419_p4 }
 0x118   : > { %p1422_p10 = pnand %p1421_p8, %p1415_p3 }
 0x11a   : > { %1425 = shalt.err (!%p1422_p10)  }
 0x11b   : > { %251 = dma.hbm_to_vmem [thread:$0]  %s238_s13, 16, %s2333_s25, [#allocation2 + $0xa] }
 0x11c   : > { %s81_s17 = sadd.s32 12, %s2130_s29  ;;  %s269_s30 = scalar_lea.vmem %s2136_s5, 12 [#allocation5] }
 0x11d   : > { %s2362_s0 = sld [smem:[#allocation4 + %s81_s17]]  ;;  %s278_s11 = sshll.u32 %s269_s30, 4  ;;  %s2365_s11 = int_to_ptr.vmem [resolvable:$true] %s278_s11 }
 0x11e   : > { %s1045_s7 = sshll.u32 %s2341_s3, 4  ;;  %s83_s9 = sadd.s32 13, %s2130_s29 }
 0x11f   : > { %s253_s23 = scalar_lea.hbm %s2742_s1, %s1045_s7 }
 0x120   : > { %s1426_s14 = scalar_lea.hbm %s253_s23, 16  ;;  %p1429_p12 = scmp.lt.u32.totalorder %s253_s23, %s2742_s1 }
 0x121   : > { %p1427_p11 = scmp.ne.s32.totalorder %s253_s23, %s1426_s14  ;;  %p1430_p5 = scmp.lt.u32.totalorder %s2156_s24, %s1426_s14 }
 0x122   : > { %p1432_p0 = scmp.lt.u32.totalorder %s1426_s14, %s253_s23 }
 0x123   : > { %p1431_p13 = por %p1430_p5, %p1429_p12 }
 0x125   : > { %p1433_p1 = por %p1432_p0, %p1431_p13 }
 0x127   : > { %p1434_p2 = pnand %p1433_p1, %p1427_p11 }
 0x129   : > { %1437 = shalt.err (!%p1434_p2)  }
 0x12a   : > { %s1438_s25 = scalar_lea.vmem %s2348_s15, 16  ;;  %p1443_p4 = scmp.lt.s32.totalorder %s2348_s15, %s2164_s10 }
 0x12b   : > { %p1439_p3 = scmp.ne.s32.totalorder %s2348_s15, %s1438_s25  ;;  %p1444_p6 = scmp.lt.s32.totalorder %s2167_s12, %s1438_s25 }
 0x12d   : > { %p1445_p8 = por %p1444_p6, %p1443_p4 }
 0x12f   : > { %p1446_p10 = pnand %p1445_p8, %p1439_p3 }
 0x131   : > { %1449 = shalt.err (!%p1446_p10)  }
 0x132   : > { %266 = dma.hbm_to_vmem [thread:$0]  %s253_s23, 16, %s2348_s15, [#allocation2 + $0xb] }
 0x133   : > { %s2381_s3 = sld [smem:[#allocation4 + %s83_s9]]  ;;  %s284_s13 = scalar_lea.vmem %s2136_s5, 13 [#allocation5] }
 0x134   : > { %s293_s8 = sshll.u32 %s284_s13, 4  ;;  %s85_s17 = sadd.s32 14, %s2130_s29  ;;  %s2386_s8 = int_to_ptr.vmem [resolvable:$true] %s293_s8 }
 0x135   : > { %s1046_s30 = sshll.u32 %s2362_s0, 4  ;;  %s2391_s14 = sld [smem:[#allocation4 + %s85_s17]] }
 0x136   : > { %s268_s18 = scalar_lea.hbm %s2742_s1, %s1046_s30 }
 0x137   : > { %s1450_s16 = scalar_lea.hbm %s268_s18, 16  ;;  %p1453_p12 = scmp.lt.u32.totalorder %s268_s18, %s2742_s1 }
 0x138   : > { %p1451_p11 = scmp.ne.s32.totalorder %s268_s18, %s1450_s16  ;;  %p1454_p5 = scmp.lt.u32.totalorder %s2156_s24, %s1450_s16 }
 0x139   : > { %p1456_p0 = scmp.lt.u32.totalorder %s1450_s16, %s268_s18 }
 0x13a   : > { %p1455_p13 = por %p1454_p5, %p1453_p12 }
 0x13c   : > { %p1457_p1 = por %p1456_p0, %p1455_p13 }
 0x13e   : > { %p1458_p2 = pnand %p1457_p1, %p1451_p11 }
 0x140   : > { %1461 = shalt.err (!%p1458_p2)  }
 0x141   : > { %s1462_s15 = scalar_lea.vmem %s2365_s11, 16  ;;  %p1467_p4 = scmp.lt.s32.totalorder %s2365_s11, %s2164_s10 }
 0x142   : > { %p1463_p3 = scmp.ne.s32.totalorder %s2365_s11, %s1462_s15  ;;  %p1468_p6 = scmp.lt.s32.totalorder %s2167_s12, %s1462_s15 }
 0x144   : > { %p1469_p8 = por %p1468_p6, %p1467_p4 }
 0x146   : > { %p1470_p10 = pnand %p1469_p8, %p1463_p3 }
 0x148   : > { %1473 = shalt.err (!%p1470_p10)  }
 0x149   : > { %281 = dma.hbm_to_vmem [thread:$0]  %s268_s18, 16, %s2365_s11, [#allocation2 + $0xc] }
 0x14a   : > { %s299_s0 = scalar_lea.vmem %s2136_s5, 14 [#allocation5]  ;;  %s87_s23 = sadd.s32 15, %s2130_s29 }
 0x14b   : > { %s1047_s9 = sshll.u32 %s2381_s3, 4  ;;  %s308_s13 = sshll.u32 %s299_s0, 4  ;;  %s2409_s13 = int_to_ptr.vmem [resolvable:$true] %s308_s13 }
 0x14c   : > { %s283_s7 = scalar_lea.hbm %s2742_s1, %s1047_s9 }
 0x14d   : > { %s1474_s4 = scalar_lea.hbm %s283_s7, 16  ;;  %p1477_p12 = scmp.lt.u32.totalorder %s283_s7, %s2742_s1 }
 0x14e   : > { %p1475_p11 = scmp.ne.s32.totalorder %s283_s7, %s1474_s4  ;;  %p1478_p5 = scmp.lt.u32.totalorder %s2156_s24, %s1474_s4 }
 0x14f   : > { %p1480_p0 = scmp.lt.u32.totalorder %s1474_s4, %s283_s7 }
 0x150   : > { %p1479_p13 = por %p1478_p5, %p1477_p12 }
 0x152   : > { %p1481_p1 = por %p1480_p0, %p1479_p13 }
 0x154   : > { %p1482_p2 = pnand %p1481_p1, %p1475_p11 }
 0x156   : > { %1485 = shalt.err (!%p1482_p2)  }
 0x157   : > { %s1486_s11 = scalar_lea.vmem %s2386_s8, 16  ;;  %p1491_p4 = scmp.lt.s32.totalorder %s2386_s8, %s2164_s10 }
 0x158   : > { %p1487_p3 = scmp.ne.s32.totalorder %s2386_s8, %s1486_s11  ;;  %p1492_p6 = scmp.lt.s32.totalorder %s2167_s12, %s1486_s11 }
 0x15a   : > { %p1493_p8 = por %p1492_p6, %p1491_p4 }
 0x15c   : > { %p1494_p10 = pnand %p1493_p8, %p1487_p3 }
 0x15e   : > { %1497 = shalt.err (!%p1494_p10)  }
 0x15f   : > { %296 = dma.hbm_to_vmem [thread:$0]  %s283_s7, 16, %s2386_s8, [#allocation2 + $0xd] }
 0x160   : > { %s1048_s3 = sshll.u32 %s2391_s14, 4  ;;  %s88_s18 = sld [smem:[#allocation4 + %s87_s23]] }
 0x161   : > { %s298_s0 = scalar_lea.hbm %s2742_s1, %s1048_s3  ;;  %s314_s9 = scalar_lea.vmem %s2136_s5, 15 [#allocation5] }
 0x162   : > { %s1498_s17 = scalar_lea.hbm %s298_s0, 16  ;;  %p1501_p12 = scmp.lt.u32.totalorder %s298_s0, %s2742_s1 }
 0x163   : > { %p1499_p11 = scmp.ne.s32.totalorder %s298_s0, %s1498_s17  ;;  %p1502_p5 = scmp.lt.u32.totalorder %s2156_s24, %s1498_s17 }
 0x164   : > { %p1504_p0 = scmp.lt.u32.totalorder %s1498_s17, %s298_s0 }
 0x165   : > { %p1503_p13 = por %p1502_p5, %p1501_p12 }
 0x167   : > { %p1505_p1 = por %p1504_p0, %p1503_p13 }
 0x169   : > { %p1506_p2 = pnand %p1505_p1, %p1499_p11 }
 0x16b   : > { %1509 = shalt.err (!%p1506_p2)  }
 0x16c   : > { %s1510_s8 = scalar_lea.vmem %s2409_s13, 16  ;;  %p1515_p4 = scmp.lt.s32.totalorder %s2409_s13, %s2164_s10 }
 0x16d   : > { %p1511_p3 = scmp.ne.s32.totalorder %s2409_s13, %s1510_s8  ;;  %p1516_p6 = scmp.lt.s32.totalorder %s2167_s12, %s1510_s8 }
 0x16f   : > { %p1517_p8 = por %p1516_p6, %p1515_p4 }
 0x171   : > { %p1518_p10 = pnand %p1517_p8, %p1511_p3 }
 0x173   : > { %1521 = shalt.err (!%p1518_p10)  }
 0x174   : > { %311 = dma.hbm_to_vmem [thread:$0]  %s298_s0, 16, %s2409_s13, [#allocation2 + $0xe] }
 0x175   : > { %s323_s14 = sshll.u32 %s314_s9, 4  ;;  %s1049_s23 = sshll.u32 %s88_s18, 4  ;;  %s324_s14 = int_to_ptr.vmem [resolvable:$true] %s323_s14 }
 0x176   : > { %s313_s28 = scalar_lea.hbm %s2742_s1, %s1049_s23 }
 0x177   : > { %s1522_s11 = scalar_lea.hbm %s313_s28, 16  ;;  %p1525_p12 = scmp.lt.u32.totalorder %s313_s28, %s2742_s1 }
 0x178   : > { %p1523_p11 = scmp.ne.s32.totalorder %s313_s28, %s1522_s11  ;;  %p1526_p5 = scmp.lt.u32.totalorder %s2156_s24, %s1522_s11 }
 0x179   : > { %p1528_p0 = scmp.lt.u32.totalorder %s1522_s11, %s313_s28 }
 0x17a   : > { %p1527_p13 = por %p1526_p5, %p1525_p12 }
 0x17c   : > { %p1529_p1 = por %p1528_p0, %p1527_p13 }
 0x17e   : > { %p1530_p2 = pnand %p1529_p1, %p1523_p11 }
 0x180   : > { %1533 = shalt.err (!%p1530_p2)  }
 0x181   : > { %s1534_s13 = scalar_lea.vmem %s324_s14, 16  ;;  %p1539_p4 = scmp.lt.s32.totalorder %s324_s14, %s2164_s10 }
 0x182   : > { %p1535_p3 = scmp.ne.s32.totalorder %s324_s14, %s1534_s13  ;;  %p1540_p6 = scmp.lt.s32.totalorder %s2167_s12, %s1534_s13 }
 0x184   : > { %p1541_p8 = por %p1540_p6, %p1539_p4 }
 0x186   : > { %p1542_p10 = pnand %p1541_p8, %p1535_p3 }
 0x188   : > { %1545 = shalt.err (!%p1542_p10)  }
 0x189   : > { %326 = dma.hbm_to_vmem [thread:$0]  %s313_s28, 16, %s324_s14, [#allocation2 + $0xf] }
 0x18a   : > { %s2445_s18 = smov 0  }
 0x18b LB: >> { %s2771_s29 = sld [smem:[#allocation114_spill]]  ;;  %s2746_s15 = sshll.u32 %s2058_s18, 4  ;;  %s2058_s18 = sphi %s2445_s18, %s332_s18  }
 0x18c   : >> { %s1109_s0 = sadd.s32 16, %s2746_s15 }
 0x191   : >> { %s2454_s9 = sadd.s32 %s1109_s0, %s2771_s29 }
 0x192   : >> { %s2457_s17 = sld [smem:[#allocation4 + %s2454_s9]]  ;;  %s370_s30 = sadd.s32 1, %s2454_s9 }
 0x193   : >> { %s2460_s4 = sld [smem:[#allocation4 + %s370_s30]]  ;;  %s372_s8 = sadd.s32 2, %s2454_s9 }
 0x194   : >> { %s2463_s14 = sld [smem:[#allocation4 + %s372_s8]]  ;;  %s374_s23 = sadd.s32 3, %s2454_s9 }
 0x195   : >> { %s2466_s7 = sld [smem:[#allocation4 + %s374_s23]]  ;;  %s376_s16 = sadd.s32 4, %s2454_s9 }
 0x196   : >> { %s2469_s28 = sld [smem:[#allocation4 + %s376_s16]]  ;;  %s378_s11 = sadd.s32 5, %s2454_s9 }
 0x197   : >> { %s2472_s3 = sld [smem:[#allocation4 + %s378_s11]]  ;;  %s380_s25 = sadd.s32 6, %s2454_s9 }
 0x198   : >> { %s2475_s13 = sld [smem:[#allocation4 + %s380_s25]]  ;;  %s382_s0 = sadd.s32 7, %s2454_s9 }
 0x199   : >> { %s2478_s30 = sld [smem:[#allocation4 + %s382_s0]]  ;;  %s384_s8 = sadd.s32 8, %s2454_s9 }
 0x19a   : >> { %s2481_s15 = sld [smem:[#allocation4 + %s384_s8]]  ;;  %s386_s23 = sadd.s32 9, %s2454_s9 }
 0x19b   : >> { %s2484_s29 = sld [smem:[#allocation4 + %s386_s23]]  ;;  %s388_s16 = sadd.s32 10, %s2454_s9 }
 0x19c   : >> { %s2487_s22 = sld [smem:[#allocation4 + %s388_s16]]  ;;  %s390_s27 = sadd.s32 11, %s2454_s9 }
 0x19d   : >> { %s2490_s11 = sld [smem:[#allocation4 + %s390_s27]]  ;;  %s392_s19 = sadd.s32 12, %s2454_s9 }
 0x19e   : >> { %s2493_s2 = sld [smem:[#allocation4 + %s392_s19]]  ;;  %s394_s25 = sadd.s32 13, %s2454_s9 }
 0x19f   : >> { %s2496_s6 = sld [smem:[#allocation4 + %s394_s25]]  ;;  %s396_s0 = sadd.s32 14, %s2454_s9 }
 0x1a0   : >> { %s2499_s21 = sld [smem:[#allocation4 + %s396_s0]]  ;;  %s398_s8 = sadd.s32 15, %s2454_s9 }
 0x1a1   : >> { %s2502_s26 = sld [smem:[#allocation4 + %s398_s8]] }
 0x1a6   : >> { %2772 = sst [smem:[#allocation116_spill]] %s2499_s21 }
 0x1a7   : >> { %2773 = sst [smem:[#allocation117_spill]] %s2502_s26 }
 0x1a8   : >> { %1976 = dma.done.wait [#allocation2], 16 }
 0x1a9   : >> { %1977 = vsyncadd [#allocation2], 4294967280  ;;  %s1051_s27 = sshll.u32 %s2457_s17, 4  ;;  %s2774_s23 = sshll.u32 %s2058_s18, 4 }
 0x1aa   : >> { %s2508_s16 = scalar_lea.vmem %s2136_s5, %s2774_s23 [#allocation5]  ;;  %s403_s25 = scalar_lea.hbm %s2742_s1, %s1051_s27 }
 0x1ab   : >> { %s929_s0 = scalar_lea.vmem %s2508_s16, 16 [#allocation5]  ;;  %s1546_s9 = scalar_lea.hbm %s403_s25, 16 }
 0x1ac   : >> { %s412_s21 = sshll.u32 %s929_s0, 4  ;;  %p1547_p11 = scmp.ne.s32.totalorder %s403_s25, %s1546_s9  ;;  %s413_s21 = int_to_ptr.vmem [resolvable:$true] %s412_s21 }
 0x1ad   : >> { %p1549_p12 = scmp.lt.u32.totalorder %s403_s25, %s2742_s1  ;;  %p1550_p5 = scmp.lt.u32.totalorder %s2156_s24, %s1546_s9 }
 0x1ae   : >> { %p1552_p0 = scmp.lt.u32.totalorder %s1546_s9, %s403_s25 }
 0x1af   : >> { %p1551_p13 = por %p1550_p5, %p1549_p12 }
 0x1b1   : >> { %p1553_p1 = por %p1552_p0, %p1551_p13 }
 0x1b3   : >> { %p1554_p2 = pnand %p1553_p1, %p1547_p11 }
 0x1b5   : >> { %1557 = shalt.err (!%p1554_p2)  }
 0x1b6   : >> { %s1558_s17 = scalar_lea.vmem %s413_s21, 16  ;;  %p1563_p4 = scmp.lt.s32.totalorder %s413_s21, %s2164_s10 }
 0x1b7   : >> { %p1559_p3 = scmp.ne.s32.totalorder %s413_s21, %s1558_s17  ;;  %p1564_p6 = scmp.lt.s32.totalorder %s2167_s12, %s1558_s17 }
 0x1b9   : >> { %p1565_p8 = por %p1564_p6, %p1563_p4 }
 0x1bb   : >> { %p1566_p10 = pnand %p1565_p8, %p1559_p3 }
 0x1bd   : >> { %1569 = shalt.err (!%p1566_p10)  }
 0x1be   : >> { %415 = dma.hbm_to_vmem [thread:$0]  %s403_s25, 16, %s413_s21, [#allocation2] }
 0x1bf   : >> { %1978 = dma.done.wait [#allocation2 + $0x1], 16 }
 0x1c0   : >> { %1979 = vsyncadd [#allocation2 + $0x1], 4294967280  ;;  %s1053_s20 = sshll.u32 %s2460_s4, 4  ;;  %s934_s26 = scalar_lea.vmem %s2508_s16, 17 [#allocation5] }
 0x1c1   : >> { %s420_s19 = scalar_lea.hbm %s2742_s1, %s1053_s20  ;;  %s429_s0 = sshll.u32 %s934_s26, 4  ;;  %s430_s0 = int_to_ptr.vmem [resolvable:$true] %s429_s0 }
 0x1c2   : >> { %s1570_s9 = scalar_lea.hbm %s420_s19, 16  ;;  %p1573_p12 = scmp.lt.u32.totalorder %s420_s19, %s2742_s1 }
 0x1c3   : >> { %p1571_p11 = scmp.ne.s32.totalorder %s420_s19, %s1570_s9  ;;  %p1574_p5 = scmp.lt.u32.totalorder %s2156_s24, %s1570_s9 }
 0x1c4   : >> { %p1576_p0 = scmp.lt.u32.totalorder %s1570_s9, %s420_s19 }
 0x1c5   : >> { %p1575_p13 = por %p1574_p5, %p1573_p12 }
 0x1c7   : >> { %p1577_p1 = por %p1576_p0, %p1575_p13 }
 0x1c9   : >> { %p1578_p2 = pnand %p1577_p1, %p1571_p11 }
 0x1cb   : >> { %1581 = shalt.err (!%p1578_p2)  }
 0x1cc   : >> { %s1582_s21 = scalar_lea.vmem %s430_s0, 16  ;;  %p1587_p4 = scmp.lt.s32.totalorder %s430_s0, %s2164_s10 }
 0x1cd   : >> { %p1583_p3 = scmp.ne.s32.totalorder %s430_s0, %s1582_s21  ;;  %p1588_p6 = scmp.lt.s32.totalorder %s2167_s12, %s1582_s21 }
 0x1cf   : >> { %p1589_p8 = por %p1588_p6, %p1587_p4 }
 0x1d1   : >> { %p1590_p10 = pnand %p1589_p8, %p1583_p3 }
 0x1d3   : >> { %1593 = shalt.err (!%p1590_p10)  }
 0x1d4   : >> { %432 = dma.hbm_to_vmem [thread:$0]  %s420_s19, 16, %s430_s0, [#allocation2 + $0x1] }
 0x1d5   : >> { %1980 = dma.done.wait [#allocation2 + $0x2], 16 }
 0x1d6   : >> { %1981 = vsyncadd [#allocation2 + $0x2], 4294967280  ;;  %s1055_s4 = sshll.u32 %s2463_s14, 4  ;;  %s939_s25 = scalar_lea.vmem %s2508_s16, 18 [#allocation5] }
 0x1d7   : >> { %s437_s27 = scalar_lea.hbm %s2742_s1, %s1055_s4  ;;  %s446_s23 = sshll.u32 %s939_s25, 4  ;;  %s447_s23 = int_to_ptr.vmem [resolvable:$true] %s446_s23 }
 0x1d8   : >> { %s1594_s9 = scalar_lea.hbm %s437_s27, 16  ;;  %p1597_p12 = scmp.lt.u32.totalorder %s437_s27, %s2742_s1 }
 0x1d9   : >> { %p1595_p11 = scmp.ne.s32.totalorder %s437_s27, %s1594_s9  ;;  %p1598_p5 = scmp.lt.u32.totalorder %s2156_s24, %s1594_s9 }
 0x1da   : >> { %p1600_p0 = scmp.lt.u32.totalorder %s1594_s9, %s437_s27 }
 0x1db   : >> { %p1599_p13 = por %p1598_p5, %p1597_p12 }
 0x1dd   : >> { %p1601_p1 = por %p1600_p0, %p1599_p13 }
 0x1df   : >> { %p1602_p2 = pnand %p1601_p1, %p1595_p11 }
 0x1e1   : >> { %1605 = shalt.err (!%p1602_p2)  }
 0x1e2   : >> { %s1606_s14 = scalar_lea.vmem %s447_s23, 16  ;;  %p1611_p4 = scmp.lt.s32.totalorder %s447_s23, %s2164_s10 }
 0x1e3   : >> { %p1607_p3 = scmp.ne.s32.totalorder %s447_s23, %s1606_s14  ;;  %p1612_p6 = scmp.lt.s32.totalorder %s2167_s12, %s1606_s14 }
 0x1e5   : >> { %p1613_p8 = por %p1612_p6, %p1611_p4 }
 0x1e7   : >> { %p1614_p10 = pnand %p1613_p8, %p1607_p3 }
 0x1e9   : >> { %1617 = shalt.err (!%p1614_p10)  }
 0x1ea   : >> { %449 = dma.hbm_to_vmem [thread:$0]  %s437_s27, 16, %s447_s23, [#allocation2 + $0x2] }
 0x1eb   : >> { %1982 = dma.done.wait [#allocation2 + $0x3], 16 }
 0x1ec   : >> { %1983 = vsyncadd [#allocation2 + $0x3], 4294967280  ;;  %s1057_s19 = sshll.u32 %s2466_s7, 4  ;;  %s944_s0 = scalar_lea.vmem %s2508_s16, 19 [#allocation5] }
 0x1ed   : >> { %s454_s25 = scalar_lea.hbm %s2742_s1, %s1057_s19  ;;  %s463_s20 = sshll.u32 %s944_s0, 4  ;;  %s464_s20 = int_to_ptr.vmem [resolvable:$true] %s463_s20 }
 0x1ee   : >> { %s1618_s26 = scalar_lea.hbm %s454_s25, 16  ;;  %p1621_p12 = scmp.lt.u32.totalorder %s454_s25, %s2742_s1 }
 0x1ef   : >> { %p1619_p11 = scmp.ne.s32.totalorder %s454_s25, %s1618_s26  ;;  %p1622_p5 = scmp.lt.u32.totalorder %s2156_s24, %s1618_s26 }
 0x1f0   : >> { %p1624_p0 = scmp.lt.u32.totalorder %s1618_s26, %s454_s25 }
 0x1f1   : >> { %p1623_p13 = por %p1622_p5, %p1621_p12 }
 0x1f3   : >> { %p1625_p1 = por %p1624_p0, %p1623_p13 }
 0x1f5   : >> { %p1626_p2 = pnand %p1625_p1, %p1619_p11 }
 0x1f7   : >> { %1629 = shalt.err (!%p1626_p2)  }
 0x1f8   : >> { %s1630_s7 = scalar_lea.vmem %s464_s20, 16  ;;  %p1635_p4 = scmp.lt.s32.totalorder %s464_s20, %s2164_s10 }
 0x1f9   : >> { %p1631_p3 = scmp.ne.s32.totalorder %s464_s20, %s1630_s7  ;;  %p1636_p6 = scmp.lt.s32.totalorder %s2167_s12, %s1630_s7 }
 0x1fb   : >> { %p1637_p8 = por %p1636_p6, %p1635_p4 }
 0x1fd   : >> { %p1638_p10 = pnand %p1637_p8, %p1631_p3 }
 0x1ff   : >> { %1641 = shalt.err (!%p1638_p10)  }
 0x200   : >> { %466 = dma.hbm_to_vmem [thread:$0]  %s454_s25, 16, %s464_s20, [#allocation2 + $0x3] }
 0x201   : >> { %1984 = dma.done.wait [#allocation2 + $0x4], 16 }
 0x202   : >> { %1985 = vsyncadd [#allocation2 + $0x4], 4294967280  ;;  %s1059_s27 = sshll.u32 %s2469_s28, 4  ;;  %s949_s23 = scalar_lea.vmem %s2508_s16, 20 [#allocation5] }
 0x203   : >> { %s471_s19 = scalar_lea.hbm %s2742_s1, %s1059_s27  ;;  %s480_s0 = sshll.u32 %s949_s23, 4  ;;  %s481_s0 = int_to_ptr.vmem [resolvable:$true] %s480_s0 }
 0x204   : >> { %s1642_s21 = scalar_lea.hbm %s471_s19, 16  ;;  %p1645_p12 = scmp.lt.u32.totalorder %s471_s19, %s2742_s1 }
 0x205   : >> { %p1643_p11 = scmp.ne.s32.totalorder %s471_s19, %s1642_s21  ;;  %p1646_p5 = scmp.lt.u32.totalorder %s2156_s24, %s1642_s21 }
 0x206   : >> { %p1648_p0 = scmp.lt.u32.totalorder %s1642_s21, %s471_s19 }
 0x207   : >> { %p1647_p13 = por %p1646_p5, %p1645_p12 }
 0x209   : >> { %p1649_p1 = por %p1648_p0, %p1647_p13 }
 0x20b   : >> { %p1650_p2 = pnand %p1649_p1, %p1643_p11 }
 0x20d   : >> { %1653 = shalt.err (!%p1650_p2)  }
 0x20e   : >> { %s1654_s28 = scalar_lea.vmem %s481_s0, 16  ;;  %p1659_p4 = scmp.lt.s32.totalorder %s481_s0, %s2164_s10 }
 0x20f   : >> { %p1655_p3 = scmp.ne.s32.totalorder %s481_s0, %s1654_s28  ;;  %p1660_p6 = scmp.lt.s32.totalorder %s2167_s12, %s1654_s28 }
 0x211   : >> { %p1661_p8 = por %p1660_p6, %p1659_p4 }
 0x213   : >> { %p1662_p10 = pnand %p1661_p8, %p1655_p3 }
 0x215   : >> { %1665 = shalt.err (!%p1662_p10)  }
 0x216   : >> { %483 = dma.hbm_to_vmem [thread:$0]  %s471_s19, 16, %s481_s0, [#allocation2 + $0x4] }
 0x217   : >> { %1986 = dma.done.wait [#allocation2 + $0x5], 16 }
 0x218   : >> { %1987 = vsyncadd [#allocation2 + $0x5], 4294967280  ;;  %s1061_s25 = sshll.u32 %s2472_s3, 4  ;;  %s954_s20 = scalar_lea.vmem %s2508_s16, 21 [#allocation5] }
 0x219   : >> { %s488_s7 = scalar_lea.hbm %s2742_s1, %s1061_s25  ;;  %s497_s27 = sshll.u32 %s954_s20, 4  ;;  %s498_s27 = int_to_ptr.vmem [resolvable:$true] %s497_s27 }
 0x21a   : >> { %s1666_s23 = scalar_lea.hbm %s488_s7, 16  ;;  %p1669_p12 = scmp.lt.u32.totalorder %s488_s7, %s2742_s1 }
 0x21b   : >> { %p1667_p11 = scmp.ne.s32.totalorder %s488_s7, %s1666_s23  ;;  %p1670_p5 = scmp.lt.u32.totalorder %s2156_s24, %s1666_s23 }
 0x21c   : >> { %p1672_p0 = scmp.lt.u32.totalorder %s1666_s23, %s488_s7 }
 0x21d   : >> { %p1671_p13 = por %p1670_p5, %p1669_p12 }
 0x21f   : >> { %p1673_p1 = por %p1672_p0, %p1671_p13 }
 0x221   : >> { %p1674_p2 = pnand %p1673_p1, %p1667_p11 }
 0x223   : >> { %1677 = shalt.err (!%p1674_p2)  }
 0x224   : >> { %s1678_s3 = scalar_lea.vmem %s498_s27, 16  ;;  %p1683_p4 = scmp.lt.s32.totalorder %s498_s27, %s2164_s10 }
 0x225   : >> { %p1679_p3 = scmp.ne.s32.totalorder %s498_s27, %s1678_s3  ;;  %p1684_p6 = scmp.lt.s32.totalorder %s2167_s12, %s1678_s3 }
 0x227   : >> { %p1685_p8 = por %p1684_p6, %p1683_p4 }
 0x229   : >> { %p1686_p10 = pnand %p1685_p8, %p1679_p3 }
 0x22b   : >> { %1689 = shalt.err (!%p1686_p10)  }
 0x22c   : >> { %500 = dma.hbm_to_vmem [thread:$0]  %s488_s7, 16, %s498_s27, [#allocation2 + $0x5] }
 0x22d   : >> { %1988 = dma.done.wait [#allocation2 + $0x6], 16 }
 0x22e   : >> { %1989 = vsyncadd [#allocation2 + $0x6], 4294967280  ;;  %s1063_s19 = sshll.u32 %s2475_s13, 4  ;;  %s959_s0 = scalar_lea.vmem %s2508_s16, 22 [#allocation5] }
 0x22f   : >> { %s505_s26 = scalar_lea.hbm %s2742_s1, %s1063_s19  ;;  %s514_s28 = sshll.u32 %s959_s0, 4  ;;  %s515_s28 = int_to_ptr.vmem [resolvable:$true] %s514_s28 }
 0x230   : >> { %s1690_s25 = scalar_lea.hbm %s505_s26, 16  ;;  %p1693_p12 = scmp.lt.u32.totalorder %s505_s26, %s2742_s1 }
 0x231   : >> { %p1691_p11 = scmp.ne.s32.totalorder %s505_s26, %s1690_s25  ;;  %p1694_p5 = scmp.lt.u32.totalorder %s2156_s24, %s1690_s25 }
 0x232   : >> { %p1696_p0 = scmp.lt.u32.totalorder %s1690_s25, %s505_s26 }
 0x233   : >> { %p1695_p13 = por %p1694_p5, %p1693_p12 }
 0x235   : >> { %p1697_p1 = por %p1696_p0, %p1695_p13 }
 0x237   : >> { %p1698_p2 = pnand %p1697_p1, %p1691_p11 }
 0x239   : >> { %1701 = shalt.err (!%p1698_p2)  }
 0x23a   : >> { %s1702_s13 = scalar_lea.vmem %s515_s28, 16  ;;  %p1707_p4 = scmp.lt.s32.totalorder %s515_s28, %s2164_s10 }
 0x23b   : >> { %p1703_p3 = scmp.ne.s32.totalorder %s515_s28, %s1702_s13  ;;  %p1708_p6 = scmp.lt.s32.totalorder %s2167_s12, %s1702_s13 }
 0x23d   : >> { %p1709_p8 = por %p1708_p6, %p1707_p4 }
 0x23f   : >> { %p1710_p10 = pnand %p1709_p8, %p1703_p3 }
 0x241   : >> { %1713 = shalt.err (!%p1710_p10)  }
 0x242   : >> { %517 = dma.hbm_to_vmem [thread:$0]  %s505_s26, 16, %s515_s28, [#allocation2 + $0x6] }
 0x243   : >> { %1990 = dma.done.wait [#allocation2 + $0x7], 16 }
 0x244   : >> { %1991 = vsyncadd [#allocation2 + $0x7], 4294967280  ;;  %s1065_s8 = sshll.u32 %s2478_s30, 4  ;;  %s964_s7 = scalar_lea.vmem %s2508_s16, 23 [#allocation5] }
 0x245   : >> { %s522_s17 = scalar_lea.hbm %s2742_s1, %s1065_s8  ;;  %s531_s14 = sshll.u32 %s964_s7, 4  ;;  %s532_s14 = int_to_ptr.vmem [resolvable:$true] %s531_s14 }
 0x246   : >> { %s1714_s3 = scalar_lea.hbm %s522_s17, 16  ;;  %p1717_p12 = scmp.lt.u32.totalorder %s522_s17, %s2742_s1 }
 0x247   : >> { %p1715_p11 = scmp.ne.s32.totalorder %s522_s17, %s1714_s3  ;;  %p1718_p5 = scmp.lt.u32.totalorder %s2156_s24, %s1714_s3 }
 0x248   : >> { %p1720_p0 = scmp.lt.u32.totalorder %s1714_s3, %s522_s17 }
 0x249   : >> { %p1719_p13 = por %p1718_p5, %p1717_p12 }
 0x24b   : >> { %p1721_p1 = por %p1720_p0, %p1719_p13 }
 0x24d   : >> { %p1722_p2 = pnand %p1721_p1, %p1715_p11 }
 0x24f   : >> { %1725 = shalt.err (!%p1722_p2)  }
 0x250   : >> { %s1726_s30 = scalar_lea.vmem %s532_s14, 16  ;;  %p1731_p4 = scmp.lt.s32.totalorder %s532_s14, %s2164_s10 }
 0x251   : >> { %p1727_p3 = scmp.ne.s32.totalorder %s532_s14, %s1726_s30  ;;  %p1732_p6 = scmp.lt.s32.totalorder %s2167_s12, %s1726_s30 }
 0x253   : >> { %p1733_p8 = por %p1732_p6, %p1731_p4 }
 0x255   : >> { %p1734_p10 = pnand %p1733_p8, %p1727_p3 }
 0x257   : >> { %1737 = shalt.err (!%p1734_p10)  }
 0x258   : >> { %534 = dma.hbm_to_vmem [thread:$0]  %s522_s17, 16, %s532_s14, [#allocation2 + $0x7] }
 0x259   : >> { %1992 = dma.done.wait [#allocation2 + $0x8], 16 }
 0x25a   : >> { %1993 = vsyncadd [#allocation2 + $0x8], 4294967280  ;;  %s1067_s21 = sshll.u32 %s2481_s15, 4  ;;  %s969_s4 = scalar_lea.vmem %s2508_s16, 24 [#allocation5] }
 0x25b   : >> { %s539_s25 = scalar_lea.hbm %s2742_s1, %s1067_s21  ;;  %s548_s20 = sshll.u32 %s969_s4, 4  ;;  %s549_s20 = int_to_ptr.vmem [resolvable:$true] %s548_s20 }
 0x25c   : >> { %s1738_s9 = scalar_lea.hbm %s539_s25, 16  ;;  %p1741_p12 = scmp.lt.u32.totalorder %s539_s25, %s2742_s1 }
 0x25d   : >> { %p1739_p11 = scmp.ne.s32.totalorder %s539_s25, %s1738_s9  ;;  %p1742_p5 = scmp.lt.u32.totalorder %s2156_s24, %s1738_s9 }
 0x25e   : >> { %p1744_p0 = scmp.lt.u32.totalorder %s1738_s9, %s539_s25 }
 0x25f   : >> { %p1743_p13 = por %p1742_p5, %p1741_p12 }
 0x261   : >> { %p1745_p1 = por %p1744_p0, %p1743_p13 }
 0x263   : >> { %p1746_p2 = pnand %p1745_p1, %p1739_p11 }
 0x265   : >> { %1749 = shalt.err (!%p1746_p2)  }
 0x266   : >> { %s1750_s15 = scalar_lea.vmem %s549_s20, 16  ;;  %p1755_p4 = scmp.lt.s32.totalorder %s549_s20, %s2164_s10 }
 0x267   : >> { %p1751_p3 = scmp.ne.s32.totalorder %s549_s20, %s1750_s15  ;;  %p1756_p6 = scmp.lt.s32.totalorder %s2167_s12, %s1750_s15 }
 0x269   : >> { %p1757_p8 = por %p1756_p6, %p1755_p4 }
 0x26b   : >> { %p1758_p10 = pnand %p1757_p8, %p1751_p3 }
 0x26d   : >> { %1761 = shalt.err (!%p1758_p10)  }
 0x26e   : >> { %551 = dma.hbm_to_vmem [thread:$0]  %s539_s25, 16, %s549_s20, [#allocation2 + $0x8] }
 0x26f   : >> { %1994 = dma.done.wait [#allocation2 + $0x9], 16 }
 0x270   : >> { %1995 = vsyncadd [#allocation2 + $0x9], 4294967280  ;;  %s1069_s7 = sshll.u32 %s2484_s29, 4  ;;  %s974_s27 = scalar_lea.vmem %s2508_s16, 25 [#allocation5] }
 0x271   : >> { %s556_s14 = scalar_lea.hbm %s2742_s1, %s1069_s7  ;;  %s565_s3 = sshll.u32 %s974_s27, 4  ;;  %s566_s3 = int_to_ptr.vmem [resolvable:$true] %s565_s3 }
 0x272   : >> { %s1762_s19 = scalar_lea.hbm %s556_s14, 16  ;;  %p1765_p12 = scmp.lt.u32.totalorder %s556_s14, %s2742_s1 }
 0x273   : >> { %p1763_p11 = scmp.ne.s32.totalorder %s556_s14, %s1762_s19  ;;  %p1766_p5 = scmp.lt.u32.totalorder %s2156_s24, %s1762_s19 }
 0x274   : >> { %p1768_p0 = scmp.lt.u32.totalorder %s1762_s19, %s556_s14 }
 0x275   : >> { %p1767_p13 = por %p1766_p5, %p1765_p12 }
 0x277   : >> { %p1769_p1 = por %p1768_p0, %p1767_p13 }
 0x279   : >> { %p1770_p2 = pnand %p1769_p1, %p1763_p11 }
 0x27b   : >> { %1773 = shalt.err (!%p1770_p2)  }
 0x27c   : >> { %s1774_s29 = scalar_lea.vmem %s566_s3, 16  ;;  %p1779_p4 = scmp.lt.s32.totalorder %s566_s3, %s2164_s10 }
 0x27d   : >> { %p1775_p3 = scmp.ne.s32.totalorder %s566_s3, %s1774_s29  ;;  %p1780_p6 = scmp.lt.s32.totalorder %s2167_s12, %s1774_s29 }
 0x27f   : >> { %p1781_p8 = por %p1780_p6, %p1779_p4 }
 0x281   : >> { %p1782_p10 = pnand %p1781_p8, %p1775_p3 }
 0x283   : >> { %1785 = shalt.err (!%p1782_p10)  }
 0x284   : >> { %568 = dma.hbm_to_vmem [thread:$0]  %s556_s14, 16, %s566_s3, [#allocation2 + $0x9] }
 0x285   : >> { %1996 = dma.done.wait [#allocation2 + $0xa], 16 }
 0x286   : >> { %1997 = vsyncadd [#allocation2 + $0xa], 4294967280  ;;  %s1071_s21 = sshll.u32 %s2487_s22, 4  ;;  %s979_s4 = scalar_lea.vmem %s2508_s16, 26 [#allocation5] }
 0x287   : >> { %s573_s25 = scalar_lea.hbm %s2742_s1, %s1071_s21  ;;  %s582_s20 = sshll.u32 %s979_s4, 4  ;;  %s583_s20 = int_to_ptr.vmem [resolvable:$true] %s582_s20 }
 0x288   : >> { %s1786_s9 = scalar_lea.hbm %s573_s25, 16  ;;  %p1789_p12 = scmp.lt.u32.totalorder %s573_s25, %s2742_s1 }
 0x289   : >> { %p1787_p11 = scmp.ne.s32.totalorder %s573_s25, %s1786_s9  ;;  %p1790_p5 = scmp.lt.u32.totalorder %s2156_s24, %s1786_s9 }
 0x28a   : >> { %p1792_p0 = scmp.lt.u32.totalorder %s1786_s9, %s573_s25 }
 0x28b   : >> { %p1791_p13 = por %p1790_p5, %p1789_p12 }
 0x28d   : >> { %p1793_p1 = por %p1792_p0, %p1791_p13 }
 0x28f   : >> { %p1794_p2 = pnand %p1793_p1, %p1787_p11 }
 0x291   : >> { %1797 = shalt.err (!%p1794_p2)  }
 0x292   : >> { %s1798_s22 = scalar_lea.vmem %s583_s20, 16  ;;  %p1803_p4 = scmp.lt.s32.totalorder %s583_s20, %s2164_s10 }
 0x293   : >> { %p1799_p3 = scmp.ne.s32.totalorder %s583_s20, %s1798_s22  ;;  %p1804_p6 = scmp.lt.s32.totalorder %s2167_s12, %s1798_s22 }
 0x295   : >> { %p1805_p8 = por %p1804_p6, %p1803_p4 }
 0x297   : >> { %p1806_p10 = pnand %p1805_p8, %p1799_p3 }
 0x299   : >> { %1809 = shalt.err (!%p1806_p10)  }
 0x29a   : >> { %585 = dma.hbm_to_vmem [thread:$0]  %s573_s25, 16, %s583_s20, [#allocation2 + $0xa] }
 0x29b   : >> { %1998 = dma.done.wait [#allocation2 + $0xb], 16 }
 0x29c   : >> { %1999 = vsyncadd [#allocation2 + $0xb], 4294967280  ;;  %s1073_s15 = sshll.u32 %s2490_s11, 4  ;;  %s984_s7 = scalar_lea.vmem %s2508_s16, 27 [#allocation5] }
 0x29d   : >> { %s590_s17 = scalar_lea.hbm %s2742_s1, %s1073_s15  ;;  %s599_s14 = sshll.u32 %s984_s7, 4  ;;  %s600_s14 = int_to_ptr.vmem [resolvable:$true] %s599_s14 }
 0x29e   : >> { %s1810_s3 = scalar_lea.hbm %s590_s17, 16  ;;  %p1813_p12 = scmp.lt.u32.totalorder %s590_s17, %s2742_s1 }
 0x29f   : >> { %p1811_p11 = scmp.ne.s32.totalorder %s590_s17, %s1810_s3  ;;  %p1814_p5 = scmp.lt.u32.totalorder %s2156_s24, %s1810_s3 }
 0x2a0   : >> { %p1816_p0 = scmp.lt.u32.totalorder %s1810_s3, %s590_s17 }
 0x2a1   : >> { %p1815_p13 = por %p1814_p5, %p1813_p12 }
 0x2a3   : >> { %p1817_p1 = por %p1816_p0, %p1815_p13 }
 0x2a5   : >> { %p1818_p2 = pnand %p1817_p1, %p1811_p11 }
 0x2a7   : >> { %1821 = shalt.err (!%p1818_p2)  }
 0x2a8   : >> { %s1822_s11 = scalar_lea.vmem %s600_s14, 16  ;;  %p1827_p4 = scmp.lt.s32.totalorder %s600_s14, %s2164_s10 }
 0x2a9   : >> { %p1823_p3 = scmp.ne.s32.totalorder %s600_s14, %s1822_s11  ;;  %p1828_p6 = scmp.lt.s32.totalorder %s2167_s12, %s1822_s11 }
 0x2ab   : >> { %p1829_p8 = por %p1828_p6, %p1827_p4 }
 0x2ad   : >> { %p1830_p10 = pnand %p1829_p8, %p1823_p3 }
 0x2af   : >> { %1833 = shalt.err (!%p1830_p10)  }
 0x2b0   : >> { %602 = dma.hbm_to_vmem [thread:$0]  %s590_s17, 16, %s600_s14, [#allocation2 + $0xb] }
 0x2b1   : >> { %2000 = dma.done.wait [#allocation2 + $0xc], 16 }
 0x2b2   : >> { %2001 = vsyncadd [#allocation2 + $0xc], 4294967280  ;;  %s1075_s30 = sshll.u32 %s2493_s2, 4  ;;  %s989_s29 = scalar_lea.vmem %s2508_s16, 28 [#allocation5] }
 0x2b3   : >> { %s607_s26 = scalar_lea.hbm %s2742_s1, %s1075_s30  ;;  %s616_s28 = sshll.u32 %s989_s29, 4  ;;  %s617_s28 = int_to_ptr.vmem [resolvable:$true] %s616_s28 }
 0x2b4   : >> { %s1834_s25 = scalar_lea.hbm %s607_s26, 16  ;;  %p1837_p12 = scmp.lt.u32.totalorder %s607_s26, %s2742_s1 }
 0x2b5   : >> { %p1835_p11 = scmp.ne.s32.totalorder %s607_s26, %s1834_s25  ;;  %p1838_p5 = scmp.lt.u32.totalorder %s2156_s24, %s1834_s25 }
 0x2b6   : >> { %p1840_p0 = scmp.lt.u32.totalorder %s1834_s25, %s607_s26 }
 0x2b7   : >> { %p1839_p13 = por %p1838_p5, %p1837_p12 }
 0x2b9   : >> { %p1841_p1 = por %p1840_p0, %p1839_p13 }
 0x2bb   : >> { %p1842_p2 = pnand %p1841_p1, %p1835_p11 }
 0x2bd   : >> { %1845 = shalt.err (!%p1842_p2)  }
 0x2be   : >> { %s1846_s2 = scalar_lea.vmem %s617_s28, 16  ;;  %p1851_p4 = scmp.lt.s32.totalorder %s617_s28, %s2164_s10 }
 0x2bf   : >> { %p1847_p3 = scmp.ne.s32.totalorder %s617_s28, %s1846_s2  ;;  %p1852_p6 = scmp.lt.s32.totalorder %s2167_s12, %s1846_s2 }
 0x2c1   : >> { %p1853_p8 = por %p1852_p6, %p1851_p4 }
 0x2c3   : >> { %p1854_p10 = pnand %p1853_p8, %p1847_p3 }
 0x2c5   : >> { %1857 = shalt.err (!%p1854_p10)  }
 0x2c6   : >> { %619 = dma.hbm_to_vmem [thread:$0]  %s607_s26, 16, %s617_s28, [#allocation2 + $0xc] }
 0x2c7   : >> { %2002 = dma.done.wait [#allocation2 + $0xd], 16 }
 0x2c8   : >> { %2003 = vsyncadd [#allocation2 + $0xd], 4294967280  ;;  %s1077_s13 = sshll.u32 %s2496_s6, 4  ;;  %s994_s8 = scalar_lea.vmem %s2508_s16, 29 [#allocation5] }
 0x2c9   : >> { %s624_s7 = scalar_lea.hbm %s2742_s1, %s1077_s13  ;;  %s633_s27 = sshll.u32 %s994_s8, 4  ;;  %s634_s27 = int_to_ptr.vmem [resolvable:$true] %s633_s27 }
 0x2ca   : >> { %s1858_s23 = scalar_lea.hbm %s624_s7, 16  ;;  %p1861_p12 = scmp.lt.u32.totalorder %s624_s7, %s2742_s1 }
 0x2cb   : >> { %p1859_p11 = scmp.ne.s32.totalorder %s624_s7, %s1858_s23  ;;  %p1862_p5 = scmp.lt.u32.totalorder %s2156_s24, %s1858_s23 }
 0x2cc   : >> { %p1864_p0 = scmp.lt.u32.totalorder %s1858_s23, %s624_s7 }
 0x2cd   : >> { %p1863_p13 = por %p1862_p5, %p1861_p12 }
 0x2cf   : >> { %p1865_p1 = por %p1864_p0, %p1863_p13 }
 0x2d1   : >> { %p1866_p2 = pnand %p1865_p1, %p1859_p11 }
 0x2d3   : >> { %1869 = shalt.err (!%p1866_p2)  }
 0x2d4   : >> { %s1870_s6 = scalar_lea.vmem %s634_s27, 16  ;;  %p1875_p4 = scmp.lt.s32.totalorder %s634_s27, %s2164_s10 }
 0x2d5   : >> { %p1871_p3 = scmp.ne.s32.totalorder %s634_s27, %s1870_s6  ;;  %p1876_p6 = scmp.lt.s32.totalorder %s2167_s12, %s1870_s6 }
 0x2d7   : >> { %p1877_p8 = por %p1876_p6, %p1875_p4 }
 0x2d9   : >> { %p1878_p10 = pnand %p1877_p8, %p1871_p3 }
 0x2db   : >> { %1881 = shalt.err (!%p1878_p10)  }
 0x2dc   : >> { %636 = dma.hbm_to_vmem [thread:$0]  %s624_s7, 16, %s634_s27, [#allocation2 + $0xd] }
 0x2dd   : >> { %2004 = dma.done.wait [#allocation2 + $0xe], 16 }
 0x2de   : >> { %2005 = vsyncadd [#allocation2 + $0xe], 4294967280  ;;  %s2775_s3 = sld [smem:[#allocation116_spill]]  ;;  %s999_s0 = scalar_lea.vmem %s2508_s16, 30 [#allocation5] }
 0x2df   : >> { %s650_s21 = sshll.u32 %s999_s0, 4  ;;  %s651_s21 = int_to_ptr.vmem [resolvable:$true] %s650_s21 }
 0x2e4   : >> { %s1079_s19 = sshll.u32 %s2775_s3, 4 }
 0x2e5   : >> { %s641_s29 = scalar_lea.hbm %s2742_s1, %s1079_s19 }
 0x2e6   : >> { %s1882_s4 = scalar_lea.hbm %s641_s29, 16  ;;  %p1885_p12 = scmp.lt.u32.totalorder %s641_s29, %s2742_s1 }
 0x2e7   : >> { %p1883_p11 = scmp.ne.s32.totalorder %s641_s29, %s1882_s4  ;;  %p1886_p5 = scmp.lt.u32.totalorder %s2156_s24, %s1882_s4 }
 0x2e8   : >> { %p1888_p0 = scmp.lt.u32.totalorder %s1882_s4, %s641_s29 }
 0x2e9   : >> { %p1887_p13 = por %p1886_p5, %p1885_p12 }
 0x2eb   : >> { %p1889_p1 = por %p1888_p0, %p1887_p13 }
 0x2ed   : >> { %p1890_p2 = pnand %p1889_p1, %p1883_p11 }
 0x2ef   : >> { %1893 = shalt.err (!%p1890_p2)  }
 0x2f0   : >> { %s1894_s25 = scalar_lea.vmem %s651_s21, 16  ;;  %p1899_p4 = scmp.lt.s32.totalorder %s651_s21, %s2164_s10 }
 0x2f1   : >> { %p1895_p3 = scmp.ne.s32.totalorder %s651_s21, %s1894_s25  ;;  %p1900_p6 = scmp.lt.s32.totalorder %s2167_s12, %s1894_s25 }
 0x2f3   : >> { %p1901_p8 = por %p1900_p6, %p1899_p4 }
 0x2f5   : >> { %p1902_p10 = pnand %p1901_p8, %p1895_p3 }
 0x2f7   : >> { %1905 = shalt.err (!%p1902_p10)  }
 0x2f8   : >> { %653 = dma.hbm_to_vmem [thread:$0]  %s641_s29, 16, %s651_s21, [#allocation2 + $0xe] }
 0x2f9   : >> { %2006 = dma.done.wait [#allocation2 + $0xf], 16 }
 0x2fa   : >> { %2007 = vsyncadd [#allocation2 + $0xf], 4294967280  ;;  %s2776_s20 = sld [smem:[#allocation117_spill]]  ;;  %s1004_s2 = scalar_lea.vmem %s2508_s16, 31 [#allocation5] }
 0x2fb   : >> { %s667_s15 = sshll.u32 %s1004_s2, 4  ;;  %s668_s15 = int_to_ptr.vmem [resolvable:$true] %s667_s15 }
 0x300   : >> { %s1081_s9 = sshll.u32 %s2776_s20, 4 }
 0x301   : >> { %s658_s22 = scalar_lea.hbm %s2742_s1, %s1081_s9 }
 0x302   : >> { %s1906_s7 = scalar_lea.hbm %s658_s22, 16  ;;  %p1909_p12 = scmp.lt.u32.totalorder %s658_s22, %s2742_s1 }
 0x303   : >> { %p1907_p11 = scmp.ne.s32.totalorder %s658_s22, %s1906_s7  ;;  %p1910_p5 = scmp.lt.u32.totalorder %s2156_s24, %s1906_s7 }
 0x304   : >> { %p1912_p0 = scmp.lt.u32.totalorder %s1906_s7, %s658_s22 }
 0x305   : >> { %p1911_p13 = por %p1910_p5, %p1909_p12 }
 0x307   : >> { %p1913_p1 = por %p1912_p0, %p1911_p13 }
 0x309   : >> { %p1914_p2 = pnand %p1913_p1, %p1907_p11 }
 0x30b   : >> { %1917 = shalt.err (!%p1914_p2)  }
 0x30c   : >> { %s1918_s17 = scalar_lea.vmem %s668_s15, 16  ;;  %p1923_p4 = scmp.lt.s32.totalorder %s668_s15, %s2164_s10 }
 0x30d   : >> { %p1919_p3 = scmp.ne.s32.totalorder %s668_s15, %s1918_s17  ;;  %p1924_p6 = scmp.lt.s32.totalorder %s2167_s12, %s1918_s17 }
 0x30f   : >> { %p1925_p8 = por %p1924_p6, %p1923_p4 }
 0x311   : >> { %p1926_p10 = pnand %p1925_p8, %p1919_p3 }
 0x313   : >> { %1929 = shalt.err (!%p1926_p10)  }
 0x314   : >> { %670 = dma.hbm_to_vmem [thread:$0]  %s658_s22, 16, %s668_s15, [#allocation2 + $0xf] }
 0x315   : >> { %s332_s18 = sadd.s32 1, %s2058_s18  }
 0x316   : >> { %p329_p9 = scmp.ge.s32.totalorder %s332_s18, 15  }
 0x318   : > { %331 = sbr.rel (!%p329_p9) target bundleno = 395 (0x18b), region = 272 }
 0x31f   : > { %2008 = dma.done.wait [#allocation2], 16 }
 0x320   : > { %2009 = vsyncadd [#allocation2], 4294967280 }
 0x321   : > { %2010 = dma.done.wait [#allocation2 + $0x1], 16 }
 0x322   : > { %2011 = vsyncadd [#allocation2 + $0x1], 4294967280 }
 0x323   : > { %2012 = dma.done.wait [#allocation2 + $0x2], 16 }
 0x324   : > { %2013 = vsyncadd [#allocation2 + $0x2], 4294967280 }
 0x325   : > { %2014 = dma.done.wait [#allocation2 + $0x3], 16 }
 0x326   : > { %2015 = vsyncadd [#allocation2 + $0x3], 4294967280 }
 0x327   : > { %2016 = dma.done.wait [#allocation2 + $0x4], 16 }
 0x328   : > { %2017 = vsyncadd [#allocation2 + $0x4], 4294967280 }
 0x329   : > { %2018 = dma.done.wait [#allocation2 + $0x5], 16 }
 0x32a   : > { %2019 = vsyncadd [#allocation2 + $0x5], 4294967280 }
 0x32b   : > { %2020 = dma.done.wait [#allocation2 + $0x6], 16 }
 0x32c   : > { %2021 = vsyncadd [#allocation2 + $0x6], 4294967280 }
 0x32d   : > { %2022 = dma.done.wait [#allocation2 + $0x7], 16 }
 0x32e   : > { %2023 = vsyncadd [#allocation2 + $0x7], 4294967280 }
 0x32f   : > { %2024 = dma.done.wait [#allocation2 + $0x8], 16 }
 0x330   : > { %2025 = vsyncadd [#allocation2 + $0x8], 4294967280 }
 0x331   : > { %2026 = dma.done.wait [#allocation2 + $0x9], 16 }
 0x332   : > { %2027 = vsyncadd [#allocation2 + $0x9], 4294967280 }
 0x333   : > { %2028 = dma.done.wait [#allocation2 + $0xa], 16 }
 0x334   : > { %2029 = vsyncadd [#allocation2 + $0xa], 4294967280 }
 0x335   : > { %2030 = dma.done.wait [#allocation2 + $0xb], 16 }
 0x336   : > { %2031 = vsyncadd [#allocation2 + $0xb], 4294967280 }
 0x337   : > { %2032 = dma.done.wait [#allocation2 + $0xc], 16 }
 0x338   : > { %2033 = vsyncadd [#allocation2 + $0xc], 4294967280 }
 0x339   : > { %2034 = dma.done.wait [#allocation2 + $0xd], 16 }
 0x33a   : > { %2035 = vsyncadd [#allocation2 + $0xd], 4294967280 }
 0x33b   : > { %2036 = dma.done.wait [#allocation2 + $0xe], 16 }
 0x33c   : > { %2037 = vsyncadd [#allocation2 + $0xe], 4294967280 }
 0x33d   : > { %2038 = dma.done.wait [#allocation2 + $0xf], 16 }
 0x33e   : > { %2039 = vsyncadd [#allocation2 + $0xf], 4294967280  ;;  %s2777_s5 = sld [smem:[#allocation108_spill]]  ;;  %s2780_s14 = sld [smem:[#allocation109_spill]] (%p2119_p7) }
 0x33f   : > { %742 = sbr.rel (!%p2119_p7) target bundleno = 872 (0x368), region = 151 }
 0x344   : > { %s2778_s24 = sand.u32 1, %s2777_s5   ;;  %s1084_s6 = sshll.u32 (%p2119_p7), %s2780_s14, 5 }
 0x345   : > { %s2690_s18 = scalar_lea.sflag [#allocation6], %s2778_s24  ;;  %s744_s3 = ssub.s32 (%p2119_p7), 39, %s1084_s6 }
 0x346   : > { %p745_p9 = scmp.lt.s32.totalorder %s744_s3, 32 }
 0x348   : > { %s2792_s3 = smov (!%p745_p9, %s744_s3), 32 }
 0x349   : > { %s2695_s19 = sshll.u32 %s2792_s3, 7 }
 0x34a   : > { %s749_s0 = ssub.s32 4096, %s2695_s19 }
 0x34b   : > { %750 = vsyncadd %s2690_s18, %s749_s0  ;;  %s2781_s11 = sld [smem:[#allocation115_spill]]  ;;  %p1086_p7 = scmp.ne.s32.totalorder %s2695_s19, 0 }
 0x34c   : > { %s1110_s30 = sshll.u32 %s2780_s14, 12  ;;  %s2782_s4 = sld [smem:[#allocation118_spill]] }
 0x351   : > { %s1930_s28 = scalar_lea.vmem %s2781_s11, %s2695_s19  ;;  %p2783_p0 = scmp.lt.s32.totalorder %s2781_s11, %s2164_s10 }
 0x352   : > { %s753_s26 = scalar_lea.hbm %s2782_s4, %s1110_s30  ;;  %p1931_p11 = scmp.ne.s32.totalorder %s2781_s11, %s1930_s28 }
 0x353   : > { %p1938_p13 = scmp.lt.s32.totalorder %s2167_s12, %s1930_s28 }
 0x354   : > { %p1932_p12 = pnand %p1931_p11, %p1086_p7 }
 0x355   : > { %p1939_p1 = por %p1938_p13, %p2783_p0 }
 0x356   : > { %p1933_p5 = pneg %p1932_p12 }
 0x358   : > { %p1940_p2 = pnand %p1939_p1, %p1933_p5 }
 0x35a   : > { %1943 = shalt.err (!%p1940_p2)
}
 0x35b   : > { %s1944_s25 = scalar_lea.hbm %s753_s26, %s2695_s19  ;;  %s1948_s2 = scalar_lea.hbm %s2782_s4, 4992 }
 0x35c   : > { %p1945_p3 = scmp.ne.s32.totalorder %s753_s26, %s1944_s25  ;;  %p1949_p8 = scmp.lt.u32.totalorder %s753_s26, %s2782_s4 }
 0x35d   : > { %p1950_p10 = scmp.lt.u32.totalorder %s1948_s2, %s1944_s25  ;;  %p1952_p11 = scmp.lt.u32.totalorder %s1944_s25, %s753_s26 }
 0x35e   : > { %p1946_p4 = pnand %p1945_p3, %p1086_p7 }
 0x35f   : > { %p1951_p9 = por %p1950_p10, %p1949_p8 }
 0x360   : > { %p1947_p6 = pneg %p1946_p4 }
 0x361   : > { %p1953_p12 = por %p1952_p11, %p1951_p9 }
 0x363   : > { %p1954_p5 = pnand %p1953_p12, %p1947_p6 }
 0x365   : > { %1957 = shalt.err (!%p1954_p5)
}
 0x366   : > { %s2062_s10 = smov 128   ;;  %s2063_s12 = smov 8  }
 0x367   : > { %761 = dma.vmem_to_hbm [thread:$0]  (%p1086_p7), %s2781_s11, %s2695_s19, %s753_s26, %s2690_s18, %s2062_s10, %s2062_s10, %s2063_s12  }
 0x368 PF: > { %s2784_s22 = sld [smem:[#allocation109_spill]]  ;;  %s2785_s15 = sld [smem:[#allocation107_spill]] }
 0x369   : > { %s2786_s7 = sld [smem:[#allocation113_spill]] }
 0x36e   : > { %p1116_p13 = scmp.ge.s32.totalorder %s2784_s22, 1  ;;  %s770_s27 = sand.u32 1, %s2785_s15  }
 0x36f   : > { %p2787_p0 = scmp.ne.s32.totalorder %s2786_s7, 0  ;;  %s771_s23 = scalar_lea.sflag [#allocation6], %s770_s27 }
 0x371   : > { %p1113_p1 = pnand %p1116_p13, %p2787_p0 }
 0x373   : > { %2041 = dma.done.wait (!%p1113_p1), %s771_s23, 4096  }
 0x374   : > { %2043 = vsyncadd (!%p1113_p1), %s771_s23, 4294963200  ;;  %s2788_s21 = sld [smem:[#allocation110_spill]]  ;;  %s2789_s19 = sld [smem:[#allocation108_spill]] }
 0x375   : > { %s2790_s20 = sld [smem:[#allocation111_spill]] }
 0x37a   : > { %p16_p2 = scmp.ge.s32.totalorder %s2788_s21, 3  }
 0x37c   :  { %18 = sbr.rel (!%p16_p2) target bundleno = 15 (0xf), region = 283 }
 0x383   :  { %776 = vsyncpa [#allocation6], 1 }
 0x384   :  { %778 = vsyncpa [#allocation6 + $0x1], 1 }
 0x385   :  { %779 = vsyncmov [#allocation2] }
 0x388   :  { %s780_s17 = vpop.sfrf %779 }
 0x389   :  { %p1092_p7 = scmp.ne.s32.totalorder %s780_s17, 0 }
 0x38b   :  { %784 = shalt.err (%p1092_p7)  }
 0x38c   :  { %786 = vsyncmov [#allocation2 + $0x1] }
 0x38f   :  { %s787_s5 = vpop.sfrf %786 }
 0x390   :  { %p1093_p3 = scmp.ne.s32.totalorder %s787_s5, 0 }
 0x392   :  { %791 = shalt.err (%p1093_p3)  }
 0x393   :  { %793 = vsyncmov [#allocation2 + $0x2] }
 0x396   :  { %s794_s24 = vpop.sfrf %793 }
 0x397   :  { %p1094_p4 = scmp.ne.s32.totalorder %s794_s24, 0 }
 0x399   :  { %798 = shalt.err (%p1094_p4)  }
 0x39a   :  { %800 = vsyncmov [#allocation2 + $0x3] }
 0x39d   :  { %s801_s18 = vpop.sfrf %800 }
 0x39e   :  { %p1095_p6 = scmp.ne.s32.totalorder %s801_s18, 0 }
 0x3a0   :  { %805 = shalt.err (%p1095_p6)  }
 0x3a1   :  { %807 = vsyncmov [#allocation2 + $0x4] }
 0x3a4   :  { %s808_s16 = vpop.sfrf %807 }
 0x3a5   :  { %p1096_p8 = scmp.ne.s32.totalorder %s808_s16, 0 }
 0x3a7   :  { %812 = shalt.err (%p1096_p8)  }
 0x3a8   :  { %814 = vsyncmov [#allocation2 + $0x5] }
 0x3ab   :  { %s815_s1 = vpop.sfrf %814 }
 0x3ac   :  { %p1097_p10 = scmp.ne.s32.totalorder %s815_s1, 0 }
 0x3ae   :  { %819 = shalt.err (%p1097_p10)  }
 0x3af   :  { %821 = vsyncmov [#allocation2 + $0x6] }
 0x3b2   :  { %s822_s14 = vpop.sfrf %821 }
 0x3b3   :  { %p1098_p9 = scmp.ne.s32.totalorder %s822_s14, 0 }
 0x3b5   :  { %826 = shalt.err (%p1098_p9)  }
 0x3b6   :  { %828 = vsyncmov [#allocation2 + $0x7] }
 0x3b9   :  { %s829_s6 = vpop.sfrf %828 }
 0x3ba   :  { %p1099_p11 = scmp.ne.s32.totalorder %s829_s6, 0 }
 0x3bc   :  { %833 = shalt.err (%p1099_p11)  }
 0x3bd   :  { %835 = vsyncmov [#allocation2 + $0x8] }
 0x3c0   :  { %s836_s3 = vpop.sfrf %835 }
 0x3c1   :  { %p1100_p12 = scmp.ne.s32.totalorder %s836_s3, 0 }
 0x3c3   :  { %840 = shalt.err (%p1100_p12)  }
 0x3c4   :  { %842 = vsyncmov [#allocation2 + $0x9] }
 0x3c7   :  { %s843_s19 = vpop.sfrf %842 }
 0x3c8   :  { %p1101_p5 = scmp.ne.s32.totalorder %s843_s19, 0 }
 0x3ca   :  { %847 = shalt.err (%p1101_p5)  }
 0x3cb   :  { %849 = vsyncmov [#allocation2 + $0xa] }
 0x3ce   :  { %s850_s0 = vpop.sfrf %849 }
 0x3cf   :  { %p1102_p13 = scmp.ne.s32.totalorder %s850_s0, 0 }
 0x3d1   :  { %854 = shalt.err (%p1102_p13)  }
 0x3d2   :  { %856 = vsyncmov [#allocation2 + $0xb] }
 0x3d5   :  { %s857_s11 = vpop.sfrf %856 }
 0x3d6   :  { %p1103_p0 = scmp.ne.s32.totalorder %s857_s11, 0 }
 0x3d8   :  { %861 = shalt.err (%p1103_p0)  }
 0x3d9   :  { %863 = vsyncmov [#allocation2 + $0xc] }
 0x3dc   :  { %s864_s30 = vpop.sfrf %863 }
 0x3dd   :  { %p1104_p1 = scmp.ne.s32.totalorder %s864_s30, 0 }
 0x3df   :  { %868 = shalt.err (%p1104_p1)  }
 0x3e0   :  { %870 = vsyncmov [#allocation2 + $0xd] }
 0x3e3   :  { %s871_s29 = vpop.sfrf %870 }
 0x3e4   :  { %p1105_p2 = scmp.ne.s32.totalorder %s871_s29, 0 }
 0x3e6   :  { %875 = shalt.err (%p1105_p2)  }
 0x3e7   :  { %877 = vsyncmov [#allocation2 + $0xe] }
 0x3ea   :  { %s878_s21 = vpop.sfrf %877 }
 0x3eb   :  { %p1106_p7 = scmp.ne.s32.totalorder %s878_s21, 0 }
 0x3ed   :  { %882 = shalt.err (%p1106_p7)  }
 0x3ee   :  { %884 = vsyncmov [#allocation2 + $0xf] }
 0x3f1   :  { %s885_s4 = vpop.sfrf %884 }
 0x3f2   :  { %p1107_p3 = scmp.ne.s32.totalorder %s885_s4, 0 }
 0x3f4   :  { %889 = shalt.err (%p1107_p3)  }

</bundles_post_ra>
